<compile_context>
chip_gen: v5e
topology: v5e:2x2
jax: 0.10.0
libtpu: 0.0.40
codegen_flags: <defaults>
</compile_context>

<pallas_src>
import functools
import math

import jax
import jax.numpy as jnp
from jax.experimental import pallas as pl
from jax.experimental.pallas import tpu as pltpu


# ------------------------------ Pallas kernel ------------------------------ #

def _convxx_kernel(x_ref, w1_ref, b1_ref, w2_ref, b2_ref, alpha_ref, out_ref,
                   *, K1, K2, H, W, C, N):
    """Fused conv1+PReLU+conv2+PReLU+residual on a packed (N*C, H*W) slab.

    x_ref    : VMEM (N*C, H*W)            input, sublane = (n, c), lane = flat hw
    w*_ref   : VMEM (K*K*C, N*C, 1)        per-(tap, co) weight columns
    b*_ref   : VMEM (N*C, 1)               bias columns (per co, tiled over n)
    alpha_ref: SMEM (1,)                   shared PReLU alpha
    out_ref  : VMEM (N*C, H*W)             output slab
    """
    NC = N * C
    HW = H * W

    # Whole input slab: (8, 256) f32 = two dense vregs, loaded once.
    x = x_ref[...].astype(jnp.float32)

    # --- hoisted flat-index -> (h, w) decomposition (built once) ----------- #
    p_idx = jax.lax.broadcasted_iota(jnp.int32, (1, HW), 1)
    if (W & (W - 1)) == 0:                      # power-of-two fast path
        h_idx = jnp.right_shift(p_idx, W.bit_length() - 1)
        w_idx = jnp.bitwise_and(p_idx, W - 1)
    else:
        h_idx = p_idx // W
        w_idx = p_idx - h_idx * W

    # --- hoisted boundary masks, shared by BOTH convs ---------------------- #
    pad_max = max(K1, K2) // 2
    masks = {}
    for dh in range(-pad_max, pad_max + 1):
        for dw in range(-pad_max, pad_max + 1):
            conds = []
            if dh < 0:
                conds.append(h_idx >= -dh)
            if dh > 0:
                conds.append(h_idx < H - dh)
            if dw < 0:
                conds.append(w_idx >= -dw)
            if dw > 0:
                conds.append(w_idx < W - dw)
            if conds:
                m = conds[0]
                for extra in conds[1:]:
                    m = m & extra
                masks[(dh, dw)] = m             # (1, HW) bool, bcast over sublanes
            else:
                masks[(dh, dw)] = None          # centre tap: no mask needed

    # Sublane -> channel index, for assembling the packed output.
    ch_iota = jax.lax.broadcasted_iota(jnp.int32, (NC, 1), 0) % C

    alpha = alpha_ref[0]

    def prelu(v):
        return jnp.where(v > 0, v, alpha * v)

    def conv(slab, w_ref, b_ref, K):
        """KxK same-padded conv on a packed (NC, HW) slab.

        Per tap: ONE lane roll + ONE boundary-mask select for the whole slab,
        then C multiply-accumulates with (NC, 1) weight columns.
        Returns the packed conv output (NC, HW), sublane = (n, co), bias added.
        """
        pad = K // 2
        acc = [jnp.zeros((NC, HW), jnp.float32) for _ in range(C)]
        for kh in range(K):
            dh = kh - pad
            for kw in range(K):
                dw = kw - pad
                if dh == 0 and dw == 0:
                    tap = slab
                else:
                    # out[p] needs x[p + dh*W + dw]: static lane rotation (XLU)
                    # + shared zero-mask of wrapped positions.
                    shift = (-(dh * W + dw)) % HW
                    tap = pltpu.roll(slab, shift, axis=1)
                    tap = jnp.where(masks[(dh, dw)], tap, 0.0)
                t = kh * K + kw
                for co in range(C):
                    wcol = w_ref[t * C + co]          # (NC, 1): varies over (n, ci)
                    acc[co] = acc[co] + wcol * tap    # lane-broadcast FMA on VPU
        # Reduce over ci (groups of C consecutive sublanes) and assemble the
        # packed (sublane = n*C + co) output slab.
        out = None
        for co in range(C):
            red = acc[co]
            for d in range(1, C):                     # rows n*C get sum over ci
                red = red + pltpu.roll(acc[co], (NC - d) % NC, axis=0)
            if co:                                    # move valid rows to n*C+co
                red = pltpu.roll(red, co, axis=0)
            out = red if out is None else jnp.where(ch_iota == co, red, out)
        return out + b_ref[...]                       # (NC, 1) bias column

    h1 = prelu(conv(x, w1_ref, b1_ref, K1))           # conv1 + PReLU
    h2 = prelu(conv(h1, w2_ref, b2_ref, K2))          # conv2 + PReLU
    # Residual add + single dense (NC, HW) store (unmasked vst).
    out_ref[...] = (h2 + x).astype(out_ref.dtype)


# ------------------------------ JAX wrapper -------------------------------- #

def convxx_forward(x_nchw, params):
    """Reproduces ConvXX.forward.  Input/output are NCHW like PyTorch."""
    N, C, H, W = x_nchw.shape
    HW = H * W
    NC = N * C

    w1, b1 = params["w1"], params["b1"]
    w2, b2 = params["w2"], params["b2"]
    alpha = params["alpha"]

    Cout, Cin, K1, K1b = w1.shape
    K2 = w2.shape[-1]
    assert K1 == K1b and K1 % 2 == 1 and K2 % 2 == 1, (
        "same-padding logic assumes odd kernel sizes")
    assert Cin == C and Cout == C and w2.shape[:2] == (C, C), (
        "ConvXX's residual/conv2 require in_chan == out_chan")

    def weight_cols(w, K):
        # (Cout, Cin, K, K) -> (K, K, Cout, Cin) -> (K*K*Cout, Cin),
        # then tile over the batch so column (n*C + ci) carries w[co, ci, kh, kw].
        wt = jnp.transpose(w, (2, 3, 0, 1)).reshape(K * K * C, C)
        return jnp.tile(wt, (1, N)).reshape(K * K * C, NC, 1).astype(jnp.float32)

    w1_cols = weight_cols(w1, K1)                      # (K1*K1*C, NC, 1)
    w2_cols = weight_cols(w2, K2)                      # (K2*K2*C, NC, 1)
    b1_col = jnp.tile(b1.astype(jnp.float32), N).reshape(NC, 1)
    b2_col = jnp.tile(b2.astype(jnp.float32), N).reshape(NC, 1)
    alpha_arr = jnp.reshape(alpha, (1,)).astype(jnp.float32)

    # Free reshape: (N, C, H, W) -> (N*C, H*W); sublane = (n, c), lane = hw.
    x_slab = x_nchw.reshape(NC, HW)

    kernel = functools.partial(_convxx_kernel, K1=K1, K2=K2, H=H, W=W, C=C, N=N)

    vmem = lambda: pl.BlockSpec(memory_space=pltpu.MemorySpace.VMEM)
    smem = lambda: pl.BlockSpec(memory_space=pltpu.MemorySpace.SMEM)

    # Single invocation (no grid): whole batch fits in a few KB of VMEM, and a
    # grid would only add per-step overhead on single-TC chips.
    out_slab = pl.pallas_call(
        kernel,
        out_shape=jax.ShapeDtypeStruct((NC, HW), x_nchw.dtype),
        in_specs=[vmem(),    # x slab
                  vmem(),    # w1 columns
                  vmem(),    # b1 column
                  vmem(),    # w2 columns
                  vmem(),    # b2 column
                  smem()],   # alpha scalar
        out_specs=vmem(),
    )(x_slab, w1_cols, b1_col, w2_cols, b2_col, alpha_arr)

    return out_slab.reshape(N, C, H, W)


# ------------------------- reference & parameter init ----------------------- #

def reference_forward(x, params):
    """Pure-JAX/XLA reference of ConvXX.forward (NCHW, f32)."""
    def conv(inp, w, b):
        pad = w.shape[-1] // 2
        dn = jax.lax.conv_dimension_numbers(inp.shape, w.shape,
                                            ("NCHW", "OIHW", "NCHW"))
        y = jax.lax.conv_general_dilated(
            inp, w, window_strides=(1, 1), padding=[(pad, pad), (pad, pad)],
            dimension_numbers=dn, precision=jax.lax.Precision.HIGHEST)
        return y + b[None, :, None, None]

    a = params["alpha"]
    prelu = lambda t: jnp.where(t > 0, t, a * t)
    x1 = prelu(conv(x, params["w1"], params["b1"]))
    x1 = prelu(conv(x1, params["w2"], params["b2"]))
    return x1 + x


def init_params(key, kernel_size, in_chan, out_chan):
    """Deterministic init mirroring PyTorch's Conv2d/PReLU defaults & shapes."""
    k1, k2, k3, k4 = jax.random.split(key, 4)
    fan1 = in_chan * kernel_size * kernel_size
    bound1 = 1.0 / math.sqrt(fan1)
    w1 = jax.random.uniform(k1, (out_chan, in_chan, kernel_size, kernel_size),
                            jnp.float32, -bound1, bound1)
    b1 = jax.random.uniform(k2, (out_chan,), jnp.float32, -bound1, bound1)

    fan2 = in_chan * 3 * 3
    bound2 = 1.0 / math.sqrt(fan2)
    w2 = jax.random.uniform(k3, (out_chan, in_chan, 3, 3),
                            jnp.float32, -bound2, bound2)
    b2 = jax.random.uniform(k4, (out_chan,), jnp.float32, -bound2, bound2)

    alpha = jnp.float32(0.25)   # nn.PReLU() default, shared by both activations
    return dict(w1=w1, b1=b1, w2=w2, b2=b2, alpha=alpha)


if __name__ == "__main__":
    key = jax.random.PRNGKey(0)
    kx, kp = jax.random.split(key)

    # ConvXX(kernel_size=5, in_chan=4, out_chan=4)
    N, C, H, W = 2, 4, 16, 16
    kernel_size = 5

    x = jax.random.normal(kx, (N, C, H, W), jnp.float32)   # NCHW like PyTorch
    params = init_params(kp, kernel_size, C, C)

    fwd = jax.jit(convxx_forward)
    out = fwd(x, params)
    jax.block_until_ready(out)
    assert out.shape == (N, C, H, W) and out.dtype == jnp.float32

    # Correctness vs. pure-JAX/XLA reference (full f32 precision).
    ref = reference_forward(x, params)
    max_err = float(jnp.max(jnp.abs(out - ref)))
    assert max_err < 2e-4, f"max abs err vs reference: {max_err}"

    print("KERNEL_OK")
</pallas_src>

<mosaic_0001>
module attributes {stable_mosaic.version = 11 : i64} {
  func.func @_convxx_kernel(%arg0: memref<8x256xf32, #tpu.memory_space<vmem>>, %arg1: memref<100x8x1xf32, #tpu.memory_space<vmem>>, %arg2: memref<8x1xf32, #tpu.memory_space<vmem>>, %arg3: memref<36x8x1xf32, #tpu.memory_space<vmem>>, %arg4: memref<8x1xf32, #tpu.memory_space<vmem>>, %arg5: memref<1xf32, #tpu.memory_space<smem>>, %arg6: memref<8x256xf32, #tpu.memory_space<vmem>>) attributes {dimension_semantics = [], scalar_prefetch = 0 : i64, scratch_operands = 0 : i64, tpu.core_type = #tpu.core_type<tc>} {
    %c0 = arith.constant 0 : index
    %c0_0 = arith.constant 0 : index
    %0 = vector.load %arg0[%c0, %c0_0] : memref<8x256xf32, #tpu.memory_space<vmem>>, vector<8x256xf32>
    %1 = tpu.iota {dimensions = array<i32: 1>} : vector<1x256xi32>
    %c4_i32 = arith.constant 4 : i32
    %2 = vector.broadcast %c4_i32 : i32 to vector<1x256xi32>
    %3 = arith.shrsi %1, %2 : vector<1x256xi32>
    %c15_i32 = arith.constant 15 : i32
    %4 = vector.broadcast %c15_i32 : i32 to vector<1x256xi32>
    %5 = arith.andi %1, %4 : vector<1x256xi32>
    %c2_i32 = arith.constant 2 : i32
    %6 = vector.broadcast %c2_i32 : i32 to vector<1x256xi32>
    %7 = arith.cmpi sge, %3, %6 : vector<1x256xi32>
    %c2_i32_1 = arith.constant 2 : i32
    %8 = vector.broadcast %c2_i32_1 : i32 to vector<1x256xi32>
    %9 = arith.cmpi sge, %5, %8 : vector<1x256xi32>
    %10 = arith.andi %7, %9 : vector<1x256xi1>
    %c2_i32_2 = arith.constant 2 : i32
    %11 = vector.broadcast %c2_i32_2 : i32 to vector<1x256xi32>
    %12 = arith.cmpi sge, %3, %11 : vector<1x256xi32>
    %c1_i32 = arith.constant 1 : i32
    %13 = vector.broadcast %c1_i32 : i32 to vector<1x256xi32>
    %14 = arith.cmpi sge, %5, %13 : vector<1x256xi32>
    %15 = arith.andi %12, %14 : vector<1x256xi1>
    %c2_i32_3 = arith.constant 2 : i32
    %16 = vector.broadcast %c2_i32_3 : i32 to vector<1x256xi32>
    %17 = arith.cmpi sge, %3, %16 : vector<1x256xi32>
    %c2_i32_4 = arith.constant 2 : i32
    %18 = vector.broadcast %c2_i32_4 : i32 to vector<1x256xi32>
    %19 = arith.cmpi sge, %3, %18 : vector<1x256xi32>
    %c15_i32_5 = arith.constant 15 : i32
    %20 = vector.broadcast %c15_i32_5 : i32 to vector<1x256xi32>
    %21 = arith.cmpi slt, %5, %20 : vector<1x256xi32>
    %22 = arith.andi %19, %21 : vector<1x256xi1>
    %c2_i32_6 = arith.constant 2 : i32
    %23 = vector.broadcast %c2_i32_6 : i32 to vector<1x256xi32>
    %24 = arith.cmpi sge, %3, %23 : vector<1x256xi32>
    %c14_i32 = arith.constant 14 : i32
    %25 = vector.broadcast %c14_i32 : i32 to vector<1x256xi32>
    %26 = arith.cmpi slt, %5, %25 : vector<1x256xi32>
    %27 = arith.andi %24, %26 : vector<1x256xi1>
    %c1_i32_7 = arith.constant 1 : i32
    %28 = vector.broadcast %c1_i32_7 : i32 to vector<1x256xi32>
    %29 = arith.cmpi sge, %3, %28 : vector<1x256xi32>
    %c2_i32_8 = arith.constant 2 : i32
    %30 = vector.broadcast %c2_i32_8 : i32 to vector<1x256xi32>
    %31 = arith.cmpi sge, %5, %30 : vector<1x256xi32>
    %32 = arith.andi %29, %31 : vector<1x256xi1>
    %c1_i32_9 = arith.constant 1 : i32
    %33 = vector.broadcast %c1_i32_9 : i32 to vector<1x256xi32>
    %34 = arith.cmpi sge, %3, %33 : vector<1x256xi32>
    %c1_i32_10 = arith.constant 1 : i32
    %35 = vector.broadcast %c1_i32_10 : i32 to vector<1x256xi32>
    %36 = arith.cmpi sge, %5, %35 : vector<1x256xi32>
    %37 = arith.andi %34, %36 : vector<1x256xi1>
    %c1_i32_11 = arith.constant 1 : i32
    %38 = vector.broadcast %c1_i32_11 : i32 to vector<1x256xi32>
    %39 = arith.cmpi sge, %3, %38 : vector<1x256xi32>
    %c1_i32_12 = arith.constant 1 : i32
    %40 = vector.broadcast %c1_i32_12 : i32 to vector<1x256xi32>
    %41 = arith.cmpi sge, %3, %40 : vector<1x256xi32>
    %c15_i32_13 = arith.constant 15 : i32
    %42 = vector.broadcast %c15_i32_13 : i32 to vector<1x256xi32>
    %43 = arith.cmpi slt, %5, %42 : vector<1x256xi32>
    %44 = arith.andi %41, %43 : vector<1x256xi1>
    %c1_i32_14 = arith.constant 1 : i32
    %45 = vector.broadcast %c1_i32_14 : i32 to vector<1x256xi32>
    %46 = arith.cmpi sge, %3, %45 : vector<1x256xi32>
    %c14_i32_15 = arith.constant 14 : i32
    %47 = vector.broadcast %c14_i32_15 : i32 to vector<1x256xi32>
    %48 = arith.cmpi slt, %5, %47 : vector<1x256xi32>
    %49 = arith.andi %46, %48 : vector<1x256xi1>
    %c2_i32_16 = arith.constant 2 : i32
    %50 = vector.broadcast %c2_i32_16 : i32 to vector<1x256xi32>
    %51 = arith.cmpi sge, %5, %50 : vector<1x256xi32>
    %c1_i32_17 = arith.constant 1 : i32
    %52 = vector.broadcast %c1_i32_17 : i32 to vector<1x256xi32>
    %53 = arith.cmpi sge, %5, %52 : vector<1x256xi32>
    %c15_i32_18 = arith.constant 15 : i32
    %54 = vector.broadcast %c15_i32_18 : i32 to vector<1x256xi32>
    %55 = arith.cmpi slt, %5, %54 : vector<1x256xi32>
    %c14_i32_19 = arith.constant 14 : i32
    %56 = vector.broadcast %c14_i32_19 : i32 to vector<1x256xi32>
    %57 = arith.cmpi slt, %5, %56 : vector<1x256xi32>
    %c15_i32_20 = arith.constant 15 : i32
    %58 = vector.broadcast %c15_i32_20 : i32 to vector<1x256xi32>
    %59 = arith.cmpi slt, %3, %58 : vector<1x256xi32>
    %c2_i32_21 = arith.constant 2 : i32
    %60 = vector.broadcast %c2_i32_21 : i32 to vector<1x256xi32>
    %61 = arith.cmpi sge, %5, %60 : vector<1x256xi32>
    %62 = arith.andi %59, %61 : vector<1x256xi1>
    %c15_i32_22 = arith.constant 15 : i32
    %63 = vector.broadcast %c15_i32_22 : i32 to vector<1x256xi32>
    %64 = arith.cmpi slt, %3, %63 : vector<1x256xi32>
    %c1_i32_23 = arith.constant 1 : i32
    %65 = vector.broadcast %c1_i32_23 : i32 to vector<1x256xi32>
    %66 = arith.cmpi sge, %5, %65 : vector<1x256xi32>
    %67 = arith.andi %64, %66 : vector<1x256xi1>
    %c15_i32_24 = arith.constant 15 : i32
    %68 = vector.broadcast %c15_i32_24 : i32 to vector<1x256xi32>
    %69 = arith.cmpi slt, %3, %68 : vector<1x256xi32>
    %c15_i32_25 = arith.constant 15 : i32
    %70 = vector.broadcast %c15_i32_25 : i32 to vector<1x256xi32>
    %71 = arith.cmpi slt, %3, %70 : vector<1x256xi32>
    %c15_i32_26 = arith.constant 15 : i32
    %72 = vector.broadcast %c15_i32_26 : i32 to vector<1x256xi32>
    %73 = arith.cmpi slt, %5, %72 : vector<1x256xi32>
    %74 = arith.andi %71, %73 : vector<1x256xi1>
    %c15_i32_27 = arith.constant 15 : i32
    %75 = vector.broadcast %c15_i32_27 : i32 to vector<1x256xi32>
    %76 = arith.cmpi slt, %3, %75 : vector<1x256xi32>
    %c14_i32_28 = arith.constant 14 : i32
    %77 = vector.broadcast %c14_i32_28 : i32 to vector<1x256xi32>
    %78 = arith.cmpi slt, %5, %77 : vector<1x256xi32>
    %79 = arith.andi %76, %78 : vector<1x256xi1>
    %c14_i32_29 = arith.constant 14 : i32
    %80 = vector.broadcast %c14_i32_29 : i32 to vector<1x256xi32>
    %81 = arith.cmpi slt, %3, %80 : vector<1x256xi32>
    %c2_i32_30 = arith.constant 2 : i32
    %82 = vector.broadcast %c2_i32_30 : i32 to vector<1x256xi32>
    %83 = arith.cmpi sge, %5, %82 : vector<1x256xi32>
    %84 = arith.andi %81, %83 : vector<1x256xi1>
    %c14_i32_31 = arith.constant 14 : i32
    %85 = vector.broadcast %c14_i32_31 : i32 to vector<1x256xi32>
    %86 = arith.cmpi slt, %3, %85 : vector<1x256xi32>
    %c1_i32_32 = arith.constant 1 : i32
    %87 = vector.broadcast %c1_i32_32 : i32 to vector<1x256xi32>
    %88 = arith.cmpi sge, %5, %87 : vector<1x256xi32>
    %89 = arith.andi %86, %88 : vector<1x256xi1>
    %c14_i32_33 = arith.constant 14 : i32
    %90 = vector.broadcast %c14_i32_33 : i32 to vector<1x256xi32>
    %91 = arith.cmpi slt, %3, %90 : vector<1x256xi32>
    %c14_i32_34 = arith.constant 14 : i32
    %92 = vector.broadcast %c14_i32_34 : i32 to vector<1x256xi32>
    %93 = arith.cmpi slt, %3, %92 : vector<1x256xi32>
    %c15_i32_35 = arith.constant 15 : i32
    %94 = vector.broadcast %c15_i32_35 : i32 to vector<1x256xi32>
    %95 = arith.cmpi slt, %5, %94 : vector<1x256xi32>
    %96 = arith.andi %93, %95 : vector<1x256xi1>
    %c14_i32_36 = arith.constant 14 : i32
    %97 = vector.broadcast %c14_i32_36 : i32 to vector<1x256xi32>
    %98 = arith.cmpi slt, %3, %97 : vector<1x256xi32>
    %c14_i32_37 = arith.constant 14 : i32
    %99 = vector.broadcast %c14_i32_37 : i32 to vector<1x256xi32>
    %100 = arith.cmpi slt, %5, %99 : vector<1x256xi32>
    %101 = arith.andi %98, %100 : vector<1x256xi1>
    %102 = tpu.iota {dimensions = array<i32: 0>} : vector<8x1xi32>
    %c4_i32_38 = arith.constant 4 : i32
    %c0_i32 = arith.constant 0 : i32
    %103 = arith.cmpi eq, %c4_i32_38, %c0_i32 : i32
    %c1_i32_39 = arith.constant 1 : i32
    %104 = arith.select %103, %c1_i32_39, %c4_i32_38 : i32
    %105 = vector.broadcast %104 : i32 to vector<8x1xi32>
    %106 = arith.remsi %102, %105 : vector<8x1xi32>
    %c0_i32_40 = arith.constant 0 : i32
    %107 = vector.broadcast %c0_i32_40 : i32 to vector<8x1xi32>
    %108 = arith.cmpi ne, %106, %107 : vector<8x1xi32>
    %c0_i32_41 = arith.constant 0 : i32
    %109 = vector.broadcast %c0_i32_41 : i32 to vector<8x1xi32>
    %110 = arith.cmpi slt, %106, %109 : vector<8x1xi32>
    %c0_i32_42 = arith.constant 0 : i32
    %111 = arith.cmpi slt, %104, %c0_i32_42 : i32
    %112 = vector.broadcast %111 : i1 to vector<8x1xi1>
    %113 = vector.broadcast %112 : vector<8x1xi1> to vector<8x1xi1>
    %114 = arith.xori %110, %113 : vector<8x1xi1>
    %115 = arith.andi %114, %108 : vector<8x1xi1>
    %116 = vector.broadcast %104 : i32 to vector<8x1xi32>
    %117 = arith.addi %106, %116 : vector<8x1xi32>
    %118 = arith.select %115, %117, %106 : vector<8x1xi1>, vector<8x1xi32>
    %c0_43 = arith.constant 0 : index
    %119 = memref.load %arg5[%c0_43] : memref<1xf32, #tpu.memory_space<smem>>
    %cst = arith.constant 0.000000e+00 : f32
    %120 = vector.broadcast %cst : f32 to vector<8x256xf32>
    %cst_44 = arith.constant 0.000000e+00 : f32
    %121 = vector.broadcast %cst_44 : f32 to vector<8x256xf32>
    %cst_45 = arith.constant 0.000000e+00 : f32
    %122 = vector.broadcast %cst_45 : f32 to vector<8x256xf32>
    %cst_46 = arith.constant 0.000000e+00 : f32
    %123 = vector.broadcast %cst_46 : f32 to vector<8x256xf32>
    %c34_i32 = arith.constant 34 : i32
    %124 = tpu.dynamic_rotate %0 by %c34_i32 dim 1 : vector<8x256xf32>, i32 -> vector<8x256xf32>
    %cst_47 = arith.constant 0.000000e+00 : f32
    %125 = vector.shape_cast %10 : vector<1x256xi1> to vector<1x256xi1>
    %126 = vector.broadcast %125 : vector<1x256xi1> to vector<8x256xi1>
    %127 = vector.broadcast %cst_47 : f32 to vector<8x256xf32>
    %128 = arith.select %126, %124, %127 : vector<8x256xi1>, vector<8x256xf32>
    %c0_48 = arith.constant 0 : index
    %c0_49 = arith.constant 0 : index
    %c0_50 = arith.constant 0 : index
    %129 = vector.load %arg1[%c0_48, %c0_49, %c0_50] : memref<100x8x1xf32, #tpu.memory_space<vmem>>, vector<1x8x1xf32>
    %130 = vector.shape_cast %129 : vector<1x8x1xf32> to vector<8x1xf32>
    %131 = vector.broadcast %130 : vector<8x1xf32> to vector<8x256xf32>
    %132 = arith.mulf %131, %128 : vector<8x256xf32>
    %133 = arith.addf %120, %132 : vector<8x256xf32>
    %c1 = arith.constant 1 : index
    %c0_51 = arith.constant 0 : index
    %c0_52 = arith.constant 0 : index
    %134 = vector.load %arg1[%c1, %c0_51, %c0_52] : memref<100x8x1xf32, #tpu.memory_space<vmem>>, vector<1x8x1xf32>
    %135 = vector.shape_cast %134 : vector<1x8x1xf32> to vector<8x1xf32>
    %136 = vector.broadcast %135 : vector<8x1xf32> to vector<8x256xf32>
    %137 = arith.mulf %136, %128 : vector<8x256xf32>
    %138 = arith.addf %121, %137 : vector<8x256xf32>
    %c2 = arith.constant 2 : index
    %c0_53 = arith.constant 0 : index
    %c0_54 = arith.constant 0 : index
    %139 = vector.load %arg1[%c2, %c0_53, %c0_54] : memref<100x8x1xf32, #tpu.memory_space<vmem>>, vector<1x8x1xf32>
    %140 = vector.shape_cast %139 : vector<1x8x1xf32> to vector<8x1xf32>
    %141 = vector.broadcast %140 : vector<8x1xf32> to vector<8x256xf32>
    %142 = arith.mulf %141, %128 : vector<8x256xf32>
    %143 = arith.addf %122, %142 : vector<8x256xf32>
    %c3 = arith.constant 3 : index
    %c0_55 = arith.constant 0 : index
    %c0_56 = arith.constant 0 : index
    %144 = vector.load %arg1[%c3, %c0_55, %c0_56] : memref<100x8x1xf32, #tpu.memory_space<vmem>>, vector<1x8x1xf32>
    %145 = vector.shape_cast %144 : vector<1x8x1xf32> to vector<8x1xf32>
    %146 = vector.broadcast %145 : vector<8x1xf32> to vector<8x256xf32>
    %147 = arith.mulf %146, %128 : vector<8x256xf32>
    %148 = arith.addf %123, %147 : vector<8x256xf32>
    %c33_i32 = arith.constant 33 : i32
    %149 = tpu.dynamic_rotate %0 by %c33_i32 dim 1 : vector<8x256xf32>, i32 -> vector<8x256xf32>
    %cst_57 = arith.constant 0.000000e+00 : f32
    %150 = vector.shape_cast %15 : vector<1x256xi1> to vector<1x256xi1>
    %151 = vector.broadcast %150 : vector<1x256xi1> to vector<8x256xi1>
    %152 = vector.broadcast %cst_57 : f32 to vector<8x256xf32>
    %153 = arith.select %151, %149, %152 : vector<8x256xi1>, vector<8x256xf32>
    %c4 = arith.constant 4 : index
    %c0_58 = arith.constant 0 : index
    %c0_59 = arith.constant 0 : index
    %154 = vector.load %arg1[%c4, %c0_58, %c0_59] : memref<100x8x1xf32, #tpu.memory_space<vmem>>, vector<1x8x1xf32>
    %155 = vector.shape_cast %154 : vector<1x8x1xf32> to vector<8x1xf32>
    %156 = vector.broadcast %155 : vector<8x1xf32> to vector<8x256xf32>
    %157 = arith.mulf %156, %153 : vector<8x256xf32>
    %158 = arith.addf %133, %157 : vector<8x256xf32>
    %c5 = arith.constant 5 : index
    %c0_60 = arith.constant 0 : index
    %c0_61 = arith.constant 0 : index
    %159 = vector.load %arg1[%c5, %c0_60, %c0_61] : memref<100x8x1xf32, #tpu.memory_space<vmem>>, vector<1x8x1xf32>
    %160 = vector.shape_cast %159 : vector<1x8x1xf32> to vector<8x1xf32>
    %161 = vector.broadcast %160 : vector<8x1xf32> to vector<8x256xf32>
    %162 = arith.mulf %161, %153 : vector<8x256xf32>
    %163 = arith.addf %138, %162 : vector<8x256xf32>
    %c6 = arith.constant 6 : index
    %c0_62 = arith.constant 0 : index
    %c0_63 = arith.constant 0 : index
    %164 = vector.load %arg1[%c6, %c0_62, %c0_63] : memref<100x8x1xf32, #tpu.memory_space<vmem>>, vector<1x8x1xf32>
    %165 = vector.shape_cast %164 : vector<1x8x1xf32> to vector<8x1xf32>
    %166 = vector.broadcast %165 : vector<8x1xf32> to vector<8x256xf32>
    %167 = arith.mulf %166, %153 : vector<8x256xf32>
    %168 = arith.addf %143, %167 : vector<8x256xf32>
    %c7 = arith.constant 7 : index
    %c0_64 = arith.constant 0 : index
    %c0_65 = arith.constant 0 : index
    %169 = vector.load %arg1[%c7, %c0_64, %c0_65] : memref<100x8x1xf32, #tpu.memory_space<vmem>>, vector<1x8x1xf32>
    %170 = vector.shape_cast %169 : vector<1x8x1xf32> to vector<8x1xf32>
    %171 = vector.broadcast %170 : vector<8x1xf32> to vector<8x256xf32>
    %172 = arith.mulf %171, %153 : vector<8x256xf32>
    %173 = arith.addf %148, %172 : vector<8x256xf32>
    %c32_i32 = arith.constant 32 : i32
    %174 = tpu.dynamic_rotate %0 by %c32_i32 dim 1 : vector<8x256xf32>, i32 -> vector<8x256xf32>
    %cst_66 = arith.constant 0.000000e+00 : f32
    %175 = vector.shape_cast %17 : vector<1x256xi1> to vector<1x256xi1>
    %176 = vector.broadcast %175 : vector<1x256xi1> to vector<8x256xi1>
    %177 = vector.broadcast %cst_66 : f32 to vector<8x256xf32>
    %178 = arith.select %176, %174, %177 : vector<8x256xi1>, vector<8x256xf32>
    %c8 = arith.constant 8 : index
    %c0_67 = arith.constant 0 : index
    %c0_68 = arith.constant 0 : index
    %179 = vector.load %arg1[%c8, %c0_67, %c0_68] : memref<100x8x1xf32, #tpu.memory_space<vmem>>, vector<1x8x1xf32>
    %180 = vector.shape_cast %179 : vector<1x8x1xf32> to vector<8x1xf32>
    %181 = vector.broadcast %180 : vector<8x1xf32> to vector<8x256xf32>
    %182 = arith.mulf %181, %178 : vector<8x256xf32>
    %183 = arith.addf %158, %182 : vector<8x256xf32>
    %c9 = arith.constant 9 : index
    %c0_69 = arith.constant 0 : index
    %c0_70 = arith.constant 0 : index
    %184 = vector.load %arg1[%c9, %c0_69, %c0_70] : memref<100x8x1xf32, #tpu.memory_space<vmem>>, vector<1x8x1xf32>
    %185 = vector.shape_cast %184 : vector<1x8x1xf32> to vector<8x1xf32>
    %186 = vector.broadcast %185 : vector<8x1xf32> to vector<8x256xf32>
    %187 = arith.mulf %186, %178 : vector<8x256xf32>
    %188 = arith.addf %163, %187 : vector<8x256xf32>
    %c10 = arith.constant 10 : index
    %c0_71 = arith.constant 0 : index
    %c0_72 = arith.constant 0 : index
    %189 = vector.load %arg1[%c10, %c0_71, %c0_72] : memref<100x8x1xf32, #tpu.memory_space<vmem>>, vector<1x8x1xf32>
    %190 = vector.shape_cast %189 : vector<1x8x1xf32> to vector<8x1xf32>
    %191 = vector.broadcast %190 : vector<8x1xf32> to vector<8x256xf32>
    %192 = arith.mulf %191, %178 : vector<8x256xf32>
    %193 = arith.addf %168, %192 : vector<8x256xf32>
    %c11 = arith.constant 11 : index
    %c0_73 = arith.constant 0 : index
    %c0_74 = arith.constant 0 : index
    %194 = vector.load %arg1[%c11, %c0_73, %c0_74] : memref<100x8x1xf32, #tpu.memory_space<vmem>>, vector<1x8x1xf32>
    %195 = vector.shape_cast %194 : vector<1x8x1xf32> to vector<8x1xf32>
    %196 = vector.broadcast %195 : vector<8x1xf32> to vector<8x256xf32>
    %197 = arith.mulf %196, %178 : vector<8x256xf32>
    %198 = arith.addf %173, %197 : vector<8x256xf32>
    %c31_i32 = arith.constant 31 : i32
    %199 = tpu.dynamic_rotate %0 by %c31_i32 dim 1 : vector<8x256xf32>, i32 -> vector<8x256xf32>
    %cst_75 = arith.constant 0.000000e+00 : f32
    %200 = vector.shape_cast %22 : vector<1x256xi1> to vector<1x256xi1>
    %201 = vector.broadcast %200 : vector<1x256xi1> to vector<8x256xi1>
    %202 = vector.broadcast %cst_75 : f32 to vector<8x256xf32>
    %203 = arith.select %201, %199, %202 : vector<8x256xi1>, vector<8x256xf32>
    %c12 = arith.constant 12 : index
    %c0_76 = arith.constant 0 : index
    %c0_77 = arith.constant 0 : index
    %204 = vector.load %arg1[%c12, %c0_76, %c0_77] : memref<100x8x1xf32, #tpu.memory_space<vmem>>, vector<1x8x1xf32>
    %205 = vector.shape_cast %204 : vector<1x8x1xf32> to vector<8x1xf32>
    %206 = vector.broadcast %205 : vector<8x1xf32> to vector<8x256xf32>
    %207 = arith.mulf %206, %203 : vector<8x256xf32>
    %208 = arith.addf %183, %207 : vector<8x256xf32>
    %c13 = arith.constant 13 : index
    %c0_78 = arith.constant 0 : index
    %c0_79 = arith.constant 0 : index
    %209 = vector.load %arg1[%c13, %c0_78, %c0_79] : memref<100x8x1xf32, #tpu.memory_space<vmem>>, vector<1x8x1xf32>
    %210 = vector.shape_cast %209 : vector<1x8x1xf32> to vector<8x1xf32>
    %211 = vector.broadcast %210 : vector<8x1xf32> to vector<8x256xf32>
    %212 = arith.mulf %211, %203 : vector<8x256xf32>
    %213 = arith.addf %188, %212 : vector<8x256xf32>
    %c14 = arith.constant 14 : index
    %c0_80 = arith.constant 0 : index
    %c0_81 = arith.constant 0 : index
    %214 = vector.load %arg1[%c14, %c0_80, %c0_81] : memref<100x8x1xf32, #tpu.memory_space<vmem>>, vector<1x8x1xf32>
    %215 = vector.shape_cast %214 : vector<1x8x1xf32> to vector<8x1xf32>
    %216 = vector.broadcast %215 : vector<8x1xf32> to vector<8x256xf32>
    %217 = arith.mulf %216, %203 : vector<8x256xf32>
    %218 = arith.addf %193, %217 : vector<8x256xf32>
    %c15 = arith.constant 15 : index
    %c0_82 = arith.constant 0 : index
    %c0_83 = arith.constant 0 : index
    %219 = vector.load %arg1[%c15, %c0_82, %c0_83] : memref<100x8x1xf32, #tpu.memory_space<vmem>>, vector<1x8x1xf32>
    %220 = vector.shape_cast %219 : vector<1x8x1xf32> to vector<8x1xf32>
    %221 = vector.broadcast %220 : vector<8x1xf32> to vector<8x256xf32>
    %222 = arith.mulf %221, %203 : vector<8x256xf32>
    %223 = arith.addf %198, %222 : vector<8x256xf32>
    %c30_i32 = arith.constant 30 : i32
    %224 = tpu.dynamic_rotate %0 by %c30_i32 dim 1 : vector<8x256xf32>, i32 -> vector<8x256xf32>
    %cst_84 = arith.constant 0.000000e+00 : f32
    %225 = vector.shape_cast %27 : vector<1x256xi1> to vector<1x256xi1>
    %226 = vector.broadcast %225 : vector<1x256xi1> to vector<8x256xi1>
    %227 = vector.broadcast %cst_84 : f32 to vector<8x256xf32>
    %228 = arith.select %226, %224, %227 : vector<8x256xi1>, vector<8x256xf32>
    %c16 = arith.constant 16 : index
    %c0_85 = arith.constant 0 : index
    %c0_86 = arith.constant 0 : index
    %229 = vector.load %arg1[%c16, %c0_85, %c0_86] : memref<100x8x1xf32, #tpu.memory_space<vmem>>, vector<1x8x1xf32>
    %230 = vector.shape_cast %229 : vector<1x8x1xf32> to vector<8x1xf32>
    %231 = vector.broadcast %230 : vector<8x1xf32> to vector<8x256xf32>
    %232 = arith.mulf %231, %228 : vector<8x256xf32>
    %233 = arith.addf %208, %232 : vector<8x256xf32>
    %c17 = arith.constant 17 : index
    %c0_87 = arith.constant 0 : index
    %c0_88 = arith.constant 0 : index
    %234 = vector.load %arg1[%c17, %c0_87, %c0_88] : memref<100x8x1xf32, #tpu.memory_space<vmem>>, vector<1x8x1xf32>
    %235 = vector.shape_cast %234 : vector<1x8x1xf32> to vector<8x1xf32>
    %236 = vector.broadcast %235 : vector<8x1xf32> to vector<8x256xf32>
    %237 = arith.mulf %236, %228 : vector<8x256xf32>
    %238 = arith.addf %213, %237 : vector<8x256xf32>
    %c18 = arith.constant 18 : index
    %c0_89 = arith.constant 0 : index
    %c0_90 = arith.constant 0 : index
    %239 = vector.load %arg1[%c18, %c0_89, %c0_90] : memref<100x8x1xf32, #tpu.memory_space<vmem>>, vector<1x8x1xf32>
    %240 = vector.shape_cast %239 : vector<1x8x1xf32> to vector<8x1xf32>
    %241 = vector.broadcast %240 : vector<8x1xf32> to vector<8x256xf32>
    %242 = arith.mulf %241, %228 : vector<8x256xf32>
    %243 = arith.addf %218, %242 : vector<8x256xf32>
    %c19 = arith.constant 19 : index
    %c0_91 = arith.constant 0 : index
    %c0_92 = arith.constant 0 : index
    %244 = vector.load %arg1[%c19, %c0_91, %c0_92] : memref<100x8x1xf32, #tpu.memory_space<vmem>>, vector<1x8x1xf32>
    %245 = vector.shape_cast %244 : vector<1x8x1xf32> to vector<8x1xf32>
    %246 = vector.broadcast %245 : vector<8x1xf32> to vector<8x256xf32>
    %247 = arith.mulf %246, %228 : vector<8x256xf32>
    %248 = arith.addf %223, %247 : vector<8x256xf32>
    %c18_i32 = arith.constant 18 : i32
    %249 = tpu.dynamic_rotate %0 by %c18_i32 dim 1 : vector<8x256xf32>, i32 -> vector<8x256xf32>
    %cst_93 = arith.constant 0.000000e+00 : f32
    %250 = vector.shape_cast %32 : vector<1x256xi1> to vector<1x256xi1>
    %251 = vector.broadcast %250 : vector<1x256xi1> to vector<8x256xi1>
    %252 = vector.broadcast %cst_93 : f32 to vector<8x256xf32>
    %253 = arith.select %251, %249, %252 : vector<8x256xi1>, vector<8x256xf32>
    %c20 = arith.constant 20 : index
    %c0_94 = arith.constant 0 : index
    %c0_95 = arith.constant 0 : index
    %254 = vector.load %arg1[%c20, %c0_94, %c0_95] : memref<100x8x1xf32, #tpu.memory_space<vmem>>, vector<1x8x1xf32>
    %255 = vector.shape_cast %254 : vector<1x8x1xf32> to vector<8x1xf32>
    %256 = vector.broadcast %255 : vector<8x1xf32> to vector<8x256xf32>
    %257 = arith.mulf %256, %253 : vector<8x256xf32>
    %258 = arith.addf %233, %257 : vector<8x256xf32>
    %c21 = arith.constant 21 : index
    %c0_96 = arith.constant 0 : index
    %c0_97 = arith.constant 0 : index
    %259 = vector.load %arg1[%c21, %c0_96, %c0_97] : memref<100x8x1xf32, #tpu.memory_space<vmem>>, vector<1x8x1xf32>
    %260 = vector.shape_cast %259 : vector<1x8x1xf32> to vector<8x1xf32>
    %261 = vector.broadcast %260 : vector<8x1xf32> to vector<8x256xf32>
    %262 = arith.mulf %261, %253 : vector<8x256xf32>
    %263 = arith.addf %238, %262 : vector<8x256xf32>
    %c22 = arith.constant 22 : index
    %c0_98 = arith.constant 0 : index
    %c0_99 = arith.constant 0 : index
    %264 = vector.load %arg1[%c22, %c0_98, %c0_99] : memref<100x8x1xf32, #tpu.memory_space<vmem>>, vector<1x8x1xf32>
    %265 = vector.shape_cast %264 : vector<1x8x1xf32> to vector<8x1xf32>
    %266 = vector.broadcast %265 : vector<8x1xf32> to vector<8x256xf32>
    %267 = arith.mulf %266, %253 : vector<8x256xf32>
    %268 = arith.addf %243, %267 : vector<8x256xf32>
    %c23 = arith.constant 23 : index
    %c0_100 = arith.constant 0 : index
    %c0_101 = arith.constant 0 : index
    %269 = vector.load %arg1[%c23, %c0_100, %c0_101] : memref<100x8x1xf32, #tpu.memory_space<vmem>>, vector<1x8x1xf32>
    %270 = vector.shape_cast %269 : vector<1x8x1xf32> to vector<8x1xf32>
    %271 = vector.broadcast %270 : vector<8x1xf32> to vector<8x256xf32>
    %272 = arith.mulf %271, %253 : vector<8x256xf32>
    %273 = arith.addf %248, %272 : vector<8x256xf32>
    %c17_i32 = arith.constant 17 : i32
    %274 = tpu.dynamic_rotate %0 by %c17_i32 dim 1 : vector<8x256xf32>, i32 -> vector<8x256xf32>
    %cst_102 = arith.constant 0.000000e+00 : f32
    %275 = vector.shape_cast %37 : vector<1x256xi1> to vector<1x256xi1>
    %276 = vector.broadcast %275 : vector<1x256xi1> to vector<8x256xi1>
    %277 = vector.broadcast %cst_102 : f32 to vector<8x256xf32>
    %278 = arith.select %276, %274, %277 : vector<8x256xi1>, vector<8x256xf32>
    %c24 = arith.constant 24 : index
    %c0_103 = arith.constant 0 : index
    %c0_104 = arith.constant 0 : index
    %279 = vector.load %arg1[%c24, %c0_103, %c0_104] : memref<100x8x1xf32, #tpu.memory_space<vmem>>, vector<1x8x1xf32>
    %280 = vector.shape_cast %279 : vector<1x8x1xf32> to vector<8x1xf32>
    %281 = vector.broadcast %280 : vector<8x1xf32> to vector<8x256xf32>
    %282 = arith.mulf %281, %278 : vector<8x256xf32>
    %283 = arith.addf %258, %282 : vector<8x256xf32>
    %c25 = arith.constant 25 : index
    %c0_105 = arith.constant 0 : index
    %c0_106 = arith.constant 0 : index
    %284 = vector.load %arg1[%c25, %c0_105, %c0_106] : memref<100x8x1xf32, #tpu.memory_space<vmem>>, vector<1x8x1xf32>
    %285 = vector.shape_cast %284 : vector<1x8x1xf32> to vector<8x1xf32>
    %286 = vector.broadcast %285 : vector<8x1xf32> to vector<8x256xf32>
    %287 = arith.mulf %286, %278 : vector<8x256xf32>
    %288 = arith.addf %263, %287 : vector<8x256xf32>
    %c26 = arith.constant 26 : index
    %c0_107 = arith.constant 0 : index
    %c0_108 = arith.constant 0 : index
    %289 = vector.load %arg1[%c26, %c0_107, %c0_108] : memref<100x8x1xf32, #tpu.memory_space<vmem>>, vector<1x8x1xf32>
    %290 = vector.shape_cast %289 : vector<1x8x1xf32> to vector<8x1xf32>
    %291 = vector.broadcast %290 : vector<8x1xf32> to vector<8x256xf32>
    %292 = arith.mulf %291, %278 : vector<8x256xf32>
    %293 = arith.addf %268, %292 : vector<8x256xf32>
    %c27 = arith.constant 27 : index
    %c0_109 = arith.constant 0 : index
    %c0_110 = arith.constant 0 : index
    %294 = vector.load %arg1[%c27, %c0_109, %c0_110] : memref<100x8x1xf32, #tpu.memory_space<vmem>>, vector<1x8x1xf32>
    %295 = vector.shape_cast %294 : vector<1x8x1xf32> to vector<8x1xf32>
    %296 = vector.broadcast %295 : vector<8x1xf32> to vector<8x256xf32>
    %297 = arith.mulf %296, %278 : vector<8x256xf32>
    %298 = arith.addf %273, %297 : vector<8x256xf32>
    %c16_i32 = arith.constant 16 : i32
    %299 = tpu.dynamic_rotate %0 by %c16_i32 dim 1 : vector<8x256xf32>, i32 -> vector<8x256xf32>
    %cst_111 = arith.constant 0.000000e+00 : f32
    %300 = vector.shape_cast %39 : vector<1x256xi1> to vector<1x256xi1>
    %301 = vector.broadcast %300 : vector<1x256xi1> to vector<8x256xi1>
    %302 = vector.broadcast %cst_111 : f32 to vector<8x256xf32>
    %303 = arith.select %301, %299, %302 : vector<8x256xi1>, vector<8x256xf32>
    %c28 = arith.constant 28 : index
    %c0_112 = arith.constant 0 : index
    %c0_113 = arith.constant 0 : index
    %304 = vector.load %arg1[%c28, %c0_112, %c0_113] : memref<100x8x1xf32, #tpu.memory_space<vmem>>, vector<1x8x1xf32>
    %305 = vector.shape_cast %304 : vector<1x8x1xf32> to vector<8x1xf32>
    %306 = vector.broadcast %305 : vector<8x1xf32> to vector<8x256xf32>
    %307 = arith.mulf %306, %303 : vector<8x256xf32>
    %308 = arith.addf %283, %307 : vector<8x256xf32>
    %c29 = arith.constant 29 : index
    %c0_114 = arith.constant 0 : index
    %c0_115 = arith.constant 0 : index
    %309 = vector.load %arg1[%c29, %c0_114, %c0_115] : memref<100x8x1xf32, #tpu.memory_space<vmem>>, vector<1x8x1xf32>
    %310 = vector.shape_cast %309 : vector<1x8x1xf32> to vector<8x1xf32>
    %311 = vector.broadcast %310 : vector<8x1xf32> to vector<8x256xf32>
    %312 = arith.mulf %311, %303 : vector<8x256xf32>
    %313 = arith.addf %288, %312 : vector<8x256xf32>
    %c30 = arith.constant 30 : index
    %c0_116 = arith.constant 0 : index
    %c0_117 = arith.constant 0 : index
    %314 = vector.load %arg1[%c30, %c0_116, %c0_117] : memref<100x8x1xf32, #tpu.memory_space<vmem>>, vector<1x8x1xf32>
    %315 = vector.shape_cast %314 : vector<1x8x1xf32> to vector<8x1xf32>
    %316 = vector.broadcast %315 : vector<8x1xf32> to vector<8x256xf32>
    %317 = arith.mulf %316, %303 : vector<8x256xf32>
    %318 = arith.addf %293, %317 : vector<8x256xf32>
    %c31 = arith.constant 31 : index
    %c0_118 = arith.constant 0 : index
    %c0_119 = arith.constant 0 : index
    %319 = vector.load %arg1[%c31, %c0_118, %c0_119] : memref<100x8x1xf32, #tpu.memory_space<vmem>>, vector<1x8x1xf32>
    %320 = vector.shape_cast %319 : vector<1x8x1xf32> to vector<8x1xf32>
    %321 = vector.broadcast %320 : vector<8x1xf32> to vector<8x256xf32>
    %322 = arith.mulf %321, %303 : vector<8x256xf32>
    %323 = arith.addf %298, %322 : vector<8x256xf32>
    %c15_i32_120 = arith.constant 15 : i32
    %324 = tpu.dynamic_rotate %0 by %c15_i32_120 dim 1 : vector<8x256xf32>, i32 -> vector<8x256xf32>
    %cst_121 = arith.constant 0.000000e+00 : f32
    %325 = vector.shape_cast %44 : vector<1x256xi1> to vector<1x256xi1>
    %326 = vector.broadcast %325 : vector<1x256xi1> to vector<8x256xi1>
    %327 = vector.broadcast %cst_121 : f32 to vector<8x256xf32>
    %328 = arith.select %326, %324, %327 : vector<8x256xi1>, vector<8x256xf32>
    %c32 = arith.constant 32 : index
    %c0_122 = arith.constant 0 : index
    %c0_123 = arith.constant 0 : index
    %329 = vector.load %arg1[%c32, %c0_122, %c0_123] : memref<100x8x1xf32, #tpu.memory_space<vmem>>, vector<1x8x1xf32>
    %330 = vector.shape_cast %329 : vector<1x8x1xf32> to vector<8x1xf32>
    %331 = vector.broadcast %330 : vector<8x1xf32> to vector<8x256xf32>
    %332 = arith.mulf %331, %328 : vector<8x256xf32>
    %333 = arith.addf %308, %332 : vector<8x256xf32>
    %c33 = arith.constant 33 : index
    %c0_124 = arith.constant 0 : index
    %c0_125 = arith.constant 0 : index
    %334 = vector.load %arg1[%c33, %c0_124, %c0_125] : memref<100x8x1xf32, #tpu.memory_space<vmem>>, vector<1x8x1xf32>
    %335 = vector.shape_cast %334 : vector<1x8x1xf32> to vector<8x1xf32>
    %336 = vector.broadcast %335 : vector<8x1xf32> to vector<8x256xf32>
    %337 = arith.mulf %336, %328 : vector<8x256xf32>
    %338 = arith.addf %313, %337 : vector<8x256xf32>
    %c34 = arith.constant 34 : index
    %c0_126 = arith.constant 0 : index
    %c0_127 = arith.constant 0 : index
    %339 = vector.load %arg1[%c34, %c0_126, %c0_127] : memref<100x8x1xf32, #tpu.memory_space<vmem>>, vector<1x8x1xf32>
    %340 = vector.shape_cast %339 : vector<1x8x1xf32> to vector<8x1xf32>
    %341 = vector.broadcast %340 : vector<8x1xf32> to vector<8x256xf32>
    %342 = arith.mulf %341, %328 : vector<8x256xf32>
    %343 = arith.addf %318, %342 : vector<8x256xf32>
    %c35 = arith.constant 35 : index
    %c0_128 = arith.constant 0 : index
    %c0_129 = arith.constant 0 : index
    %344 = vector.load %arg1[%c35, %c0_128, %c0_129] : memref<100x8x1xf32, #tpu.memory_space<vmem>>, vector<1x8x1xf32>
    %345 = vector.shape_cast %344 : vector<1x8x1xf32> to vector<8x1xf32>
    %346 = vector.broadcast %345 : vector<8x1xf32> to vector<8x256xf32>
    %347 = arith.mulf %346, %328 : vector<8x256xf32>
    %348 = arith.addf %323, %347 : vector<8x256xf32>
    %c14_i32_130 = arith.constant 14 : i32
    %349 = tpu.dynamic_rotate %0 by %c14_i32_130 dim 1 : vector<8x256xf32>, i32 -> vector<8x256xf32>
    %cst_131 = arith.constant 0.000000e+00 : f32
    %350 = vector.shape_cast %49 : vector<1x256xi1> to vector<1x256xi1>
    %351 = vector.broadcast %350 : vector<1x256xi1> to vector<8x256xi1>
    %352 = vector.broadcast %cst_131 : f32 to vector<8x256xf32>
    %353 = arith.select %351, %349, %352 : vector<8x256xi1>, vector<8x256xf32>
    %c36 = arith.constant 36 : index
    %c0_132 = arith.constant 0 : index
    %c0_133 = arith.constant 0 : index
    %354 = vector.load %arg1[%c36, %c0_132, %c0_133] : memref<100x8x1xf32, #tpu.memory_space<vmem>>, vector<1x8x1xf32>
    %355 = vector.shape_cast %354 : vector<1x8x1xf32> to vector<8x1xf32>
    %356 = vector.broadcast %355 : vector<8x1xf32> to vector<8x256xf32>
    %357 = arith.mulf %356, %353 : vector<8x256xf32>
    %358 = arith.addf %333, %357 : vector<8x256xf32>
    %c37 = arith.constant 37 : index
    %c0_134 = arith.constant 0 : index
    %c0_135 = arith.constant 0 : index
    %359 = vector.load %arg1[%c37, %c0_134, %c0_135] : memref<100x8x1xf32, #tpu.memory_space<vmem>>, vector<1x8x1xf32>
    %360 = vector.shape_cast %359 : vector<1x8x1xf32> to vector<8x1xf32>
    %361 = vector.broadcast %360 : vector<8x1xf32> to vector<8x256xf32>
    %362 = arith.mulf %361, %353 : vector<8x256xf32>
    %363 = arith.addf %338, %362 : vector<8x256xf32>
    %c38 = arith.constant 38 : index
    %c0_136 = arith.constant 0 : index
    %c0_137 = arith.constant 0 : index
    %364 = vector.load %arg1[%c38, %c0_136, %c0_137] : memref<100x8x1xf32, #tpu.memory_space<vmem>>, vector<1x8x1xf32>
    %365 = vector.shape_cast %364 : vector<1x8x1xf32> to vector<8x1xf32>
    %366 = vector.broadcast %365 : vector<8x1xf32> to vector<8x256xf32>
    %367 = arith.mulf %366, %353 : vector<8x256xf32>
    %368 = arith.addf %343, %367 : vector<8x256xf32>
    %c39 = arith.constant 39 : index
    %c0_138 = arith.constant 0 : index
    %c0_139 = arith.constant 0 : index
    %369 = vector.load %arg1[%c39, %c0_138, %c0_139] : memref<100x8x1xf32, #tpu.memory_space<vmem>>, vector<1x8x1xf32>
    %370 = vector.shape_cast %369 : vector<1x8x1xf32> to vector<8x1xf32>
    %371 = vector.broadcast %370 : vector<8x1xf32> to vector<8x256xf32>
    %372 = arith.mulf %371, %353 : vector<8x256xf32>
    %373 = arith.addf %348, %372 : vector<8x256xf32>
    %c2_i32_140 = arith.constant 2 : i32
    %374 = tpu.dynamic_rotate %0 by %c2_i32_140 dim 1 : vector<8x256xf32>, i32 -> vector<8x256xf32>
    %cst_141 = arith.constant 0.000000e+00 : f32
    %375 = vector.shape_cast %51 : vector<1x256xi1> to vector<1x256xi1>
    %376 = vector.broadcast %375 : vector<1x256xi1> to vector<8x256xi1>
    %377 = vector.broadcast %cst_141 : f32 to vector<8x256xf32>
    %378 = arith.select %376, %374, %377 : vector<8x256xi1>, vector<8x256xf32>
    %c40 = arith.constant 40 : index
    %c0_142 = arith.constant 0 : index
    %c0_143 = arith.constant 0 : index
    %379 = vector.load %arg1[%c40, %c0_142, %c0_143] : memref<100x8x1xf32, #tpu.memory_space<vmem>>, vector<1x8x1xf32>
    %380 = vector.shape_cast %379 : vector<1x8x1xf32> to vector<8x1xf32>
    %381 = vector.broadcast %380 : vector<8x1xf32> to vector<8x256xf32>
    %382 = arith.mulf %381, %378 : vector<8x256xf32>
    %383 = arith.addf %358, %382 : vector<8x256xf32>
    %c41 = arith.constant 41 : index
    %c0_144 = arith.constant 0 : index
    %c0_145 = arith.constant 0 : index
    %384 = vector.load %arg1[%c41, %c0_144, %c0_145] : memref<100x8x1xf32, #tpu.memory_space<vmem>>, vector<1x8x1xf32>
    %385 = vector.shape_cast %384 : vector<1x8x1xf32> to vector<8x1xf32>
    %386 = vector.broadcast %385 : vector<8x1xf32> to vector<8x256xf32>
    %387 = arith.mulf %386, %378 : vector<8x256xf32>
    %388 = arith.addf %363, %387 : vector<8x256xf32>
    %c42 = arith.constant 42 : index
    %c0_146 = arith.constant 0 : index
    %c0_147 = arith.constant 0 : index
    %389 = vector.load %arg1[%c42, %c0_146, %c0_147] : memref<100x8x1xf32, #tpu.memory_space<vmem>>, vector<1x8x1xf32>
    %390 = vector.shape_cast %389 : vector<1x8x1xf32> to vector<8x1xf32>
    %391 = vector.broadcast %390 : vector<8x1xf32> to vector<8x256xf32>
    %392 = arith.mulf %391, %378 : vector<8x256xf32>
    %393 = arith.addf %368, %392 : vector<8x256xf32>
    %c43 = arith.constant 43 : index
    %c0_148 = arith.constant 0 : index
    %c0_149 = arith.constant 0 : index
    %394 = vector.load %arg1[%c43, %c0_148, %c0_149] : memref<100x8x1xf32, #tpu.memory_space<vmem>>, vector<1x8x1xf32>
    %395 = vector.shape_cast %394 : vector<1x8x1xf32> to vector<8x1xf32>
    %396 = vector.broadcast %395 : vector<8x1xf32> to vector<8x256xf32>
    %397 = arith.mulf %396, %378 : vector<8x256xf32>
    %398 = arith.addf %373, %397 : vector<8x256xf32>
    %c1_i32_150 = arith.constant 1 : i32
    %399 = tpu.dynamic_rotate %0 by %c1_i32_150 dim 1 : vector<8x256xf32>, i32 -> vector<8x256xf32>
    %cst_151 = arith.constant 0.000000e+00 : f32
    %400 = vector.shape_cast %53 : vector<1x256xi1> to vector<1x256xi1>
    %401 = vector.broadcast %400 : vector<1x256xi1> to vector<8x256xi1>
    %402 = vector.broadcast %cst_151 : f32 to vector<8x256xf32>
    %403 = arith.select %401, %399, %402 : vector<8x256xi1>, vector<8x256xf32>
    %c44 = arith.constant 44 : index
    %c0_152 = arith.constant 0 : index
    %c0_153 = arith.constant 0 : index
    %404 = vector.load %arg1[%c44, %c0_152, %c0_153] : memref<100x8x1xf32, #tpu.memory_space<vmem>>, vector<1x8x1xf32>
    %405 = vector.shape_cast %404 : vector<1x8x1xf32> to vector<8x1xf32>
    %406 = vector.broadcast %405 : vector<8x1xf32> to vector<8x256xf32>
    %407 = arith.mulf %406, %403 : vector<8x256xf32>
    %408 = arith.addf %383, %407 : vector<8x256xf32>
    %c45 = arith.constant 45 : index
    %c0_154 = arith.constant 0 : index
    %c0_155 = arith.constant 0 : index
    %409 = vector.load %arg1[%c45, %c0_154, %c0_155] : memref<100x8x1xf32, #tpu.memory_space<vmem>>, vector<1x8x1xf32>
    %410 = vector.shape_cast %409 : vector<1x8x1xf32> to vector<8x1xf32>
    %411 = vector.broadcast %410 : vector<8x1xf32> to vector<8x256xf32>
    %412 = arith.mulf %411, %403 : vector<8x256xf32>
    %413 = arith.addf %388, %412 : vector<8x256xf32>
    %c46 = arith.constant 46 : index
    %c0_156 = arith.constant 0 : index
    %c0_157 = arith.constant 0 : index
    %414 = vector.load %arg1[%c46, %c0_156, %c0_157] : memref<100x8x1xf32, #tpu.memory_space<vmem>>, vector<1x8x1xf32>
    %415 = vector.shape_cast %414 : vector<1x8x1xf32> to vector<8x1xf32>
    %416 = vector.broadcast %415 : vector<8x1xf32> to vector<8x256xf32>
    %417 = arith.mulf %416, %403 : vector<8x256xf32>
    %418 = arith.addf %393, %417 : vector<8x256xf32>
    %c47 = arith.constant 47 : index
    %c0_158 = arith.constant 0 : index
    %c0_159 = arith.constant 0 : index
    %419 = vector.load %arg1[%c47, %c0_158, %c0_159] : memref<100x8x1xf32, #tpu.memory_space<vmem>>, vector<1x8x1xf32>
    %420 = vector.shape_cast %419 : vector<1x8x1xf32> to vector<8x1xf32>
    %421 = vector.broadcast %420 : vector<8x1xf32> to vector<8x256xf32>
    %422 = arith.mulf %421, %403 : vector<8x256xf32>
    %423 = arith.addf %398, %422 : vector<8x256xf32>
    %c48 = arith.constant 48 : index
    %c0_160 = arith.constant 0 : index
    %c0_161 = arith.constant 0 : index
    %424 = vector.load %arg1[%c48, %c0_160, %c0_161] : memref<100x8x1xf32, #tpu.memory_space<vmem>>, vector<1x8x1xf32>
    %425 = vector.shape_cast %424 : vector<1x8x1xf32> to vector<8x1xf32>
    %426 = vector.broadcast %425 : vector<8x1xf32> to vector<8x256xf32>
    %427 = arith.mulf %426, %0 : vector<8x256xf32>
    %428 = arith.addf %408, %427 : vector<8x256xf32>
    %c49 = arith.constant 49 : index
    %c0_162 = arith.constant 0 : index
    %c0_163 = arith.constant 0 : index
    %429 = vector.load %arg1[%c49, %c0_162, %c0_163] : memref<100x8x1xf32, #tpu.memory_space<vmem>>, vector<1x8x1xf32>
    %430 = vector.shape_cast %429 : vector<1x8x1xf32> to vector<8x1xf32>
    %431 = vector.broadcast %430 : vector<8x1xf32> to vector<8x256xf32>
    %432 = arith.mulf %431, %0 : vector<8x256xf32>
    %433 = arith.addf %413, %432 : vector<8x256xf32>
    %c50 = arith.constant 50 : index
    %c0_164 = arith.constant 0 : index
    %c0_165 = arith.constant 0 : index
    %434 = vector.load %arg1[%c50, %c0_164, %c0_165] : memref<100x8x1xf32, #tpu.memory_space<vmem>>, vector<1x8x1xf32>
    %435 = vector.shape_cast %434 : vector<1x8x1xf32> to vector<8x1xf32>
    %436 = vector.broadcast %435 : vector<8x1xf32> to vector<8x256xf32>
    %437 = arith.mulf %436, %0 : vector<8x256xf32>
    %438 = arith.addf %418, %437 : vector<8x256xf32>
    %c51 = arith.constant 51 : index
    %c0_166 = arith.constant 0 : index
    %c0_167 = arith.constant 0 : index
    %439 = vector.load %arg1[%c51, %c0_166, %c0_167] : memref<100x8x1xf32, #tpu.memory_space<vmem>>, vector<1x8x1xf32>
    %440 = vector.shape_cast %439 : vector<1x8x1xf32> to vector<8x1xf32>
    %441 = vector.broadcast %440 : vector<8x1xf32> to vector<8x256xf32>
    %442 = arith.mulf %441, %0 : vector<8x256xf32>
    %443 = arith.addf %423, %442 : vector<8x256xf32>
    %c255_i32 = arith.constant 255 : i32
    %444 = tpu.dynamic_rotate %0 by %c255_i32 dim 1 : vector<8x256xf32>, i32 -> vector<8x256xf32>
    %cst_168 = arith.constant 0.000000e+00 : f32
    %445 = vector.shape_cast %55 : vector<1x256xi1> to vector<1x256xi1>
    %446 = vector.broadcast %445 : vector<1x256xi1> to vector<8x256xi1>
    %447 = vector.broadcast %cst_168 : f32 to vector<8x256xf32>
    %448 = arith.select %446, %444, %447 : vector<8x256xi1>, vector<8x256xf32>
    %c52 = arith.constant 52 : index
    %c0_169 = arith.constant 0 : index
    %c0_170 = arith.constant 0 : index
    %449 = vector.load %arg1[%c52, %c0_169, %c0_170] : memref<100x8x1xf32, #tpu.memory_space<vmem>>, vector<1x8x1xf32>
    %450 = vector.shape_cast %449 : vector<1x8x1xf32> to vector<8x1xf32>
    %451 = vector.broadcast %450 : vector<8x1xf32> to vector<8x256xf32>
    %452 = arith.mulf %451, %448 : vector<8x256xf32>
    %453 = arith.addf %428, %452 : vector<8x256xf32>
    %c53 = arith.constant 53 : index
    %c0_171 = arith.constant 0 : index
    %c0_172 = arith.constant 0 : index
    %454 = vector.load %arg1[%c53, %c0_171, %c0_172] : memref<100x8x1xf32, #tpu.memory_space<vmem>>, vector<1x8x1xf32>
    %455 = vector.shape_cast %454 : vector<1x8x1xf32> to vector<8x1xf32>
    %456 = vector.broadcast %455 : vector<8x1xf32> to vector<8x256xf32>
    %457 = arith.mulf %456, %448 : vector<8x256xf32>
    %458 = arith.addf %433, %457 : vector<8x256xf32>
    %c54 = arith.constant 54 : index
    %c0_173 = arith.constant 0 : index
    %c0_174 = arith.constant 0 : index
    %459 = vector.load %arg1[%c54, %c0_173, %c0_174] : memref<100x8x1xf32, #tpu.memory_space<vmem>>, vector<1x8x1xf32>
    %460 = vector.shape_cast %459 : vector<1x8x1xf32> to vector<8x1xf32>
    %461 = vector.broadcast %460 : vector<8x1xf32> to vector<8x256xf32>
    %462 = arith.mulf %461, %448 : vector<8x256xf32>
    %463 = arith.addf %438, %462 : vector<8x256xf32>
    %c55 = arith.constant 55 : index
    %c0_175 = arith.constant 0 : index
    %c0_176 = arith.constant 0 : index
    %464 = vector.load %arg1[%c55, %c0_175, %c0_176] : memref<100x8x1xf32, #tpu.memory_space<vmem>>, vector<1x8x1xf32>
    %465 = vector.shape_cast %464 : vector<1x8x1xf32> to vector<8x1xf32>
    %466 = vector.broadcast %465 : vector<8x1xf32> to vector<8x256xf32>
    %467 = arith.mulf %466, %448 : vector<8x256xf32>
    %468 = arith.addf %443, %467 : vector<8x256xf32>
    %c254_i32 = arith.constant 254 : i32
    %469 = tpu.dynamic_rotate %0 by %c254_i32 dim 1 : vector<8x256xf32>, i32 -> vector<8x256xf32>
    %cst_177 = arith.constant 0.000000e+00 : f32
    %470 = vector.shape_cast %57 : vector<1x256xi1> to vector<1x256xi1>
    %471 = vector.broadcast %470 : vector<1x256xi1> to vector<8x256xi1>
    %472 = vector.broadcast %cst_177 : f32 to vector<8x256xf32>
    %473 = arith.select %471, %469, %472 : vector<8x256xi1>, vector<8x256xf32>
    %c56 = arith.constant 56 : index
    %c0_178 = arith.constant 0 : index
    %c0_179 = arith.constant 0 : index
    %474 = vector.load %arg1[%c56, %c0_178, %c0_179] : memref<100x8x1xf32, #tpu.memory_space<vmem>>, vector<1x8x1xf32>
    %475 = vector.shape_cast %474 : vector<1x8x1xf32> to vector<8x1xf32>
    %476 = vector.broadcast %475 : vector<8x1xf32> to vector<8x256xf32>
    %477 = arith.mulf %476, %473 : vector<8x256xf32>
    %478 = arith.addf %453, %477 : vector<8x256xf32>
    %c57 = arith.constant 57 : index
    %c0_180 = arith.constant 0 : index
    %c0_181 = arith.constant 0 : index
    %479 = vector.load %arg1[%c57, %c0_180, %c0_181] : memref<100x8x1xf32, #tpu.memory_space<vmem>>, vector<1x8x1xf32>
    %480 = vector.shape_cast %479 : vector<1x8x1xf32> to vector<8x1xf32>
    %481 = vector.broadcast %480 : vector<8x1xf32> to vector<8x256xf32>
    %482 = arith.mulf %481, %473 : vector<8x256xf32>
    %483 = arith.addf %458, %482 : vector<8x256xf32>
    %c58 = arith.constant 58 : index
    %c0_182 = arith.constant 0 : index
    %c0_183 = arith.constant 0 : index
    %484 = vector.load %arg1[%c58, %c0_182, %c0_183] : memref<100x8x1xf32, #tpu.memory_space<vmem>>, vector<1x8x1xf32>
    %485 = vector.shape_cast %484 : vector<1x8x1xf32> to vector<8x1xf32>
    %486 = vector.broadcast %485 : vector<8x1xf32> to vector<8x256xf32>
    %487 = arith.mulf %486, %473 : vector<8x256xf32>
    %488 = arith.addf %463, %487 : vector<8x256xf32>
    %c59 = arith.constant 59 : index
    %c0_184 = arith.constant 0 : index
    %c0_185 = arith.constant 0 : index
    %489 = vector.load %arg1[%c59, %c0_184, %c0_185] : memref<100x8x1xf32, #tpu.memory_space<vmem>>, vector<1x8x1xf32>
    %490 = vector.shape_cast %489 : vector<1x8x1xf32> to vector<8x1xf32>
    %491 = vector.broadcast %490 : vector<8x1xf32> to vector<8x256xf32>
    %492 = arith.mulf %491, %473 : vector<8x256xf32>
    %493 = arith.addf %468, %492 : vector<8x256xf32>
    %c242_i32 = arith.constant 242 : i32
    %494 = tpu.dynamic_rotate %0 by %c242_i32 dim 1 : vector<8x256xf32>, i32 -> vector<8x256xf32>
    %cst_186 = arith.constant 0.000000e+00 : f32
    %495 = vector.shape_cast %62 : vector<1x256xi1> to vector<1x256xi1>
    %496 = vector.broadcast %495 : vector<1x256xi1> to vector<8x256xi1>
    %497 = vector.broadcast %cst_186 : f32 to vector<8x256xf32>
    %498 = arith.select %496, %494, %497 : vector<8x256xi1>, vector<8x256xf32>
    %c60 = arith.constant 60 : index
    %c0_187 = arith.constant 0 : index
    %c0_188 = arith.constant 0 : index
    %499 = vector.load %arg1[%c60, %c0_187, %c0_188] : memref<100x8x1xf32, #tpu.memory_space<vmem>>, vector<1x8x1xf32>
    %500 = vector.shape_cast %499 : vector<1x8x1xf32> to vector<8x1xf32>
    %501 = vector.broadcast %500 : vector<8x1xf32> to vector<8x256xf32>
    %502 = arith.mulf %501, %498 : vector<8x256xf32>
    %503 = arith.addf %478, %502 : vector<8x256xf32>
    %c61 = arith.constant 61 : index
    %c0_189 = arith.constant 0 : index
    %c0_190 = arith.constant 0 : index
    %504 = vector.load %arg1[%c61, %c0_189, %c0_190] : memref<100x8x1xf32, #tpu.memory_space<vmem>>, vector<1x8x1xf32>
    %505 = vector.shape_cast %504 : vector<1x8x1xf32> to vector<8x1xf32>
    %506 = vector.broadcast %505 : vector<8x1xf32> to vector<8x256xf32>
    %507 = arith.mulf %506, %498 : vector<8x256xf32>
    %508 = arith.addf %483, %507 : vector<8x256xf32>
    %c62 = arith.constant 62 : index
    %c0_191 = arith.constant 0 : index
    %c0_192 = arith.constant 0 : index
    %509 = vector.load %arg1[%c62, %c0_191, %c0_192] : memref<100x8x1xf32, #tpu.memory_space<vmem>>, vector<1x8x1xf32>
    %510 = vector.shape_cast %509 : vector<1x8x1xf32> to vector<8x1xf32>
    %511 = vector.broadcast %510 : vector<8x1xf32> to vector<8x256xf32>
    %512 = arith.mulf %511, %498 : vector<8x256xf32>
    %513 = arith.addf %488, %512 : vector<8x256xf32>
    %c63 = arith.constant 63 : index
    %c0_193 = arith.constant 0 : index
    %c0_194 = arith.constant 0 : index
    %514 = vector.load %arg1[%c63, %c0_193, %c0_194] : memref<100x8x1xf32, #tpu.memory_space<vmem>>, vector<1x8x1xf32>
    %515 = vector.shape_cast %514 : vector<1x8x1xf32> to vector<8x1xf32>
    %516 = vector.broadcast %515 : vector<8x1xf32> to vector<8x256xf32>
    %517 = arith.mulf %516, %498 : vector<8x256xf32>
    %518 = arith.addf %493, %517 : vector<8x256xf32>
    %c241_i32 = arith.constant 241 : i32
    %519 = tpu.dynamic_rotate %0 by %c241_i32 dim 1 : vector<8x256xf32>, i32 -> vector<8x256xf32>
    %cst_195 = arith.constant 0.000000e+00 : f32
    %520 = vector.shape_cast %67 : vector<1x256xi1> to vector<1x256xi1>
    %521 = vector.broadcast %520 : vector<1x256xi1> to vector<8x256xi1>
    %522 = vector.broadcast %cst_195 : f32 to vector<8x256xf32>
    %523 = arith.select %521, %519, %522 : vector<8x256xi1>, vector<8x256xf32>
    %c64 = arith.constant 64 : index
    %c0_196 = arith.constant 0 : index
    %c0_197 = arith.constant 0 : index
    %524 = vector.load %arg1[%c64, %c0_196, %c0_197] : memref<100x8x1xf32, #tpu.memory_space<vmem>>, vector<1x8x1xf32>
    %525 = vector.shape_cast %524 : vector<1x8x1xf32> to vector<8x1xf32>
    %526 = vector.broadcast %525 : vector<8x1xf32> to vector<8x256xf32>
    %527 = arith.mulf %526, %523 : vector<8x256xf32>
    %528 = arith.addf %503, %527 : vector<8x256xf32>
    %c65 = arith.constant 65 : index
    %c0_198 = arith.constant 0 : index
    %c0_199 = arith.constant 0 : index
    %529 = vector.load %arg1[%c65, %c0_198, %c0_199] : memref<100x8x1xf32, #tpu.memory_space<vmem>>, vector<1x8x1xf32>
    %530 = vector.shape_cast %529 : vector<1x8x1xf32> to vector<8x1xf32>
    %531 = vector.broadcast %530 : vector<8x1xf32> to vector<8x256xf32>
    %532 = arith.mulf %531, %523 : vector<8x256xf32>
    %533 = arith.addf %508, %532 : vector<8x256xf32>
    %c66 = arith.constant 66 : index
    %c0_200 = arith.constant 0 : index
    %c0_201 = arith.constant 0 : index
    %534 = vector.load %arg1[%c66, %c0_200, %c0_201] : memref<100x8x1xf32, #tpu.memory_space<vmem>>, vector<1x8x1xf32>
    %535 = vector.shape_cast %534 : vector<1x8x1xf32> to vector<8x1xf32>
    %536 = vector.broadcast %535 : vector<8x1xf32> to vector<8x256xf32>
    %537 = arith.mulf %536, %523 : vector<8x256xf32>
    %538 = arith.addf %513, %537 : vector<8x256xf32>
    %c67 = arith.constant 67 : index
    %c0_202 = arith.constant 0 : index
    %c0_203 = arith.constant 0 : index
    %539 = vector.load %arg1[%c67, %c0_202, %c0_203] : memref<100x8x1xf32, #tpu.memory_space<vmem>>, vector<1x8x1xf32>
    %540 = vector.shape_cast %539 : vector<1x8x1xf32> to vector<8x1xf32>
    %541 = vector.broadcast %540 : vector<8x1xf32> to vector<8x256xf32>
    %542 = arith.mulf %541, %523 : vector<8x256xf32>
    %543 = arith.addf %518, %542 : vector<8x256xf32>
    %c240_i32 = arith.constant 240 : i32
    %544 = tpu.dynamic_rotate %0 by %c240_i32 dim 1 : vector<8x256xf32>, i32 -> vector<8x256xf32>
    %cst_204 = arith.constant 0.000000e+00 : f32
    %545 = vector.shape_cast %69 : vector<1x256xi1> to vector<1x256xi1>
    %546 = vector.broadcast %545 : vector<1x256xi1> to vector<8x256xi1>
    %547 = vector.broadcast %cst_204 : f32 to vector<8x256xf32>
    %548 = arith.select %546, %544, %547 : vector<8x256xi1>, vector<8x256xf32>
    %c68 = arith.constant 68 : index
    %c0_205 = arith.constant 0 : index
    %c0_206 = arith.constant 0 : index
    %549 = vector.load %arg1[%c68, %c0_205, %c0_206] : memref<100x8x1xf32, #tpu.memory_space<vmem>>, vector<1x8x1xf32>
    %550 = vector.shape_cast %549 : vector<1x8x1xf32> to vector<8x1xf32>
    %551 = vector.broadcast %550 : vector<8x1xf32> to vector<8x256xf32>
    %552 = arith.mulf %551, %548 : vector<8x256xf32>
    %553 = arith.addf %528, %552 : vector<8x256xf32>
    %c69 = arith.constant 69 : index
    %c0_207 = arith.constant 0 : index
    %c0_208 = arith.constant 0 : index
    %554 = vector.load %arg1[%c69, %c0_207, %c0_208] : memref<100x8x1xf32, #tpu.memory_space<vmem>>, vector<1x8x1xf32>
    %555 = vector.shape_cast %554 : vector<1x8x1xf32> to vector<8x1xf32>
    %556 = vector.broadcast %555 : vector<8x1xf32> to vector<8x256xf32>
    %557 = arith.mulf %556, %548 : vector<8x256xf32>
    %558 = arith.addf %533, %557 : vector<8x256xf32>
    %c70 = arith.constant 70 : index
    %c0_209 = arith.constant 0 : index
    %c0_210 = arith.constant 0 : index
    %559 = vector.load %arg1[%c70, %c0_209, %c0_210] : memref<100x8x1xf32, #tpu.memory_space<vmem>>, vector<1x8x1xf32>
    %560 = vector.shape_cast %559 : vector<1x8x1xf32> to vector<8x1xf32>
    %561 = vector.broadcast %560 : vector<8x1xf32> to vector<8x256xf32>
    %562 = arith.mulf %561, %548 : vector<8x256xf32>
    %563 = arith.addf %538, %562 : vector<8x256xf32>
    %c71 = arith.constant 71 : index
    %c0_211 = arith.constant 0 : index
    %c0_212 = arith.constant 0 : index
    %564 = vector.load %arg1[%c71, %c0_211, %c0_212] : memref<100x8x1xf32, #tpu.memory_space<vmem>>, vector<1x8x1xf32>
    %565 = vector.shape_cast %564 : vector<1x8x1xf32> to vector<8x1xf32>
    %566 = vector.broadcast %565 : vector<8x1xf32> to vector<8x256xf32>
    %567 = arith.mulf %566, %548 : vector<8x256xf32>
    %568 = arith.addf %543, %567 : vector<8x256xf32>
    %c239_i32 = arith.constant 239 : i32
    %569 = tpu.dynamic_rotate %0 by %c239_i32 dim 1 : vector<8x256xf32>, i32 -> vector<8x256xf32>
    %cst_213 = arith.constant 0.000000e+00 : f32
    %570 = vector.shape_cast %74 : vector<1x256xi1> to vector<1x256xi1>
    %571 = vector.broadcast %570 : vector<1x256xi1> to vector<8x256xi1>
    %572 = vector.broadcast %cst_213 : f32 to vector<8x256xf32>
    %573 = arith.select %571, %569, %572 : vector<8x256xi1>, vector<8x256xf32>
    %c72 = arith.constant 72 : index
    %c0_214 = arith.constant 0 : index
    %c0_215 = arith.constant 0 : index
    %574 = vector.load %arg1[%c72, %c0_214, %c0_215] : memref<100x8x1xf32, #tpu.memory_space<vmem>>, vector<1x8x1xf32>
    %575 = vector.shape_cast %574 : vector<1x8x1xf32> to vector<8x1xf32>
    %576 = vector.broadcast %575 : vector<8x1xf32> to vector<8x256xf32>
    %577 = arith.mulf %576, %573 : vector<8x256xf32>
    %578 = arith.addf %553, %577 : vector<8x256xf32>
    %c73 = arith.constant 73 : index
    %c0_216 = arith.constant 0 : index
    %c0_217 = arith.constant 0 : index
    %579 = vector.load %arg1[%c73, %c0_216, %c0_217] : memref<100x8x1xf32, #tpu.memory_space<vmem>>, vector<1x8x1xf32>
    %580 = vector.shape_cast %579 : vector<1x8x1xf32> to vector<8x1xf32>
    %581 = vector.broadcast %580 : vector<8x1xf32> to vector<8x256xf32>
    %582 = arith.mulf %581, %573 : vector<8x256xf32>
    %583 = arith.addf %558, %582 : vector<8x256xf32>
    %c74 = arith.constant 74 : index
    %c0_218 = arith.constant 0 : index
    %c0_219 = arith.constant 0 : index
    %584 = vector.load %arg1[%c74, %c0_218, %c0_219] : memref<100x8x1xf32, #tpu.memory_space<vmem>>, vector<1x8x1xf32>
    %585 = vector.shape_cast %584 : vector<1x8x1xf32> to vector<8x1xf32>
    %586 = vector.broadcast %585 : vector<8x1xf32> to vector<8x256xf32>
    %587 = arith.mulf %586, %573 : vector<8x256xf32>
    %588 = arith.addf %563, %587 : vector<8x256xf32>
    %c75 = arith.constant 75 : index
    %c0_220 = arith.constant 0 : index
    %c0_221 = arith.constant 0 : index
    %589 = vector.load %arg1[%c75, %c0_220, %c0_221] : memref<100x8x1xf32, #tpu.memory_space<vmem>>, vector<1x8x1xf32>
    %590 = vector.shape_cast %589 : vector<1x8x1xf32> to vector<8x1xf32>
    %591 = vector.broadcast %590 : vector<8x1xf32> to vector<8x256xf32>
    %592 = arith.mulf %591, %573 : vector<8x256xf32>
    %593 = arith.addf %568, %592 : vector<8x256xf32>
    %c238_i32 = arith.constant 238 : i32
    %594 = tpu.dynamic_rotate %0 by %c238_i32 dim 1 : vector<8x256xf32>, i32 -> vector<8x256xf32>
    %cst_222 = arith.constant 0.000000e+00 : f32
    %595 = vector.shape_cast %79 : vector<1x256xi1> to vector<1x256xi1>
    %596 = vector.broadcast %595 : vector<1x256xi1> to vector<8x256xi1>
    %597 = vector.broadcast %cst_222 : f32 to vector<8x256xf32>
    %598 = arith.select %596, %594, %597 : vector<8x256xi1>, vector<8x256xf32>
    %c76 = arith.constant 76 : index
    %c0_223 = arith.constant 0 : index
    %c0_224 = arith.constant 0 : index
    %599 = vector.load %arg1[%c76, %c0_223, %c0_224] : memref<100x8x1xf32, #tpu.memory_space<vmem>>, vector<1x8x1xf32>
    %600 = vector.shape_cast %599 : vector<1x8x1xf32> to vector<8x1xf32>
    %601 = vector.broadcast %600 : vector<8x1xf32> to vector<8x256xf32>
    %602 = arith.mulf %601, %598 : vector<8x256xf32>
    %603 = arith.addf %578, %602 : vector<8x256xf32>
    %c77 = arith.constant 77 : index
    %c0_225 = arith.constant 0 : index
    %c0_226 = arith.constant 0 : index
    %604 = vector.load %arg1[%c77, %c0_225, %c0_226] : memref<100x8x1xf32, #tpu.memory_space<vmem>>, vector<1x8x1xf32>
    %605 = vector.shape_cast %604 : vector<1x8x1xf32> to vector<8x1xf32>
    %606 = vector.broadcast %605 : vector<8x1xf32> to vector<8x256xf32>
    %607 = arith.mulf %606, %598 : vector<8x256xf32>
    %608 = arith.addf %583, %607 : vector<8x256xf32>
    %c78 = arith.constant 78 : index
    %c0_227 = arith.constant 0 : index
    %c0_228 = arith.constant 0 : index
    %609 = vector.load %arg1[%c78, %c0_227, %c0_228] : memref<100x8x1xf32, #tpu.memory_space<vmem>>, vector<1x8x1xf32>
    %610 = vector.shape_cast %609 : vector<1x8x1xf32> to vector<8x1xf32>
    %611 = vector.broadcast %610 : vector<8x1xf32> to vector<8x256xf32>
    %612 = arith.mulf %611, %598 : vector<8x256xf32>
    %613 = arith.addf %588, %612 : vector<8x256xf32>
    %c79 = arith.constant 79 : index
    %c0_229 = arith.constant 0 : index
    %c0_230 = arith.constant 0 : index
    %614 = vector.load %arg1[%c79, %c0_229, %c0_230] : memref<100x8x1xf32, #tpu.memory_space<vmem>>, vector<1x8x1xf32>
    %615 = vector.shape_cast %614 : vector<1x8x1xf32> to vector<8x1xf32>
    %616 = vector.broadcast %615 : vector<8x1xf32> to vector<8x256xf32>
    %617 = arith.mulf %616, %598 : vector<8x256xf32>
    %618 = arith.addf %593, %617 : vector<8x256xf32>
    %c226_i32 = arith.constant 226 : i32
    %619 = tpu.dynamic_rotate %0 by %c226_i32 dim 1 : vector<8x256xf32>, i32 -> vector<8x256xf32>
    %cst_231 = arith.constant 0.000000e+00 : f32
    %620 = vector.shape_cast %84 : vector<1x256xi1> to vector<1x256xi1>
    %621 = vector.broadcast %620 : vector<1x256xi1> to vector<8x256xi1>
    %622 = vector.broadcast %cst_231 : f32 to vector<8x256xf32>
    %623 = arith.select %621, %619, %622 : vector<8x256xi1>, vector<8x256xf32>
    %c80 = arith.constant 80 : index
    %c0_232 = arith.constant 0 : index
    %c0_233 = arith.constant 0 : index
    %624 = vector.load %arg1[%c80, %c0_232, %c0_233] : memref<100x8x1xf32, #tpu.memory_space<vmem>>, vector<1x8x1xf32>
    %625 = vector.shape_cast %624 : vector<1x8x1xf32> to vector<8x1xf32>
    %626 = vector.broadcast %625 : vector<8x1xf32> to vector<8x256xf32>
    %627 = arith.mulf %626, %623 : vector<8x256xf32>
    %628 = arith.addf %603, %627 : vector<8x256xf32>
    %c81 = arith.constant 81 : index
    %c0_234 = arith.constant 0 : index
    %c0_235 = arith.constant 0 : index
    %629 = vector.load %arg1[%c81, %c0_234, %c0_235] : memref<100x8x1xf32, #tpu.memory_space<vmem>>, vector<1x8x1xf32>
    %630 = vector.shape_cast %629 : vector<1x8x1xf32> to vector<8x1xf32>
    %631 = vector.broadcast %630 : vector<8x1xf32> to vector<8x256xf32>
    %632 = arith.mulf %631, %623 : vector<8x256xf32>
    %633 = arith.addf %608, %632 : vector<8x256xf32>
    %c82 = arith.constant 82 : index
    %c0_236 = arith.constant 0 : index
    %c0_237 = arith.constant 0 : index
    %634 = vector.load %arg1[%c82, %c0_236, %c0_237] : memref<100x8x1xf32, #tpu.memory_space<vmem>>, vector<1x8x1xf32>
    %635 = vector.shape_cast %634 : vector<1x8x1xf32> to vector<8x1xf32>
    %636 = vector.broadcast %635 : vector<8x1xf32> to vector<8x256xf32>
    %637 = arith.mulf %636, %623 : vector<8x256xf32>
    %638 = arith.addf %613, %637 : vector<8x256xf32>
    %c83 = arith.constant 83 : index
    %c0_238 = arith.constant 0 : index
    %c0_239 = arith.constant 0 : index
    %639 = vector.load %arg1[%c83, %c0_238, %c0_239] : memref<100x8x1xf32, #tpu.memory_space<vmem>>, vector<1x8x1xf32>
    %640 = vector.shape_cast %639 : vector<1x8x1xf32> to vector<8x1xf32>
    %641 = vector.broadcast %640 : vector<8x1xf32> to vector<8x256xf32>
    %642 = arith.mulf %641, %623 : vector<8x256xf32>
    %643 = arith.addf %618, %642 : vector<8x256xf32>
    %c225_i32 = arith.constant 225 : i32
    %644 = tpu.dynamic_rotate %0 by %c225_i32 dim 1 : vector<8x256xf32>, i32 -> vector<8x256xf32>
    %cst_240 = arith.constant 0.000000e+00 : f32
    %645 = vector.shape_cast %89 : vector<1x256xi1> to vector<1x256xi1>
    %646 = vector.broadcast %645 : vector<1x256xi1> to vector<8x256xi1>
    %647 = vector.broadcast %cst_240 : f32 to vector<8x256xf32>
    %648 = arith.select %646, %644, %647 : vector<8x256xi1>, vector<8x256xf32>
    %c84 = arith.constant 84 : index
    %c0_241 = arith.constant 0 : index
    %c0_242 = arith.constant 0 : index
    %649 = vector.load %arg1[%c84, %c0_241, %c0_242] : memref<100x8x1xf32, #tpu.memory_space<vmem>>, vector<1x8x1xf32>
    %650 = vector.shape_cast %649 : vector<1x8x1xf32> to vector<8x1xf32>
    %651 = vector.broadcast %650 : vector<8x1xf32> to vector<8x256xf32>
    %652 = arith.mulf %651, %648 : vector<8x256xf32>
    %653 = arith.addf %628, %652 : vector<8x256xf32>
    %c85 = arith.constant 85 : index
    %c0_243 = arith.constant 0 : index
    %c0_244 = arith.constant 0 : index
    %654 = vector.load %arg1[%c85, %c0_243, %c0_244] : memref<100x8x1xf32, #tpu.memory_space<vmem>>, vector<1x8x1xf32>
    %655 = vector.shape_cast %654 : vector<1x8x1xf32> to vector<8x1xf32>
    %656 = vector.broadcast %655 : vector<8x1xf32> to vector<8x256xf32>
    %657 = arith.mulf %656, %648 : vector<8x256xf32>
    %658 = arith.addf %633, %657 : vector<8x256xf32>
    %c86 = arith.constant 86 : index
    %c0_245 = arith.constant 0 : index
    %c0_246 = arith.constant 0 : index
    %659 = vector.load %arg1[%c86, %c0_245, %c0_246] : memref<100x8x1xf32, #tpu.memory_space<vmem>>, vector<1x8x1xf32>
    %660 = vector.shape_cast %659 : vector<1x8x1xf32> to vector<8x1xf32>
    %661 = vector.broadcast %660 : vector<8x1xf32> to vector<8x256xf32>
    %662 = arith.mulf %661, %648 : vector<8x256xf32>
    %663 = arith.addf %638, %662 : vector<8x256xf32>
    %c87 = arith.constant 87 : index
    %c0_247 = arith.constant 0 : index
    %c0_248 = arith.constant 0 : index
    %664 = vector.load %arg1[%c87, %c0_247, %c0_248] : memref<100x8x1xf32, #tpu.memory_space<vmem>>, vector<1x8x1xf32>
    %665 = vector.shape_cast %664 : vector<1x8x1xf32> to vector<8x1xf32>
    %666 = vector.broadcast %665 : vector<8x1xf32> to vector<8x256xf32>
    %667 = arith.mulf %666, %648 : vector<8x256xf32>
    %668 = arith.addf %643, %667 : vector<8x256xf32>
    %c224_i32 = arith.constant 224 : i32
    %669 = tpu.dynamic_rotate %0 by %c224_i32 dim 1 : vector<8x256xf32>, i32 -> vector<8x256xf32>
    %cst_249 = arith.constant 0.000000e+00 : f32
    %670 = vector.shape_cast %91 : vector<1x256xi1> to vector<1x256xi1>
    %671 = vector.broadcast %670 : vector<1x256xi1> to vector<8x256xi1>
    %672 = vector.broadcast %cst_249 : f32 to vector<8x256xf32>
    %673 = arith.select %671, %669, %672 : vector<8x256xi1>, vector<8x256xf32>
    %c88 = arith.constant 88 : index
    %c0_250 = arith.constant 0 : index
    %c0_251 = arith.constant 0 : index
    %674 = vector.load %arg1[%c88, %c0_250, %c0_251] : memref<100x8x1xf32, #tpu.memory_space<vmem>>, vector<1x8x1xf32>
    %675 = vector.shape_cast %674 : vector<1x8x1xf32> to vector<8x1xf32>
    %676 = vector.broadcast %675 : vector<8x1xf32> to vector<8x256xf32>
    %677 = arith.mulf %676, %673 : vector<8x256xf32>
    %678 = arith.addf %653, %677 : vector<8x256xf32>
    %c89 = arith.constant 89 : index
    %c0_252 = arith.constant 0 : index
    %c0_253 = arith.constant 0 : index
    %679 = vector.load %arg1[%c89, %c0_252, %c0_253] : memref<100x8x1xf32, #tpu.memory_space<vmem>>, vector<1x8x1xf32>
    %680 = vector.shape_cast %679 : vector<1x8x1xf32> to vector<8x1xf32>
    %681 = vector.broadcast %680 : vector<8x1xf32> to vector<8x256xf32>
    %682 = arith.mulf %681, %673 : vector<8x256xf32>
    %683 = arith.addf %658, %682 : vector<8x256xf32>
    %c90 = arith.constant 90 : index
    %c0_254 = arith.constant 0 : index
    %c0_255 = arith.constant 0 : index
    %684 = vector.load %arg1[%c90, %c0_254, %c0_255] : memref<100x8x1xf32, #tpu.memory_space<vmem>>, vector<1x8x1xf32>
    %685 = vector.shape_cast %684 : vector<1x8x1xf32> to vector<8x1xf32>
    %686 = vector.broadcast %685 : vector<8x1xf32> to vector<8x256xf32>
    %687 = arith.mulf %686, %673 : vector<8x256xf32>
    %688 = arith.addf %663, %687 : vector<8x256xf32>
    %c91 = arith.constant 91 : index
    %c0_256 = arith.constant 0 : index
    %c0_257 = arith.constant 0 : index
    %689 = vector.load %arg1[%c91, %c0_256, %c0_257] : memref<100x8x1xf32, #tpu.memory_space<vmem>>, vector<1x8x1xf32>
    %690 = vector.shape_cast %689 : vector<1x8x1xf32> to vector<8x1xf32>
    %691 = vector.broadcast %690 : vector<8x1xf32> to vector<8x256xf32>
    %692 = arith.mulf %691, %673 : vector<8x256xf32>
    %693 = arith.addf %668, %692 : vector<8x256xf32>
    %c223_i32 = arith.constant 223 : i32
    %694 = tpu.dynamic_rotate %0 by %c223_i32 dim 1 : vector<8x256xf32>, i32 -> vector<8x256xf32>
    %cst_258 = arith.constant 0.000000e+00 : f32
    %695 = vector.shape_cast %96 : vector<1x256xi1> to vector<1x256xi1>
    %696 = vector.broadcast %695 : vector<1x256xi1> to vector<8x256xi1>
    %697 = vector.broadcast %cst_258 : f32 to vector<8x256xf32>
    %698 = arith.select %696, %694, %697 : vector<8x256xi1>, vector<8x256xf32>
    %c92 = arith.constant 92 : index
    %c0_259 = arith.constant 0 : index
    %c0_260 = arith.constant 0 : index
    %699 = vector.load %arg1[%c92, %c0_259, %c0_260] : memref<100x8x1xf32, #tpu.memory_space<vmem>>, vector<1x8x1xf32>
    %700 = vector.shape_cast %699 : vector<1x8x1xf32> to vector<8x1xf32>
    %701 = vector.broadcast %700 : vector<8x1xf32> to vector<8x256xf32>
    %702 = arith.mulf %701, %698 : vector<8x256xf32>
    %703 = arith.addf %678, %702 : vector<8x256xf32>
    %c93 = arith.constant 93 : index
    %c0_261 = arith.constant 0 : index
    %c0_262 = arith.constant 0 : index
    %704 = vector.load %arg1[%c93, %c0_261, %c0_262] : memref<100x8x1xf32, #tpu.memory_space<vmem>>, vector<1x8x1xf32>
    %705 = vector.shape_cast %704 : vector<1x8x1xf32> to vector<8x1xf32>
    %706 = vector.broadcast %705 : vector<8x1xf32> to vector<8x256xf32>
    %707 = arith.mulf %706, %698 : vector<8x256xf32>
    %708 = arith.addf %683, %707 : vector<8x256xf32>
    %c94 = arith.constant 94 : index
    %c0_263 = arith.constant 0 : index
    %c0_264 = arith.constant 0 : index
    %709 = vector.load %arg1[%c94, %c0_263, %c0_264] : memref<100x8x1xf32, #tpu.memory_space<vmem>>, vector<1x8x1xf32>
    %710 = vector.shape_cast %709 : vector<1x8x1xf32> to vector<8x1xf32>
    %711 = vector.broadcast %710 : vector<8x1xf32> to vector<8x256xf32>
    %712 = arith.mulf %711, %698 : vector<8x256xf32>
    %713 = arith.addf %688, %712 : vector<8x256xf32>
    %c95 = arith.constant 95 : index
    %c0_265 = arith.constant 0 : index
    %c0_266 = arith.constant 0 : index
    %714 = vector.load %arg1[%c95, %c0_265, %c0_266] : memref<100x8x1xf32, #tpu.memory_space<vmem>>, vector<1x8x1xf32>
    %715 = vector.shape_cast %714 : vector<1x8x1xf32> to vector<8x1xf32>
    %716 = vector.broadcast %715 : vector<8x1xf32> to vector<8x256xf32>
    %717 = arith.mulf %716, %698 : vector<8x256xf32>
    %718 = arith.addf %693, %717 : vector<8x256xf32>
    %c222_i32 = arith.constant 222 : i32
    %719 = tpu.dynamic_rotate %0 by %c222_i32 dim 1 : vector<8x256xf32>, i32 -> vector<8x256xf32>
    %cst_267 = arith.constant 0.000000e+00 : f32
    %720 = vector.shape_cast %101 : vector<1x256xi1> to vector<1x256xi1>
    %721 = vector.broadcast %720 : vector<1x256xi1> to vector<8x256xi1>
    %722 = vector.broadcast %cst_267 : f32 to vector<8x256xf32>
    %723 = arith.select %721, %719, %722 : vector<8x256xi1>, vector<8x256xf32>
    %c96 = arith.constant 96 : index
    %c0_268 = arith.constant 0 : index
    %c0_269 = arith.constant 0 : index
    %724 = vector.load %arg1[%c96, %c0_268, %c0_269] : memref<100x8x1xf32, #tpu.memory_space<vmem>>, vector<1x8x1xf32>
    %725 = vector.shape_cast %724 : vector<1x8x1xf32> to vector<8x1xf32>
    %726 = vector.broadcast %725 : vector<8x1xf32> to vector<8x256xf32>
    %727 = arith.mulf %726, %723 : vector<8x256xf32>
    %728 = arith.addf %703, %727 : vector<8x256xf32>
    %c97 = arith.constant 97 : index
    %c0_270 = arith.constant 0 : index
    %c0_271 = arith.constant 0 : index
    %729 = vector.load %arg1[%c97, %c0_270, %c0_271] : memref<100x8x1xf32, #tpu.memory_space<vmem>>, vector<1x8x1xf32>
    %730 = vector.shape_cast %729 : vector<1x8x1xf32> to vector<8x1xf32>
    %731 = vector.broadcast %730 : vector<8x1xf32> to vector<8x256xf32>
    %732 = arith.mulf %731, %723 : vector<8x256xf32>
    %733 = arith.addf %708, %732 : vector<8x256xf32>
    %c98 = arith.constant 98 : index
    %c0_272 = arith.constant 0 : index
    %c0_273 = arith.constant 0 : index
    %734 = vector.load %arg1[%c98, %c0_272, %c0_273] : memref<100x8x1xf32, #tpu.memory_space<vmem>>, vector<1x8x1xf32>
    %735 = vector.shape_cast %734 : vector<1x8x1xf32> to vector<8x1xf32>
    %736 = vector.broadcast %735 : vector<8x1xf32> to vector<8x256xf32>
    %737 = arith.mulf %736, %723 : vector<8x256xf32>
    %738 = arith.addf %713, %737 : vector<8x256xf32>
    %c99 = arith.constant 99 : index
    %c0_274 = arith.constant 0 : index
    %c0_275 = arith.constant 0 : index
    %739 = vector.load %arg1[%c99, %c0_274, %c0_275] : memref<100x8x1xf32, #tpu.memory_space<vmem>>, vector<1x8x1xf32>
    %740 = vector.shape_cast %739 : vector<1x8x1xf32> to vector<8x1xf32>
    %741 = vector.broadcast %740 : vector<8x1xf32> to vector<8x256xf32>
    %742 = arith.mulf %741, %723 : vector<8x256xf32>
    %743 = arith.addf %718, %742 : vector<8x256xf32>
    %c7_i32 = arith.constant 7 : i32
    %744 = tpu.dynamic_rotate %728 by %c7_i32 dim 0 : vector<8x256xf32>, i32 -> vector<8x256xf32>
    %745 = arith.addf %728, %744 : vector<8x256xf32>
    %c6_i32 = arith.constant 6 : i32
    %746 = tpu.dynamic_rotate %728 by %c6_i32 dim 0 : vector<8x256xf32>, i32 -> vector<8x256xf32>
    %747 = arith.addf %745, %746 : vector<8x256xf32>
    %c5_i32 = arith.constant 5 : i32
    %748 = tpu.dynamic_rotate %728 by %c5_i32 dim 0 : vector<8x256xf32>, i32 -> vector<8x256xf32>
    %749 = arith.addf %747, %748 : vector<8x256xf32>
    %c7_i32_276 = arith.constant 7 : i32
    %750 = tpu.dynamic_rotate %733 by %c7_i32_276 dim 0 : vector<8x256xf32>, i32 -> vector<8x256xf32>
    %751 = arith.addf %733, %750 : vector<8x256xf32>
    %c6_i32_277 = arith.constant 6 : i32
    %752 = tpu.dynamic_rotate %733 by %c6_i32_277 dim 0 : vector<8x256xf32>, i32 -> vector<8x256xf32>
    %753 = arith.addf %751, %752 : vector<8x256xf32>
    %c5_i32_278 = arith.constant 5 : i32
    %754 = tpu.dynamic_rotate %733 by %c5_i32_278 dim 0 : vector<8x256xf32>, i32 -> vector<8x256xf32>
    %755 = arith.addf %753, %754 : vector<8x256xf32>
    %c1_i32_279 = arith.constant 1 : i32
    %756 = tpu.dynamic_rotate %755 by %c1_i32_279 dim 0 : vector<8x256xf32>, i32 -> vector<8x256xf32>
    %c1_i32_280 = arith.constant 1 : i32
    %757 = vector.broadcast %c1_i32_280 : i32 to vector<8x1xi32>
    %758 = arith.cmpi eq, %118, %757 : vector<8x1xi32>
    %759 = vector.shape_cast %758 : vector<8x1xi1> to vector<8x1xi1>
    %760 = vector.broadcast %759 : vector<8x1xi1> to vector<8x256xi1>
    %761 = arith.select %760, %756, %749 : vector<8x256xi1>, vector<8x256xf32>
    %c7_i32_281 = arith.constant 7 : i32
    %762 = tpu.dynamic_rotate %738 by %c7_i32_281 dim 0 : vector<8x256xf32>, i32 -> vector<8x256xf32>
    %763 = arith.addf %738, %762 : vector<8x256xf32>
    %c6_i32_282 = arith.constant 6 : i32
    %764 = tpu.dynamic_rotate %738 by %c6_i32_282 dim 0 : vector<8x256xf32>, i32 -> vector<8x256xf32>
    %765 = arith.addf %763, %764 : vector<8x256xf32>
    %c5_i32_283 = arith.constant 5 : i32
    %766 = tpu.dynamic_rotate %738 by %c5_i32_283 dim 0 : vector<8x256xf32>, i32 -> vector<8x256xf32>
    %767 = arith.addf %765, %766 : vector<8x256xf32>
    %c2_i32_284 = arith.constant 2 : i32
    %768 = tpu.dynamic_rotate %767 by %c2_i32_284 dim 0 : vector<8x256xf32>, i32 -> vector<8x256xf32>
    %c2_i32_285 = arith.constant 2 : i32
    %769 = vector.broadcast %c2_i32_285 : i32 to vector<8x1xi32>
    %770 = arith.cmpi eq, %118, %769 : vector<8x1xi32>
    %771 = vector.shape_cast %770 : vector<8x1xi1> to vector<8x1xi1>
    %772 = vector.broadcast %771 : vector<8x1xi1> to vector<8x256xi1>
    %773 = arith.select %772, %768, %761 : vector<8x256xi1>, vector<8x256xf32>
    %c7_i32_286 = arith.constant 7 : i32
    %774 = tpu.dynamic_rotate %743 by %c7_i32_286 dim 0 : vector<8x256xf32>, i32 -> vector<8x256xf32>
    %775 = arith.addf %743, %774 : vector<8x256xf32>
    %c6_i32_287 = arith.constant 6 : i32
    %776 = tpu.dynamic_rotate %743 by %c6_i32_287 dim 0 : vector<8x256xf32>, i32 -> vector<8x256xf32>
    %777 = arith.addf %775, %776 : vector<8x256xf32>
    %c5_i32_288 = arith.constant 5 : i32
    %778 = tpu.dynamic_rotate %743 by %c5_i32_288 dim 0 : vector<8x256xf32>, i32 -> vector<8x256xf32>
    %779 = arith.addf %777, %778 : vector<8x256xf32>
    %c3_i32 = arith.constant 3 : i32
    %780 = tpu.dynamic_rotate %779 by %c3_i32 dim 0 : vector<8x256xf32>, i32 -> vector<8x256xf32>
    %c3_i32_289 = arith.constant 3 : i32
    %781 = vector.broadcast %c3_i32_289 : i32 to vector<8x1xi32>
    %782 = arith.cmpi eq, %118, %781 : vector<8x1xi32>
    %783 = vector.shape_cast %782 : vector<8x1xi1> to vector<8x1xi1>
    %784 = vector.broadcast %783 : vector<8x1xi1> to vector<8x256xi1>
    %785 = arith.select %784, %780, %773 : vector<8x256xi1>, vector<8x256xf32>
    %c0_290 = arith.constant 0 : index
    %c0_291 = arith.constant 0 : index
    %786 = vector.load %arg2[%c0_290, %c0_291] : memref<8x1xf32, #tpu.memory_space<vmem>>, vector<8x1xf32>
    %787 = vector.broadcast %786 : vector<8x1xf32> to vector<8x256xf32>
    %788 = arith.addf %785, %787 : vector<8x256xf32>
    %cst_292 = arith.constant 0.000000e+00 : f32
    %789 = vector.broadcast %cst_292 : f32 to vector<8x256xf32>
    %790 = arith.cmpf ogt, %788, %789 : vector<8x256xf32>
    %791 = vector.broadcast %119 : f32 to vector<8x256xf32>
    %792 = arith.mulf %791, %788 : vector<8x256xf32>
    %793 = arith.select %790, %788, %792 : vector<8x256xi1>, vector<8x256xf32>
    %cst_293 = arith.constant 0.000000e+00 : f32
    %794 = vector.broadcast %cst_293 : f32 to vector<8x256xf32>
    %cst_294 = arith.constant 0.000000e+00 : f32
    %795 = vector.broadcast %cst_294 : f32 to vector<8x256xf32>
    %cst_295 = arith.constant 0.000000e+00 : f32
    %796 = vector.broadcast %cst_295 : f32 to vector<8x256xf32>
    %cst_296 = arith.constant 0.000000e+00 : f32
    %797 = vector.broadcast %cst_296 : f32 to vector<8x256xf32>
    %c17_i32_297 = arith.constant 17 : i32
    %798 = tpu.dynamic_rotate %793 by %c17_i32_297 dim 1 : vector<8x256xf32>, i32 -> vector<8x256xf32>
    %cst_298 = arith.constant 0.000000e+00 : f32
    %799 = vector.shape_cast %37 : vector<1x256xi1> to vector<1x256xi1>
    %800 = vector.broadcast %799 : vector<1x256xi1> to vector<8x256xi1>
    %801 = vector.broadcast %cst_298 : f32 to vector<8x256xf32>
    %802 = arith.select %800, %798, %801 : vector<8x256xi1>, vector<8x256xf32>
    %c0_299 = arith.constant 0 : index
    %c0_300 = arith.constant 0 : index
    %c0_301 = arith.constant 0 : index
    %803 = vector.load %arg3[%c0_299, %c0_300, %c0_301] : memref<36x8x1xf32, #tpu.memory_space<vmem>>, vector<1x8x1xf32>
    %804 = vector.shape_cast %803 : vector<1x8x1xf32> to vector<8x1xf32>
    %805 = vector.broadcast %804 : vector<8x1xf32> to vector<8x256xf32>
    %806 = arith.mulf %805, %802 : vector<8x256xf32>
    %807 = arith.addf %794, %806 : vector<8x256xf32>
    %c1_302 = arith.constant 1 : index
    %c0_303 = arith.constant 0 : index
    %c0_304 = arith.constant 0 : index
    %808 = vector.load %arg3[%c1_302, %c0_303, %c0_304] : memref<36x8x1xf32, #tpu.memory_space<vmem>>, vector<1x8x1xf32>
    %809 = vector.shape_cast %808 : vector<1x8x1xf32> to vector<8x1xf32>
    %810 = vector.broadcast %809 : vector<8x1xf32> to vector<8x256xf32>
    %811 = arith.mulf %810, %802 : vector<8x256xf32>
    %812 = arith.addf %795, %811 : vector<8x256xf32>
    %c2_305 = arith.constant 2 : index
    %c0_306 = arith.constant 0 : index
    %c0_307 = arith.constant 0 : index
    %813 = vector.load %arg3[%c2_305, %c0_306, %c0_307] : memref<36x8x1xf32, #tpu.memory_space<vmem>>, vector<1x8x1xf32>
    %814 = vector.shape_cast %813 : vector<1x8x1xf32> to vector<8x1xf32>
    %815 = vector.broadcast %814 : vector<8x1xf32> to vector<8x256xf32>
    %816 = arith.mulf %815, %802 : vector<8x256xf32>
    %817 = arith.addf %796, %816 : vector<8x256xf32>
    %c3_308 = arith.constant 3 : index
    %c0_309 = arith.constant 0 : index
    %c0_310 = arith.constant 0 : index
    %818 = vector.load %arg3[%c3_308, %c0_309, %c0_310] : memref<36x8x1xf32, #tpu.memory_space<vmem>>, vector<1x8x1xf32>
    %819 = vector.shape_cast %818 : vector<1x8x1xf32> to vector<8x1xf32>
    %820 = vector.broadcast %819 : vector<8x1xf32> to vector<8x256xf32>
    %821 = arith.mulf %820, %802 : vector<8x256xf32>
    %822 = arith.addf %797, %821 : vector<8x256xf32>
    %c16_i32_311 = arith.constant 16 : i32
    %823 = tpu.dynamic_rotate %793 by %c16_i32_311 dim 1 : vector<8x256xf32>, i32 -> vector<8x256xf32>
    %cst_312 = arith.constant 0.000000e+00 : f32
    %824 = vector.shape_cast %39 : vector<1x256xi1> to vector<1x256xi1>
    %825 = vector.broadcast %824 : vector<1x256xi1> to vector<8x256xi1>
    %826 = vector.broadcast %cst_312 : f32 to vector<8x256xf32>
    %827 = arith.select %825, %823, %826 : vector<8x256xi1>, vector<8x256xf32>
    %c4_313 = arith.constant 4 : index
    %c0_314 = arith.constant 0 : index
    %c0_315 = arith.constant 0 : index
    %828 = vector.load %arg3[%c4_313, %c0_314, %c0_315] : memref<36x8x1xf32, #tpu.memory_space<vmem>>, vector<1x8x1xf32>
    %829 = vector.shape_cast %828 : vector<1x8x1xf32> to vector<8x1xf32>
    %830 = vector.broadcast %829 : vector<8x1xf32> to vector<8x256xf32>
    %831 = arith.mulf %830, %827 : vector<8x256xf32>
    %832 = arith.addf %807, %831 : vector<8x256xf32>
    %c5_316 = arith.constant 5 : index
    %c0_317 = arith.constant 0 : index
    %c0_318 = arith.constant 0 : index
    %833 = vector.load %arg3[%c5_316, %c0_317, %c0_318] : memref<36x8x1xf32, #tpu.memory_space<vmem>>, vector<1x8x1xf32>
    %834 = vector.shape_cast %833 : vector<1x8x1xf32> to vector<8x1xf32>
    %835 = vector.broadcast %834 : vector<8x1xf32> to vector<8x256xf32>
    %836 = arith.mulf %835, %827 : vector<8x256xf32>
    %837 = arith.addf %812, %836 : vector<8x256xf32>
    %c6_319 = arith.constant 6 : index
    %c0_320 = arith.constant 0 : index
    %c0_321 = arith.constant 0 : index
    %838 = vector.load %arg3[%c6_319, %c0_320, %c0_321] : memref<36x8x1xf32, #tpu.memory_space<vmem>>, vector<1x8x1xf32>
    %839 = vector.shape_cast %838 : vector<1x8x1xf32> to vector<8x1xf32>
    %840 = vector.broadcast %839 : vector<8x1xf32> to vector<8x256xf32>
    %841 = arith.mulf %840, %827 : vector<8x256xf32>
    %842 = arith.addf %817, %841 : vector<8x256xf32>
    %c7_322 = arith.constant 7 : index
    %c0_323 = arith.constant 0 : index
    %c0_324 = arith.constant 0 : index
    %843 = vector.load %arg3[%c7_322, %c0_323, %c0_324] : memref<36x8x1xf32, #tpu.memory_space<vmem>>, vector<1x8x1xf32>
    %844 = vector.shape_cast %843 : vector<1x8x1xf32> to vector<8x1xf32>
    %845 = vector.broadcast %844 : vector<8x1xf32> to vector<8x256xf32>
    %846 = arith.mulf %845, %827 : vector<8x256xf32>
    %847 = arith.addf %822, %846 : vector<8x256xf32>
    %c15_i32_325 = arith.constant 15 : i32
    %848 = tpu.dynamic_rotate %793 by %c15_i32_325 dim 1 : vector<8x256xf32>, i32 -> vector<8x256xf32>
    %cst_326 = arith.constant 0.000000e+00 : f32
    %849 = vector.shape_cast %44 : vector<1x256xi1> to vector<1x256xi1>
    %850 = vector.broadcast %849 : vector<1x256xi1> to vector<8x256xi1>
    %851 = vector.broadcast %cst_326 : f32 to vector<8x256xf32>
    %852 = arith.select %850, %848, %851 : vector<8x256xi1>, vector<8x256xf32>
    %c8_327 = arith.constant 8 : index
    %c0_328 = arith.constant 0 : index
    %c0_329 = arith.constant 0 : index
    %853 = vector.load %arg3[%c8_327, %c0_328, %c0_329] : memref<36x8x1xf32, #tpu.memory_space<vmem>>, vector<1x8x1xf32>
    %854 = vector.shape_cast %853 : vector<1x8x1xf32> to vector<8x1xf32>
    %855 = vector.broadcast %854 : vector<8x1xf32> to vector<8x256xf32>
    %856 = arith.mulf %855, %852 : vector<8x256xf32>
    %857 = arith.addf %832, %856 : vector<8x256xf32>
    %c9_330 = arith.constant 9 : index
    %c0_331 = arith.constant 0 : index
    %c0_332 = arith.constant 0 : index
    %858 = vector.load %arg3[%c9_330, %c0_331, %c0_332] : memref<36x8x1xf32, #tpu.memory_space<vmem>>, vector<1x8x1xf32>
    %859 = vector.shape_cast %858 : vector<1x8x1xf32> to vector<8x1xf32>
    %860 = vector.broadcast %859 : vector<8x1xf32> to vector<8x256xf32>
    %861 = arith.mulf %860, %852 : vector<8x256xf32>
    %862 = arith.addf %837, %861 : vector<8x256xf32>
    %c10_333 = arith.constant 10 : index
    %c0_334 = arith.constant 0 : index
    %c0_335 = arith.constant 0 : index
    %863 = vector.load %arg3[%c10_333, %c0_334, %c0_335] : memref<36x8x1xf32, #tpu.memory_space<vmem>>, vector<1x8x1xf32>
    %864 = vector.shape_cast %863 : vector<1x8x1xf32> to vector<8x1xf32>
    %865 = vector.broadcast %864 : vector<8x1xf32> to vector<8x256xf32>
    %866 = arith.mulf %865, %852 : vector<8x256xf32>
    %867 = arith.addf %842, %866 : vector<8x256xf32>
    %c11_336 = arith.constant 11 : index
    %c0_337 = arith.constant 0 : index
    %c0_338 = arith.constant 0 : index
    %868 = vector.load %arg3[%c11_336, %c0_337, %c0_338] : memref<36x8x1xf32, #tpu.memory_space<vmem>>, vector<1x8x1xf32>
    %869 = vector.shape_cast %868 : vector<1x8x1xf32> to vector<8x1xf32>
    %870 = vector.broadcast %869 : vector<8x1xf32> to vector<8x256xf32>
    %871 = arith.mulf %870, %852 : vector<8x256xf32>
    %872 = arith.addf %847, %871 : vector<8x256xf32>
    %c1_i32_339 = arith.constant 1 : i32
    %873 = tpu.dynamic_rotate %793 by %c1_i32_339 dim 1 : vector<8x256xf32>, i32 -> vector<8x256xf32>
    %cst_340 = arith.constant 0.000000e+00 : f32
    %874 = vector.shape_cast %53 : vector<1x256xi1> to vector<1x256xi1>
    %875 = vector.broadcast %874 : vector<1x256xi1> to vector<8x256xi1>
    %876 = vector.broadcast %cst_340 : f32 to vector<8x256xf32>
    %877 = arith.select %875, %873, %876 : vector<8x256xi1>, vector<8x256xf32>
    %c12_341 = arith.constant 12 : index
    %c0_342 = arith.constant 0 : index
    %c0_343 = arith.constant 0 : index
    %878 = vector.load %arg3[%c12_341, %c0_342, %c0_343] : memref<36x8x1xf32, #tpu.memory_space<vmem>>, vector<1x8x1xf32>
    %879 = vector.shape_cast %878 : vector<1x8x1xf32> to vector<8x1xf32>
    %880 = vector.broadcast %879 : vector<8x1xf32> to vector<8x256xf32>
    %881 = arith.mulf %880, %877 : vector<8x256xf32>
    %882 = arith.addf %857, %881 : vector<8x256xf32>
    %c13_344 = arith.constant 13 : index
    %c0_345 = arith.constant 0 : index
    %c0_346 = arith.constant 0 : index
    %883 = vector.load %arg3[%c13_344, %c0_345, %c0_346] : memref<36x8x1xf32, #tpu.memory_space<vmem>>, vector<1x8x1xf32>
    %884 = vector.shape_cast %883 : vector<1x8x1xf32> to vector<8x1xf32>
    %885 = vector.broadcast %884 : vector<8x1xf32> to vector<8x256xf32>
    %886 = arith.mulf %885, %877 : vector<8x256xf32>
    %887 = arith.addf %862, %886 : vector<8x256xf32>
    %c14_347 = arith.constant 14 : index
    %c0_348 = arith.constant 0 : index
    %c0_349 = arith.constant 0 : index
    %888 = vector.load %arg3[%c14_347, %c0_348, %c0_349] : memref<36x8x1xf32, #tpu.memory_space<vmem>>, vector<1x8x1xf32>
    %889 = vector.shape_cast %888 : vector<1x8x1xf32> to vector<8x1xf32>
    %890 = vector.broadcast %889 : vector<8x1xf32> to vector<8x256xf32>
    %891 = arith.mulf %890, %877 : vector<8x256xf32>
    %892 = arith.addf %867, %891 : vector<8x256xf32>
    %c15_350 = arith.constant 15 : index
    %c0_351 = arith.constant 0 : index
    %c0_352 = arith.constant 0 : index
    %893 = vector.load %arg3[%c15_350, %c0_351, %c0_352] : memref<36x8x1xf32, #tpu.memory_space<vmem>>, vector<1x8x1xf32>
    %894 = vector.shape_cast %893 : vector<1x8x1xf32> to vector<8x1xf32>
    %895 = vector.broadcast %894 : vector<8x1xf32> to vector<8x256xf32>
    %896 = arith.mulf %895, %877 : vector<8x256xf32>
    %897 = arith.addf %872, %896 : vector<8x256xf32>
    %c16_353 = arith.constant 16 : index
    %c0_354 = arith.constant 0 : index
    %c0_355 = arith.constant 0 : index
    %898 = vector.load %arg3[%c16_353, %c0_354, %c0_355] : memref<36x8x1xf32, #tpu.memory_space<vmem>>, vector<1x8x1xf32>
    %899 = vector.shape_cast %898 : vector<1x8x1xf32> to vector<8x1xf32>
    %900 = vector.broadcast %899 : vector<8x1xf32> to vector<8x256xf32>
    %901 = arith.mulf %900, %793 : vector<8x256xf32>
    %902 = arith.addf %882, %901 : vector<8x256xf32>
    %c17_356 = arith.constant 17 : index
    %c0_357 = arith.constant 0 : index
    %c0_358 = arith.constant 0 : index
    %903 = vector.load %arg3[%c17_356, %c0_357, %c0_358] : memref<36x8x1xf32, #tpu.memory_space<vmem>>, vector<1x8x1xf32>
    %904 = vector.shape_cast %903 : vector<1x8x1xf32> to vector<8x1xf32>
    %905 = vector.broadcast %904 : vector<8x1xf32> to vector<8x256xf32>
    %906 = arith.mulf %905, %793 : vector<8x256xf32>
    %907 = arith.addf %887, %906 : vector<8x256xf32>
    %c18_359 = arith.constant 18 : index
    %c0_360 = arith.constant 0 : index
    %c0_361 = arith.constant 0 : index
    %908 = vector.load %arg3[%c18_359, %c0_360, %c0_361] : memref<36x8x1xf32, #tpu.memory_space<vmem>>, vector<1x8x1xf32>
    %909 = vector.shape_cast %908 : vector<1x8x1xf32> to vector<8x1xf32>
    %910 = vector.broadcast %909 : vector<8x1xf32> to vector<8x256xf32>
    %911 = arith.mulf %910, %793 : vector<8x256xf32>
    %912 = arith.addf %892, %911 : vector<8x256xf32>
    %c19_362 = arith.constant 19 : index
    %c0_363 = arith.constant 0 : index
    %c0_364 = arith.constant 0 : index
    %913 = vector.load %arg3[%c19_362, %c0_363, %c0_364] : memref<36x8x1xf32, #tpu.memory_space<vmem>>, vector<1x8x1xf32>
    %914 = vector.shape_cast %913 : vector<1x8x1xf32> to vector<8x1xf32>
    %915 = vector.broadcast %914 : vector<8x1xf32> to vector<8x256xf32>
    %916 = arith.mulf %915, %793 : vector<8x256xf32>
    %917 = arith.addf %897, %916 : vector<8x256xf32>
    %c255_i32_365 = arith.constant 255 : i32
    %918 = tpu.dynamic_rotate %793 by %c255_i32_365 dim 1 : vector<8x256xf32>, i32 -> vector<8x256xf32>
    %cst_366 = arith.constant 0.000000e+00 : f32
    %919 = vector.shape_cast %55 : vector<1x256xi1> to vector<1x256xi1>
    %920 = vector.broadcast %919 : vector<1x256xi1> to vector<8x256xi1>
    %921 = vector.broadcast %cst_366 : f32 to vector<8x256xf32>
    %922 = arith.select %920, %918, %921 : vector<8x256xi1>, vector<8x256xf32>
    %c20_367 = arith.constant 20 : index
    %c0_368 = arith.constant 0 : index
    %c0_369 = arith.constant 0 : index
    %923 = vector.load %arg3[%c20_367, %c0_368, %c0_369] : memref<36x8x1xf32, #tpu.memory_space<vmem>>, vector<1x8x1xf32>
    %924 = vector.shape_cast %923 : vector<1x8x1xf32> to vector<8x1xf32>
    %925 = vector.broadcast %924 : vector<8x1xf32> to vector<8x256xf32>
    %926 = arith.mulf %925, %922 : vector<8x256xf32>
    %927 = arith.addf %902, %926 : vector<8x256xf32>
    %c21_370 = arith.constant 21 : index
    %c0_371 = arith.constant 0 : index
    %c0_372 = arith.constant 0 : index
    %928 = vector.load %arg3[%c21_370, %c0_371, %c0_372] : memref<36x8x1xf32, #tpu.memory_space<vmem>>, vector<1x8x1xf32>
    %929 = vector.shape_cast %928 : vector<1x8x1xf32> to vector<8x1xf32>
    %930 = vector.broadcast %929 : vector<8x1xf32> to vector<8x256xf32>
    %931 = arith.mulf %930, %922 : vector<8x256xf32>
    %932 = arith.addf %907, %931 : vector<8x256xf32>
    %c22_373 = arith.constant 22 : index
    %c0_374 = arith.constant 0 : index
    %c0_375 = arith.constant 0 : index
    %933 = vector.load %arg3[%c22_373, %c0_374, %c0_375] : memref<36x8x1xf32, #tpu.memory_space<vmem>>, vector<1x8x1xf32>
    %934 = vector.shape_cast %933 : vector<1x8x1xf32> to vector<8x1xf32>
    %935 = vector.broadcast %934 : vector<8x1xf32> to vector<8x256xf32>
    %936 = arith.mulf %935, %922 : vector<8x256xf32>
    %937 = arith.addf %912, %936 : vector<8x256xf32>
    %c23_376 = arith.constant 23 : index
    %c0_377 = arith.constant 0 : index
    %c0_378 = arith.constant 0 : index
    %938 = vector.load %arg3[%c23_376, %c0_377, %c0_378] : memref<36x8x1xf32, #tpu.memory_space<vmem>>, vector<1x8x1xf32>
    %939 = vector.shape_cast %938 : vector<1x8x1xf32> to vector<8x1xf32>
    %940 = vector.broadcast %939 : vector<8x1xf32> to vector<8x256xf32>
    %941 = arith.mulf %940, %922 : vector<8x256xf32>
    %942 = arith.addf %917, %941 : vector<8x256xf32>
    %c241_i32_379 = arith.constant 241 : i32
    %943 = tpu.dynamic_rotate %793 by %c241_i32_379 dim 1 : vector<8x256xf32>, i32 -> vector<8x256xf32>
    %cst_380 = arith.constant 0.000000e+00 : f32
    %944 = vector.shape_cast %67 : vector<1x256xi1> to vector<1x256xi1>
    %945 = vector.broadcast %944 : vector<1x256xi1> to vector<8x256xi1>
    %946 = vector.broadcast %cst_380 : f32 to vector<8x256xf32>
    %947 = arith.select %945, %943, %946 : vector<8x256xi1>, vector<8x256xf32>
    %c24_381 = arith.constant 24 : index
    %c0_382 = arith.constant 0 : index
    %c0_383 = arith.constant 0 : index
    %948 = vector.load %arg3[%c24_381, %c0_382, %c0_383] : memref<36x8x1xf32, #tpu.memory_space<vmem>>, vector<1x8x1xf32>
    %949 = vector.shape_cast %948 : vector<1x8x1xf32> to vector<8x1xf32>
    %950 = vector.broadcast %949 : vector<8x1xf32> to vector<8x256xf32>
    %951 = arith.mulf %950, %947 : vector<8x256xf32>
    %952 = arith.addf %927, %951 : vector<8x256xf32>
    %c25_384 = arith.constant 25 : index
    %c0_385 = arith.constant 0 : index
    %c0_386 = arith.constant 0 : index
    %953 = vector.load %arg3[%c25_384, %c0_385, %c0_386] : memref<36x8x1xf32, #tpu.memory_space<vmem>>, vector<1x8x1xf32>
    %954 = vector.shape_cast %953 : vector<1x8x1xf32> to vector<8x1xf32>
    %955 = vector.broadcast %954 : vector<8x1xf32> to vector<8x256xf32>
    %956 = arith.mulf %955, %947 : vector<8x256xf32>
    %957 = arith.addf %932, %956 : vector<8x256xf32>
    %c26_387 = arith.constant 26 : index
    %c0_388 = arith.constant 0 : index
    %c0_389 = arith.constant 0 : index
    %958 = vector.load %arg3[%c26_387, %c0_388, %c0_389] : memref<36x8x1xf32, #tpu.memory_space<vmem>>, vector<1x8x1xf32>
    %959 = vector.shape_cast %958 : vector<1x8x1xf32> to vector<8x1xf32>
    %960 = vector.broadcast %959 : vector<8x1xf32> to vector<8x256xf32>
    %961 = arith.mulf %960, %947 : vector<8x256xf32>
    %962 = arith.addf %937, %961 : vector<8x256xf32>
    %c27_390 = arith.constant 27 : index
    %c0_391 = arith.constant 0 : index
    %c0_392 = arith.constant 0 : index
    %963 = vector.load %arg3[%c27_390, %c0_391, %c0_392] : memref<36x8x1xf32, #tpu.memory_space<vmem>>, vector<1x8x1xf32>
    %964 = vector.shape_cast %963 : vector<1x8x1xf32> to vector<8x1xf32>
    %965 = vector.broadcast %964 : vector<8x1xf32> to vector<8x256xf32>
    %966 = arith.mulf %965, %947 : vector<8x256xf32>
    %967 = arith.addf %942, %966 : vector<8x256xf32>
    %c240_i32_393 = arith.constant 240 : i32
    %968 = tpu.dynamic_rotate %793 by %c240_i32_393 dim 1 : vector<8x256xf32>, i32 -> vector<8x256xf32>
    %cst_394 = arith.constant 0.000000e+00 : f32
    %969 = vector.shape_cast %69 : vector<1x256xi1> to vector<1x256xi1>
    %970 = vector.broadcast %969 : vector<1x256xi1> to vector<8x256xi1>
    %971 = vector.broadcast %cst_394 : f32 to vector<8x256xf32>
    %972 = arith.select %970, %968, %971 : vector<8x256xi1>, vector<8x256xf32>
    %c28_395 = arith.constant 28 : index
    %c0_396 = arith.constant 0 : index
    %c0_397 = arith.constant 0 : index
    %973 = vector.load %arg3[%c28_395, %c0_396, %c0_397] : memref<36x8x1xf32, #tpu.memory_space<vmem>>, vector<1x8x1xf32>
    %974 = vector.shape_cast %973 : vector<1x8x1xf32> to vector<8x1xf32>
    %975 = vector.broadcast %974 : vector<8x1xf32> to vector<8x256xf32>
    %976 = arith.mulf %975, %972 : vector<8x256xf32>
    %977 = arith.addf %952, %976 : vector<8x256xf32>
    %c29_398 = arith.constant 29 : index
    %c0_399 = arith.constant 0 : index
    %c0_400 = arith.constant 0 : index
    %978 = vector.load %arg3[%c29_398, %c0_399, %c0_400] : memref<36x8x1xf32, #tpu.memory_space<vmem>>, vector<1x8x1xf32>
    %979 = vector.shape_cast %978 : vector<1x8x1xf32> to vector<8x1xf32>
    %980 = vector.broadcast %979 : vector<8x1xf32> to vector<8x256xf32>
    %981 = arith.mulf %980, %972 : vector<8x256xf32>
    %982 = arith.addf %957, %981 : vector<8x256xf32>
    %c30_401 = arith.constant 30 : index
    %c0_402 = arith.constant 0 : index
    %c0_403 = arith.constant 0 : index
    %983 = vector.load %arg3[%c30_401, %c0_402, %c0_403] : memref<36x8x1xf32, #tpu.memory_space<vmem>>, vector<1x8x1xf32>
    %984 = vector.shape_cast %983 : vector<1x8x1xf32> to vector<8x1xf32>
    %985 = vector.broadcast %984 : vector<8x1xf32> to vector<8x256xf32>
    %986 = arith.mulf %985, %972 : vector<8x256xf32>
    %987 = arith.addf %962, %986 : vector<8x256xf32>
    %c31_404 = arith.constant 31 : index
    %c0_405 = arith.constant 0 : index
    %c0_406 = arith.constant 0 : index
    %988 = vector.load %arg3[%c31_404, %c0_405, %c0_406] : memref<36x8x1xf32, #tpu.memory_space<vmem>>, vector<1x8x1xf32>
    %989 = vector.shape_cast %988 : vector<1x8x1xf32> to vector<8x1xf32>
    %990 = vector.broadcast %989 : vector<8x1xf32> to vector<8x256xf32>
    %991 = arith.mulf %990, %972 : vector<8x256xf32>
    %992 = arith.addf %967, %991 : vector<8x256xf32>
    %c239_i32_407 = arith.constant 239 : i32
    %993 = tpu.dynamic_rotate %793 by %c239_i32_407 dim 1 : vector<8x256xf32>, i32 -> vector<8x256xf32>
    %cst_408 = arith.constant 0.000000e+00 : f32
    %994 = vector.shape_cast %74 : vector<1x256xi1> to vector<1x256xi1>
    %995 = vector.broadcast %994 : vector<1x256xi1> to vector<8x256xi1>
    %996 = vector.broadcast %cst_408 : f32 to vector<8x256xf32>
    %997 = arith.select %995, %993, %996 : vector<8x256xi1>, vector<8x256xf32>
    %c32_409 = arith.constant 32 : index
    %c0_410 = arith.constant 0 : index
    %c0_411 = arith.constant 0 : index
    %998 = vector.load %arg3[%c32_409, %c0_410, %c0_411] : memref<36x8x1xf32, #tpu.memory_space<vmem>>, vector<1x8x1xf32>
    %999 = vector.shape_cast %998 : vector<1x8x1xf32> to vector<8x1xf32>
    %1000 = vector.broadcast %999 : vector<8x1xf32> to vector<8x256xf32>
    %1001 = arith.mulf %1000, %997 : vector<8x256xf32>
    %1002 = arith.addf %977, %1001 : vector<8x256xf32>
    %c33_412 = arith.constant 33 : index
    %c0_413 = arith.constant 0 : index
    %c0_414 = arith.constant 0 : index
    %1003 = vector.load %arg3[%c33_412, %c0_413, %c0_414] : memref<36x8x1xf32, #tpu.memory_space<vmem>>, vector<1x8x1xf32>
    %1004 = vector.shape_cast %1003 : vector<1x8x1xf32> to vector<8x1xf32>
    %1005 = vector.broadcast %1004 : vector<8x1xf32> to vector<8x256xf32>
    %1006 = arith.mulf %1005, %997 : vector<8x256xf32>
    %1007 = arith.addf %982, %1006 : vector<8x256xf32>
    %c34_415 = arith.constant 34 : index
    %c0_416 = arith.constant 0 : index
    %c0_417 = arith.constant 0 : index
    %1008 = vector.load %arg3[%c34_415, %c0_416, %c0_417] : memref<36x8x1xf32, #tpu.memory_space<vmem>>, vector<1x8x1xf32>
    %1009 = vector.shape_cast %1008 : vector<1x8x1xf32> to vector<8x1xf32>
    %1010 = vector.broadcast %1009 : vector<8x1xf32> to vector<8x256xf32>
    %1011 = arith.mulf %1010, %997 : vector<8x256xf32>
    %1012 = arith.addf %987, %1011 : vector<8x256xf32>
    %c35_418 = arith.constant 35 : index
    %c0_419 = arith.constant 0 : index
    %c0_420 = arith.constant 0 : index
    %1013 = vector.load %arg3[%c35_418, %c0_419, %c0_420] : memref<36x8x1xf32, #tpu.memory_space<vmem>>, vector<1x8x1xf32>
    %1014 = vector.shape_cast %1013 : vector<1x8x1xf32> to vector<8x1xf32>
    %1015 = vector.broadcast %1014 : vector<8x1xf32> to vector<8x256xf32>
    %1016 = arith.mulf %1015, %997 : vector<8x256xf32>
    %1017 = arith.addf %992, %1016 : vector<8x256xf32>
    %c7_i32_421 = arith.constant 7 : i32
    %1018 = tpu.dynamic_rotate %1002 by %c7_i32_421 dim 0 : vector<8x256xf32>, i32 -> vector<8x256xf32>
    %1019 = arith.addf %1002, %1018 : vector<8x256xf32>
    %c6_i32_422 = arith.constant 6 : i32
    %1020 = tpu.dynamic_rotate %1002 by %c6_i32_422 dim 0 : vector<8x256xf32>, i32 -> vector<8x256xf32>
    %1021 = arith.addf %1019, %1020 : vector<8x256xf32>
    %c5_i32_423 = arith.constant 5 : i32
    %1022 = tpu.dynamic_rotate %1002 by %c5_i32_423 dim 0 : vector<8x256xf32>, i32 -> vector<8x256xf32>
    %1023 = arith.addf %1021, %1022 : vector<8x256xf32>
    %c7_i32_424 = arith.constant 7 : i32
    %1024 = tpu.dynamic_rotate %1007 by %c7_i32_424 dim 0 : vector<8x256xf32>, i32 -> vector<8x256xf32>
    %1025 = arith.addf %1007, %1024 : vector<8x256xf32>
    %c6_i32_425 = arith.constant 6 : i32
    %1026 = tpu.dynamic_rotate %1007 by %c6_i32_425 dim 0 : vector<8x256xf32>, i32 -> vector<8x256xf32>
    %1027 = arith.addf %1025, %1026 : vector<8x256xf32>
    %c5_i32_426 = arith.constant 5 : i32
    %1028 = tpu.dynamic_rotate %1007 by %c5_i32_426 dim 0 : vector<8x256xf32>, i32 -> vector<8x256xf32>
    %1029 = arith.addf %1027, %1028 : vector<8x256xf32>
    %c1_i32_427 = arith.constant 1 : i32
    %1030 = tpu.dynamic_rotate %1029 by %c1_i32_427 dim 0 : vector<8x256xf32>, i32 -> vector<8x256xf32>
    %c1_i32_428 = arith.constant 1 : i32
    %1031 = vector.broadcast %c1_i32_428 : i32 to vector<8x1xi32>
    %1032 = arith.cmpi eq, %118, %1031 : vector<8x1xi32>
    %1033 = vector.shape_cast %1032 : vector<8x1xi1> to vector<8x1xi1>
    %1034 = vector.broadcast %1033 : vector<8x1xi1> to vector<8x256xi1>
    %1035 = arith.select %1034, %1030, %1023 : vector<8x256xi1>, vector<8x256xf32>
    %c7_i32_429 = arith.constant 7 : i32
    %1036 = tpu.dynamic_rotate %1012 by %c7_i32_429 dim 0 : vector<8x256xf32>, i32 -> vector<8x256xf32>
    %1037 = arith.addf %1012, %1036 : vector<8x256xf32>
    %c6_i32_430 = arith.constant 6 : i32
    %1038 = tpu.dynamic_rotate %1012 by %c6_i32_430 dim 0 : vector<8x256xf32>, i32 -> vector<8x256xf32>
    %1039 = arith.addf %1037, %1038 : vector<8x256xf32>
    %c5_i32_431 = arith.constant 5 : i32
    %1040 = tpu.dynamic_rotate %1012 by %c5_i32_431 dim 0 : vector<8x256xf32>, i32 -> vector<8x256xf32>
    %1041 = arith.addf %1039, %1040 : vector<8x256xf32>
    %c2_i32_432 = arith.constant 2 : i32
    %1042 = tpu.dynamic_rotate %1041 by %c2_i32_432 dim 0 : vector<8x256xf32>, i32 -> vector<8x256xf32>
    %c2_i32_433 = arith.constant 2 : i32
    %1043 = vector.broadcast %c2_i32_433 : i32 to vector<8x1xi32>
    %1044 = arith.cmpi eq, %118, %1043 : vector<8x1xi32>
    %1045 = vector.shape_cast %1044 : vector<8x1xi1> to vector<8x1xi1>
    %1046 = vector.broadcast %1045 : vector<8x1xi1> to vector<8x256xi1>
    %1047 = arith.select %1046, %1042, %1035 : vector<8x256xi1>, vector<8x256xf32>
    %c7_i32_434 = arith.constant 7 : i32
    %1048 = tpu.dynamic_rotate %1017 by %c7_i32_434 dim 0 : vector<8x256xf32>, i32 -> vector<8x256xf32>
    %1049 = arith.addf %1017, %1048 : vector<8x256xf32>
    %c6_i32_435 = arith.constant 6 : i32
    %1050 = tpu.dynamic_rotate %1017 by %c6_i32_435 dim 0 : vector<8x256xf32>, i32 -> vector<8x256xf32>
    %1051 = arith.addf %1049, %1050 : vector<8x256xf32>
    %c5_i32_436 = arith.constant 5 : i32
    %1052 = tpu.dynamic_rotate %1017 by %c5_i32_436 dim 0 : vector<8x256xf32>, i32 -> vector<8x256xf32>
    %1053 = arith.addf %1051, %1052 : vector<8x256xf32>
    %c3_i32_437 = arith.constant 3 : i32
    %1054 = tpu.dynamic_rotate %1053 by %c3_i32_437 dim 0 : vector<8x256xf32>, i32 -> vector<8x256xf32>
    %c3_i32_438 = arith.constant 3 : i32
    %1055 = vector.broadcast %c3_i32_438 : i32 to vector<8x1xi32>
    %1056 = arith.cmpi eq, %118, %1055 : vector<8x1xi32>
    %1057 = vector.shape_cast %1056 : vector<8x1xi1> to vector<8x1xi1>
    %1058 = vector.broadcast %1057 : vector<8x1xi1> to vector<8x256xi1>
    %1059 = arith.select %1058, %1054, %1047 : vector<8x256xi1>, vector<8x256xf32>
    %c0_439 = arith.constant 0 : index
    %c0_440 = arith.constant 0 : index
    %1060 = vector.load %arg4[%c0_439, %c0_440] : memref<8x1xf32, #tpu.memory_space<vmem>>, vector<8x1xf32>
    %1061 = vector.broadcast %1060 : vector<8x1xf32> to vector<8x256xf32>
    %1062 = arith.addf %1059, %1061 : vector<8x256xf32>
    %cst_441 = arith.constant 0.000000e+00 : f32
    %1063 = vector.broadcast %cst_441 : f32 to vector<8x256xf32>
    %1064 = arith.cmpf ogt, %1062, %1063 : vector<8x256xf32>
    %1065 = vector.broadcast %119 : f32 to vector<8x256xf32>
    %1066 = arith.mulf %1065, %1062 : vector<8x256xf32>
    %1067 = arith.select %1064, %1062, %1066 : vector<8x256xi1>, vector<8x256xf32>
    %1068 = arith.addf %1067, %0 : vector<8x256xf32>
    %c0_442 = arith.constant 0 : index
    %c0_443 = arith.constant 0 : index
    %1069 = vector.load %arg6[%c0_442, %c0_443] : memref<8x256xf32, #tpu.memory_space<vmem>>, vector<8x256xf32>
    tpu.vector_store %arg6[%c0_442, %c0_443], %1068 {strides = array<i32>} : memref<8x256xf32, #tpu.memory_space<vmem>>, vector<8x256xf32>,
    return
  }
}

</mosaic_0001>

<bundles_post_ra>
// kernel: tile.1
= control target key start
LH: loop header
LB: loop body
LE: loop exit
PB: predicated region body
PF: predicated region fallthrough
CT: control target
= control target key end

     0   :  { %s34_s8 = smov 125   ;;  %s35_s9 = smov 126   ;;  %vm7_vm0 = vcmask 7168   ;;  %s61_s0 = inlined_call_operand.vmem [shape: f32[2,4], index: 0, kind: input, shape index: {}]   ;;  %s62_s1 = inlined_call_operand.vmem [shape: f32[8,1], index: 1, kind: output, shape index: {}]  }
   0x1   :  { %v4_v0 = vld [vmem:[%s61_s0] sm:$0x3]  ;;  %s33_s0 = smov 127  }
   0x2   :  { %5 = vst [vmem:[#allocation0] sm:$0x3] %v4_v0 }
   0x9   :  { %v9_v1 = vld [vmem:[#allocation0] sm:$0x3]  }
   0xa   :  { %v21_v2 = vld [vmem:[#allocation0] sm:$0x3]   ;;  %10 = vrot.lane.b32.xlu0 %v9_v1, %s33_s0 }
   0xb   :  { %22 = vrot.lane.b32.xlu1 %v21_v2, %s34_s8  ;;  %v15_v3 = vld [vmem:[#allocation0] sm:$0x3]  }
   0xc   :  { %v6_v4 = vld [vmem:[#allocation0] sm:$0x3]  }
   0xd   :  { %8 = vst.msk [vmem:[%s62_s1] ss:$4 sm:$0x3] %vm7_vm0, %v6_v4  }
  0x12   :  { %16 = vrot.lane.b32.xlu0 %v15_v3, %s35_s9 }
  0x7c   :  { %v11_v5 = vpop.permute.xlu0 %10  }
  0x7d   :  { %v23_v6 = vpop.permute.xlu1 %22   ;;  %27 = vst.msk [vmem:[%s62_s1 + $0x1] ss:$4 sm:$0x3] %vm7_vm0, %v11_v5  }
  0x7e   :  { %29 = vst.msk [vmem:[%s62_s1 + $0x3] ss:$4 sm:$0x3] %vm7_vm0, %v23_v6  }
  0x84   :  { %v17_v7 = vpop.permute.xlu0 %16  }
  0x85   :  { %28 = vst.msk [vmem:[%s62_s1 + $0x2] ss:$4 sm:$0x3] %vm7_vm0, %v17_v7  }

// kernel: tile.29
= control target key start
LH: loop header
LB: loop body
LE: loop exit
PB: predicated region body
PF: predicated region fallthrough
CT: control target
= control target key end

     0   :  { %s22_s0 = inlined_call_operand.vmem [shape: f32[4], index: 0, kind: input, shape index: {}]   ;;  %s23_s1 = inlined_call_operand.vmem [shape: f32[2,4], index: 1, kind: output, shape index: {}]  }
   0x1   :  { %v4_v0 = vld [vmem:[%s22_s0] ss:$0 sm:$0xff] }
   0x2   :  { %5 = vst [vmem:[%s23_s1] sm:$0x3] %v4_v0 }

// kernel: convxx_forward.1
= control target key start
LH: loop header
LB: loop body
LE: loop exit
PB: predicated region body
PF: predicated region fallthrough
CT: control target
= control target key end

     0   :  { %v2298_v0 = vmov 0   ;;  %s2299_s27 = smov 34   ;;  %s2300_s12 = smov 33   ;;  %s3757_s1 = inlined_call_operand.vmem [shape: f32[100,8,1], index: 1, kind: input, shape index: {}]   ;;  %s3758_s0 = inlined_call_operand.vmem [shape: f32[8,256], index: 0, kind: input, shape index: {}]   ;;  %s3759_s2 = inlined_call_operand.vmem [shape: f32[8,1], index: 2, kind: input, shape index: {}]   ;;  %s3760_s3 = inlined_call_operand.vmem [shape: f32[36,8,1], index: 3, kind: input, shape index: {}]   ;;  %s3761_s5 = inlined_call_operand.<no memory space> [shape: f32[1], index: 5, kind: input, shape index: {}]   ;;  %s3762_s4 = inlined_call_operand.vmem [shape: f32[8,1], index: 4, kind: input, shape index: {}]   ;;  %s3763_s6 = inlined_call_operand.vmem [shape: f32[8,256], index: 6, kind: output, shape index: {}]  }
   0x1   :  { %2292 = vset.pattern.permute.xlu2 %v2298_v0  ;;  %2291 = vset.pattern.permute.xlu1 %v2298_v0  ;;  %v2133_v1 = vld [vmem:[%s3757_s1 + $0x10] sm:$0xff]  ;;  %v109_v2 = vld [vmem:[%s3757_s1] sm:$0xff]  ;;  %v2134_v4 = vld [vmem:[%s3757_s1 + $0x18] sm:$0xff]  ;;  %s2301_s21 = smov 32   ;;  %s2302_s30 = smov 31  }
   0x2   :  { %v2367_v3 = vld [vmem:[%s3758_s0] sm:$0xff]  ;;  %134 = vperm.xlu2 %2292, %v2133_v1   ;;  %112 = vperm.xlu1 %2291, %v109_v2   ;;  %v2132_v5 = vld [vmem:[%s3757_s1 + $0x8] sm:$0xff]  ;;  %v2138_v8 = vld [vmem:[%s3757_s1 + $0x38] sm:$0xff]  ;;  %s2303_s15 = smov 30   ;;  %s2304_s24 = smov 18  }
   0x3   :  { %96 = vrot.lane.b32.xlu0 %v2367_v3, %s2299_s27  ;;  %v2379_v6 = vld [vmem:[%s3758_s0 + $0x8] sm:$0xff]  ;;  %v2135_v7 = vld [vmem:[%s3757_s1 + $0x20] sm:$0xff]  ;;  %v2137_v9 = vld [vmem:[%s3757_s1 + $0x30] sm:$0xff]  ;;  %s2305_s9 = smov 17   ;;  %s2306_s18 = smov 16  }
   0x4   :  { %2293 = vset.pattern.permute.xlu0 %v2298_v0  ;;  %v2136_v10 = vld [vmem:[%s3757_s1 + $0x28] sm:$0xff]  ;;  %v2139_v11 = vld [vmem:[%s3757_s1 + $0x40] sm:$0xff]  ;;  %v2141_v12 = vld [vmem:[%s3757_s1 + $0x50] sm:$0xff]  ;;  %s2308_s13 = smov 14   ;;  %s2309_s23 = smov 2  }
   0x5   :  { %v2140_v13 = vld [vmem:[%s3757_s1 + $0x48] sm:$0xff]  ;;  %v2142_v14 = vld [vmem:[%s3757_s1 + $0x58] sm:$0xff]  ;;  %v2143_v15 = vld [vmem:[%s3757_s1 + $0x60] sm:$0xff]  ;;  %s2310_s10 = smov 1   ;;  %s2311_s26 = smov 127  }
   0x6   :  { %v2145_v16 = vld [vmem:[%s3757_s1 + $0x70] sm:$0xff]  ;;  %v2144_v17 = vld [vmem:[%s3757_s1 + $0x68] sm:$0xff]  ;;  %v2146_v18 = vld [vmem:[%s3757_s1 + $0x78] sm:$0xff]  ;;  %s2312_s14 = smov 126   ;;  %s2317_s28 = smov 110  }
   0x7   :  { %v2147_v19 = vld [vmem:[%s3757_s1 + $0x80] sm:$0xff]  ;;  %v2149_v20 = vld [vmem:[%s3757_s1 + $0x90] sm:$0xff]  ;;  %v2148_v21 = vld [vmem:[%s3757_s1 + $0x88] sm:$0xff]  ;;  %s2318_s20 = smov 98   ;;  %s2319_s8 = smov 97  }
   0x8   :  { %v2150_v22 = vld [vmem:[%s3757_s1 + $0x98] sm:$0xff]  ;;  %v2151_v23 = vld [vmem:[%s3757_s1 + $0xa0] sm:$0xff]  ;;  %v2153_v24 = vld [vmem:[%s3757_s1 + $0xb0] sm:$0xff]  ;;  %s2320_s22 = smov 96   ;;  %s2322_s25 = smov 94  }
   0x9   :  { %v2152_v25 = vld [vmem:[%s3757_s1 + $0xa8] sm:$0xff]  ;;  %v2154_v26 = vld [vmem:[%s3757_s1 + $0xb8] sm:$0xff]  ;;  %v2155_v28 = vld [vmem:[%s3757_s1 + $0xc0] sm:$0xff] }
   0xa   :  { %145 = vperm.xlu2 %2292, %v2134_v4   ;;  %123 = vperm.xlu1 %2291, %v2132_v5   ;;  %v2157_v30 = vld [vmem:[%s3757_s1 + $0xd0] sm:$0xff]  ;;  %v2156_v31 = vld [vmem:[%s3757_s1 + $0xc8] sm:$0xff]  ;;  %v2158_v32 = vld [vmem:[%s3757_s1 + $0xd8] sm:$0xff] }
   0xb   :  { %98 = vrot.lane.b32.xlu0 %v2379_v6, %s2299_s27  ;;  %v2159_v34 = vld [vmem:[%s3757_s1 + $0xe0] sm:$0xff]  ;;  %v2161_v38 = vld [vmem:[%s3757_s1 + $0xf0] sm:$0xff]  ;;  %v2160_v39 = vld [vmem:[%s3757_s1 + $0xe8] sm:$0xff]  ;;  %s2307_s27 = smov 15  }
   0xc   :  { %v2162_v40 = vld [vmem:[%s3757_s1 + $0xf8] sm:$0xff]  ;;  %v2163_v44 = vld [vmem:[%s3757_s1 + $0x100] sm:$0xff]  ;;  %v2165_v48 = vld [vmem:[%s3757_s1 + $0x110] sm:$0xff] }
   0xd   :  { %v2164_v49 = vld [vmem:[%s3757_s1 + $0x108] sm:$0xff]  ;;  %v2166_v50 = vld [vmem:[%s3757_s1 + $0x118] sm:$0xff]  ;;  %v2167_v54 = vld [vmem:[%s3757_s1 + $0x120] sm:$0xff] }
   0xe   :  { %v2169_v58 = vld [vmem:[%s3757_s1 + $0x130] sm:$0xff]  ;;  %v2168_v59 = vld [vmem:[%s3757_s1 + $0x128] sm:$0xff]  ;;  %v2170_v60 = vld [vmem:[%s3757_s1 + $0x138] sm:$0xff] }
   0xf   :  { %v2171_v0 = vld [vmem:[%s3757_s1 + $0x140] sm:$0xff]  ;;  %v2173_v5 = vld [vmem:[%s3757_s1 + $0x150] sm:$0xff] }
  0x12   :  { %169 = vperm.xlu2 %2292, %v2135_v7   ;;  %154 = vrot.lane.b32.xlu1 %v2379_v6, %s2300_s12  ;;  %v2172_v7 = vld [vmem:[%s3757_s1 + $0x148] sm:$0xff] }
  0x13   :  { %152 = vrot.lane.b32.xlu0 %v2367_v3, %s2300_s12  ;;  %s2316_s12 = smov 111  }
  0x1a   :  { %202 = vperm.xlu2 %2292, %v2138_v8   ;;  %191 = vperm.xlu1 %2291, %v2137_v9   ;;  %v2174_v8 = vld [vmem:[%s3757_s1 + $0x158] sm:$0xff] }
  0x1b   :  { %180 = vperm.xlu0 %2293, %v2136_v10  }
  0x22   :  { %211 = vrot.lane.b32.xlu2 %v2379_v6, %s2301_s21  ;;  %209 = vrot.lane.b32.xlu1 %v2367_v3, %s2301_s21 }
  0x23   :  { %226 = vperm.xlu0 %2293, %v2139_v11  }
  0x2a   :  { %248 = vperm.xlu2 %2292, %v2141_v12   ;;  %237 = vperm.xlu1 %2291, %v2140_v13   ;;  %v2175_v12 = vld [vmem:[%s3757_s1 + $0x160] sm:$0xff] }
  0x2b   :  { %259 = vperm.xlu0 %2293, %v2142_v14  }
  0x32   :  { %268 = vrot.lane.b32.xlu2 %v2379_v6, %s2302_s30  ;;  %266 = vrot.lane.b32.xlu1 %v2367_v3, %s2302_s30 }
  0x33   :  { %283 = vperm.xlu0 %2293, %v2143_v15  }
  0x3a   :  { %305 = vperm.xlu2 %2292, %v2145_v16   ;;  %294 = vperm.xlu1 %2291, %v2144_v17   ;;  %v2177_v16 = vld [vmem:[%s3757_s1 + $0x170] sm:$0xff]  ;;  %v2176_v17 = vld [vmem:[%s3757_s1 + $0x168] sm:$0xff] }
  0x3b   :  { %316 = vperm.xlu0 %2293, %v2146_v18   ;;  %v2178_v18 = vld [vmem:[%s3757_s1 + $0x178] sm:$0xff] }
  0x42   :  { %325 = vrot.lane.b32.xlu2 %v2379_v6, %s2303_s15  ;;  %323 = vrot.lane.b32.xlu1 %v2367_v3, %s2303_s15 }
  0x43   :  { %340 = vperm.xlu0 %2293, %v2147_v19  }
  0x4a   :  { %362 = vperm.xlu2 %2292, %v2149_v20   ;;  %351 = vperm.xlu1 %2291, %v2148_v21  }
  0x4b   :  { %373 = vperm.xlu0 %2293, %v2150_v22   ;;  %v2180_v22 = vld [vmem:[%s3757_s1 + $0x188] sm:$0xff] }
  0x52   :  { %382 = vrot.lane.b32.xlu2 %v2379_v6, %s2304_s24  ;;  %380 = vrot.lane.b32.xlu1 %v2367_v3, %s2304_s24  ;;  %s2313_s24 = smov 114  }
  0x53   :  { %397 = vperm.xlu0 %2293, %v2151_v23   ;;  %v2179_v23 = vld [vmem:[%s3757_s1 + $0x180] sm:$0xff] }
  0x5a   :  { %419 = vperm.xlu2 %2292, %v2153_v24   ;;  %408 = vperm.xlu1 %2291, %v2152_v25   ;;  %v2181_v24 = vld [vmem:[%s3757_s1 + $0x190] sm:$0xff] }
  0x5b   :  { %430 = vperm.xlu0 %2293, %v2154_v26  }
  0x5c   :  { %v2452_v27 = vpop.permute.xlu2 %134 }
  0x62   :  { %439 = vrot.lane.b32.xlu2 %v2379_v6, %s2305_s9  ;;  %437 = vrot.lane.b32.xlu1 %v2367_v3, %s2305_s9 }
  0x63   :  { %454 = vperm.xlu0 %2293, %v2155_v28  }
  0x64   :  { %v2461_v29 = vpop.permute.xlu2 %145 }
  0x6a   :  { %476 = vperm.xlu2 %2292, %v2157_v30   ;;  %465 = vperm.xlu1 %2291, %v2156_v31   ;;  %v2182_v30 = vld [vmem:[%s3757_s1 + $0x198] sm:$0xff] }
  0x6b   :  { %487 = vperm.xlu0 %2293, %v2158_v32  }
  0x6c   :  { %v2472_v33 = vpop.permute.xlu2 %169 }
  0x72   :  { %496 = vrot.lane.b32.xlu2 %v2379_v6, %s2306_s18  ;;  %494 = vrot.lane.b32.xlu1 %v2367_v3, %s2306_s18 }
  0x73   :  { %511 = vperm.xlu0 %2293, %v2159_v34  }
  0x74   :  { %v2481_v35 = vpop.permute.xlu2 %202  ;;  %v2483_v36 = vpop.permute.xlu1 %112 }
  0x75   :  { %v2485_v37 = vpop.permute.xlu0 %96 }
  0x7a   :  { %533 = vperm.xlu2 %2292, %v2161_v38   ;;  %522 = vperm.xlu1 %2291, %v2160_v39   ;;  %v3764_v38 = vlaneseq  ;;  %v2184_v39 = vld [vmem:[%s3757_s1 + $0x1a8] sm:$0xff] }
  0x7b   :  { %544 = vperm.xlu0 %2293, %v2162_v40   ;;  %v2183_v40 = vld [vmem:[%s3757_s1 + $0x1a0] sm:$0xff] }
  0x7c   :  { %v2496_v41 = vpop.permute.xlu1 %123  ;;  %v2498_v42 = vpop.permute.xlu2 %211 }
  0x7d   :  { %v2500_v43 = vpop.permute.xlu0 %98 }
  0x82   :  { %553 = vrot.lane.b32.xlu2 %v2379_v6, %s2307_s27  ;;  %551 = vrot.lane.b32.xlu1 %v2367_v3, %s2307_s27 }
  0x83   :  { %568 = vperm.xlu0 %2293, %v2163_v44   ;;  %v2185_v44 = vld [vmem:[%s3757_s1 + $0x1b0] sm:$0xff] }
  0x84   :  { %v2509_v45 = vpop.permute.xlu2 %248  ;;  %v2511_v46 = vpop.permute.xlu1 %154 }
  0x85   :  { %v2513_v47 = vpop.permute.xlu0 %152 }
  0x8a   :  { %590 = vperm.xlu2 %2292, %v2165_v48   ;;  %579 = vperm.xlu1 %2291, %v2164_v49   ;;  %v2648_v48 = vand.u32 127, %v3764_v38  ;;  %v2190_v38 = vld [vmem:[%s3757_s1 + $0x1d8] sm:$0xff] }
  0x8b   :  { %601 = vperm.xlu0 %2293, %v2166_v50  }
  0x8c   :  { %v2524_v51 = vpop.permute.xlu2 %268  ;;  %v2526_v52 = vpop.permute.xlu1 %191  ;;  %vm100_vm4 = vcmp.lt.s32.totalorder %v2648_v48, 34  ;;  %vm156_vm8 = vcmp.lt.s32.totalorder %v2648_v48, 33  ;;  %vm213_vm12 = vcmp.lt.s32.totalorder %v2648_v48, 32  ;;  %vm270_vm15 = vcmp.lt.s32.totalorder %v2648_v48, 31 }
  0x8d   :  { %v2528_v53 = vpop.permute.xlu0 %180 }
  0x92   :  { %610 = vrot.lane.b32.xlu2 %v2379_v6, %s2308_s13  ;;  %608 = vrot.lane.b32.xlu1 %v2367_v3, %s2308_s13  ;;  %s2314_s13 = smov 113  }
  0x93   :  { %625 = vperm.xlu0 %2293, %v2167_v54  }
  0x94   :  { %v2535_v55 = vpop.permute.xlu2 %305  ;;  %v2537_v56 = vpop.permute.xlu1 %209 }
  0x95   :  { %v2539_v57 = vpop.permute.xlu0 %226 }
  0x9a   :  { %647 = vperm.xlu2 %2292, %v2169_v58   ;;  %636 = vperm.xlu1 %2291, %v2168_v59   ;;  %v28_v58 = vadd.s32 128, %v2648_v48  ;;  %v2186_v59 = vld [vmem:[%s3757_s1 + $0x1b8] sm:$0xff] }
  0x9b   :  { %658 = vperm.xlu0 %2293, %v2170_v60   ;;  %v2661_v60 = vshra.s32 %v2648_v48, 4 }
  0x9c   :  { %v2550_v61 = vpop.permute.xlu2 %325  ;;  %v2552_v62 = vpop.permute.xlu1 %237 }
  0x9d   :  { %v2554_v63 = vpop.permute.xlu0 %259  ;;  %vm33_vm0 = vcmp.ge.s32.totalorder %v2661_v60, 2 }
  0xa2   :  { %667 = vrot.lane.b32.xlu2 %v2379_v6, %s2309_s23  ;;  %665 = vrot.lane.b32.xlu1 %v2367_v3, %s2309_s23  ;;  %s2315_s23 = smov 112  }
  0xa3   :  { %682 = vperm.xlu0 %2293, %v2171_v0   ;;  %v2664_v0 = vand.u32 15, %v2648_v48 }
  0xa4   :  { %v2561_v1 = vpop.permute.xlu2 %362  ;;  %v2563_v2 = vpop.permute.xlu1 %266 }
  0xa5   :  { %v2565_v4 = vpop.permute.xlu0 %283  ;;  %vm35_vm1 = vcmp.ge.s32.totalorder %v2664_v0, 2  ;;  %vm3785_vm5 = vcmp.ge.s32.totalorder %v2664_v0, 1  ;;  %vm3788_vm13 = vcmp.lt.s32.totalorder %v2664_v0, 15 }
  0xa6   :  { %vm37_vm6 = vmand %vm33_vm0, %vm35_vm1 }
  0xa7   :  { %vm41_vm10 = vmand %vm33_vm0, %vm3785_vm5 }
  0xaa   :  { %704 = vperm.xlu2 %2292, %v2173_v5   ;;  %693 = vperm.xlu1 %2291, %v2172_v7   ;;  %v2666_v5 = vshra.s32 %v28_v58, 4  ;;  %v2668_v7 = vand.u32 15, %v28_v58 }
  0xab   :  { %715 = vperm.xlu0 %2293, %v2174_v8  }
  0xac   :  { %v2576_v9 = vpop.permute.xlu2 %382  ;;  %v2578_v10 = vpop.permute.xlu1 %294  ;;  %vm34_vm2 = vcmp.ge.s32.totalorder %v2666_v5, 2  ;;  %vm3789_vm3 = vcmp.ge.s32.totalorder %v2668_v7, 2  ;;  %vm3784_vm7 = vcmp.ge.s32.totalorder %v2668_v7, 1  ;;  %vm3787_vm14 = vcmp.lt.s32.totalorder %v2668_v7, 15 }
  0xad   :  { %v2580_v11 = vpop.permute.xlu0 %316  ;;  %vm38_vm9 = vmand %vm34_vm2, %vm3789_vm3 }
  0xae   :  { %vm42_vm11 = vmand %vm34_vm2, %vm3784_vm7 }
  0xb2   :  { %724 = vrot.lane.b32.xlu2 %v2379_v6, %s2310_s10  ;;  %722 = vrot.lane.b32.xlu1 %v2367_v3, %s2310_s10 }
  0xb3   :  { %739 = vperm.xlu0 %2293, %v2175_v12  }
  0xb4   :  { %v2589_v13 = vpop.permute.xlu2 %419  ;;  %v2591_v14 = vpop.permute.xlu1 %323 }
  0xb5   :  { %v2593_v15 = vpop.permute.xlu0 %340 }
  0xba   :  { %761 = vperm.xlu2 %2292, %v2177_v16   ;;  %750 = vperm.xlu1 %2291, %v2176_v17   ;;  %v2188_v17 = vld [vmem:[%s3757_s1 + $0x1c8] sm:$0xff] }
  0xbb   :  { %772 = vperm.xlu0 %2293, %v2178_v18   ;;  %v2187_v18 = vld [vmem:[%s3757_s1 + $0x1c0] sm:$0xff] }
  0xbc   :  { %v2604_v19 = vpop.permute.xlu2 %439  ;;  %v2606_v20 = vpop.permute.xlu1 %351 }
  0xbd   :  { %v2608_v21 = vpop.permute.xlu0 %373 }
  0xc2   :  { %794 = vperm.xlu2 %2292, %v2180_v22   ;;  %783 = vperm.xlu1 %2291, %v2179_v23   ;;  %v2189_v22 = vld [vmem:[%s3757_s1 + $0x1d0] sm:$0xff]  ;;  %v102_v23 = vsel %vm100_vm4, %v2500_v43, %v2485_v37 }
  0xc3   :  { %805 = vperm.xlu0 %2293, %v2181_v24   ;;  %v101_v24 = vsel %vm100_vm4, %v2485_v37, %v2500_v43  ;;  %v107_v37 = vsel %vm37_vm6, %v102_v23, 0.0  ;;  %v215_v23 = vsel %vm213_vm12, %v2498_v42, %v2537_v56  ;;  %vm2766_vm4 = vmand %vm33_vm0, %vm3788_vm13 }
  0xc4   :  { %v2619_v25 = vpop.permute.xlu2 %476  ;;  %v2621_v26 = vpop.permute.xlu1 %380  ;;  %vm2777_vm6 = vmand %vm34_vm2, %vm3787_vm14 }
  0xc5   :  { %v2623_v28 = vpop.permute.xlu0 %397 }
  0xca   :  { %823 = vrot.lane.b32.xlu2 %v2367_v3, %s2311_s26  ;;  %816 = vperm.xlu1 %2291, %v2182_v30   ;;  %v157_v30 = vsel %vm156_vm8, %v2513_v47, %v2511_v46 }
  0xcb   :  { %825 = vrot.lane.b32.xlu0 %v2379_v6, %s2311_s26 }
  0xcc   :  { %v2632_v31 = vpop.permute.xlu2 %496  ;;  %v2634_v32 = vpop.permute.xlu1 %408 }
  0xcd   :  { %v2636_v34 = vpop.permute.xlu0 %430 }
  0xd2   :  { %851 = vperm.xlu2 %2292, %v2184_v39   ;;  %840 = vperm.xlu1 %2291, %v2183_v40   ;;  %v158_v39 = vsel %vm156_vm8, %v2511_v46, %v2513_v47  ;;  %v148_v47 = vmul.f32 %v2461_v29, %v107_v37  ;;  %vm3775_vm8 = vcmp.lt.s32.totalorder %v2664_v0, 14 }
  0xd3   :  { %862 = vperm.xlu0 %2293, %v2185_v44   ;;  %v108_v44 = vsel %vm38_vm9, %v101_v24, 0.0  ;;  %vm327_vm9 = vcmp.lt.s32.totalorder %v2648_v48, 30 }
  0xd4   :  { %v2650_v49 = vpop.permute.xlu2 %533  ;;  %v2652_v50 = vpop.permute.xlu1 %437  ;;  %v116_v46 = vmul.f32 %v2483_v36, %v108_v44 }
  0xd5   :  { %3794 = vst [vmem:[#allocation3_spill] sm:$0xff] %v2650_v49  ;;  %v2654_v54 = vpop.permute.xlu0 %454  ;;  %v220_v49 = vsel %vm33_vm0, %v215_v23, 0.0  ;;  %v127_v23 = vmul.f32 %v2496_v41, %v108_v44 }
  0xd6   :  { %3795 = vst [vmem:[#allocation4_spill] sm:$0xff] %v2654_v54 }
  0xda   :  { %880 = vrot.lane.b32.xlu2 %v2367_v3, %s2312_s14  ;;  %873 = vperm.xlu1 %2291, %v2186_v59   ;;  %v163_v59 = vsel %vm41_vm10, %v158_v39, 0.0  ;;  %vm3792_vm10 = vcmp.lt.s32.totalorder %v2668_v7, 14 }
  0xdb   :  { %882 = vrot.lane.b32.xlu0 %v2379_v6, %s2312_s14  ;;  %v172_v24 = vmul.f32 %v2472_v33, %v163_v59  ;;  %s2321_s14 = smov 95  }
  0xdc   :  { %v2672_v8 = vpop.permute.xlu2 %553  ;;  %v2674_v12 = vpop.permute.xlu1 %465 }
  0xdd   :  { %3796 = vst [vmem:[#allocation5_spill] sm:$0xff] %v2672_v8  ;;  %v2678_v16 = vpop.permute.xlu0 %487 }
  0xde   :  { %3797 = vst [vmem:[#allocation6_spill] sm:$0xff] %v2674_v12  ;;  %v126_v12 = vmul.f32 %v2496_v41, %v107_v37 }
  0xdf   :  { %3798 = vst [vmem:[#allocation7_spill] sm:$0xff] %v2678_v16 }
  0xe2   :  { %908 = vperm.xlu2 %2292, %v2188_v17   ;;  %897 = vperm.xlu1 %2291, %v2187_v18   ;;  %v164_v17 = vsel %vm42_vm11, %v157_v30, 0.0  ;;  %v115_v18 = vmul.f32 %v2483_v36, %v107_v37  ;;  %v137_v30 = vmul.f32 %v2452_v27, %v107_v37  ;;  %v138_v36 = vmul.f32 %v2452_v27, %v108_v44  ;;  %vm2818_vm11 = vmand %vm33_vm0, %vm3775_vm8 }
  0xe3   :  { %919 = vperm.xlu0 %2293, %v2189_v22   ;;  %v149_v22 = vmul.f32 %v2461_v29, %v108_v44  ;;  %v173_v39 = vmul.f32 %v2472_v33, %v164_v17  ;;  %v206_v29 = vmul.f32 %v2481_v35, %v164_v17  ;;  %v194_v33 = vmul.f32 %v2526_v52, %v163_v59  ;;  %vm50_vm0 = vmand %vm34_vm2, %vm3792_vm10 }
  0xe4   :  { %v2719_v43 = vpop.permute.xlu2 %590  ;;  %v2721_v40 = vpop.permute.xlu1 %494  ;;  %v195_v27 = vmul.f32 %v2526_v52, %v164_v17  ;;  %v174_v54 = vadd.f32 %v172_v24, %v115_v18  ;;  %v271_v37 = vsel %vm270_vm15, %v2563_v2, %v2524_v51  ;;  %v272_v44 = vsel %vm270_vm15, %v2524_v51, %v2563_v2  ;;  %v2191_v24 = vld [vmem:[%s3757_s1 + $0x1e0] sm:$0xff] }
  0xe5   :  { %3799 = vst [vmem:[#allocation8_spill] sm:$0xff] %v2719_v43  ;;  %v2724_v58 = vpop.permute.xlu0 %511  ;;  %v214_v43 = vsel %vm213_vm12, %v2537_v56, %v2498_v42  ;;  %v183_v42 = vmul.f32 %v2528_v53, %v163_v59  ;;  %v184_v56 = vmul.f32 %v2528_v53, %v164_v17  ;;  %v175_v8 = vadd.f32 %v173_v39, %v116_v46 }
  0xe6   :  { %3800 = vst [vmem:[#allocation9_spill] sm:$0xff] %v2724_v58  ;;  %v205_v58 = vmul.f32 %v2481_v35, %v163_v59  ;;  %v196_v17 = vadd.f32 %v194_v33, %v137_v30  ;;  %v229_v18 = vmul.f32 %v2539_v57, %v220_v49  ;;  %v208_v46 = vadd.f32 %v206_v29, %v149_v22 }
  0xe7   :  { %v197_v39 = vadd.f32 %v195_v27, %v138_v36  ;;  %v277_v2 = vsel %vm2766_vm4, %v272_v44, 0.0  ;;  %v278_v22 = vsel %vm2777_vm6, %v271_v37, 0.0  ;;  %vm3780_vm12 = vcmp.ge.s32.totalorder %v2661_v60, 1 }
  0xe8   :  { %v207_v59 = vadd.f32 %v205_v58, %v148_v47  ;;  %v2192_v47 = vld [vmem:[%s3757_s1 + $0x1e8] sm:$0xff]  ;;  %v231_v33 = vadd.f32 %v229_v18, %v174_v54  ;;  %vm384_vm15 = vcmp.lt.s32.totalorder %v2648_v48, 18  ;;  %vm3779_vm4 = vcmp.ge.s32.totalorder %v2666_v5, 1 }
  0xe9   :  { %vm2864_vm6 = vmand %vm3779_vm4, %vm3789_vm3 }
  0xea   :  { %937 = vrot.lane.b32.xlu2 %v2367_v3, %s2313_s24  ;;  %930 = vperm.xlu1 %2291, %v2190_v38   ;;  %v221_v38 = vsel %vm34_vm2, %v214_v43, 0.0  ;;  %v251_v43 = vmul.f32 %v2509_v45, %v220_v49  ;;  %vm53_vm2 = vmand %vm3780_vm12, %vm35_vm1 }
  0xeb   :  { %939 = vrot.lane.b32.xlu0 %v2379_v6, %s2313_s24  ;;  %v252_v58 = vmul.f32 %v2509_v45, %v221_v38  ;;  %v2193_v45 = vld [vmem:[%s3757_s1 + $0x1f0] sm:$0xff]  ;;  %v230_v51 = vmul.f32 %v2539_v57, %v221_v38  ;;  %v241_v36 = vmul.f32 %v2552_v62, %v221_v38  ;;  %v262_v57 = vmul.f32 %v2554_v63, %v220_v49 }
  0xec   :  { %v2756_v16 = vpop.permute.xlu2 %610  ;;  %v2758_v35 = vpop.permute.xlu1 %522  ;;  %v253_v30 = vadd.f32 %v251_v43, %v196_v17  ;;  %v263_v27 = vmul.f32 %v2554_v63, %v221_v38  ;;  %v287_v38 = vmul.f32 %v2565_v4, %v278_v22  ;;  %v297_v17 = vmul.f32 %v2578_v10, %v277_v2 }
  0xed   :  { %3801 = vst [vmem:[#allocation10_spill] sm:$0xff] %v2758_v35  ;;  %v2770_v53 = vpop.permute.xlu0 %544  ;;  %v186_v35 = vadd.f32 %v184_v56, %v127_v23  ;;  %v254_v29 = vadd.f32 %v252_v58, %v197_v39  ;;  %v309_v56 = vmul.f32 %v2535_v55, %v278_v22  ;;  %v328_v23 = vsel %vm327_vm9, %v2591_v14, %v2550_v61 }
  0xee   :  { %3804 = vst [vmem:[#allocation11_spill] sm:$0xff] %v2770_v53  ;;  %v185_v53 = vadd.f32 %v183_v42, %v126_v12  ;;  %v240_v12 = vmul.f32 %v2552_v62, %v220_v49  ;;  %v308_v42 = vmul.f32 %v2535_v55, %v277_v2  ;;  %v329_v49 = vsel %vm327_vm9, %v2550_v61, %v2591_v14  ;;  %v2194_v61 = vld [vmem:[%s3757_s1 + $0x1f8] sm:$0xff] }
  0xef   :  { %v286_v55 = vmul.f32 %v2565_v4, %v277_v2  ;;  %v232_v43 = vadd.f32 %v230_v51, %v175_v8  ;;  %v243_v37 = vadd.f32 %v241_v36, %v186_v35  ;;  %v264_v4 = vadd.f32 %v262_v57, %v207_v59 }
  0xf0   :  { %v242_v41 = vadd.f32 %v240_v12, %v185_v53  ;;  %v265_v44 = vadd.f32 %v263_v27, %v208_v46  ;;  %v334_v58 = vsel %vm2818_vm11, %v329_v49, 0.0  ;;  %v310_v14 = vadd.f32 %v308_v42, %v253_v30  ;;  %vm2900_vm11 = vmand %vm3780_vm12, %vm3785_vm5 }
  0xf1   :  { %v311_v18 = vadd.f32 %v309_v56, %v254_v29  ;;  %v386_v8 = vsel %vm384_vm15, %v2576_v9, %v2621_v26  ;;  %v288_v35 = vadd.f32 %v286_v55, %v231_v33  ;;  %v289_v53 = vadd.f32 %v287_v38, %v232_v43  ;;  %v2195_v43 = vld [vmem:[%s3757_s1 + $0x200] sm:$0xff] }
  0xf2   :  { %965 = vperm.xlu2 %2292, %v2192_v47   ;;  %954 = vperm.xlu1 %2291, %v2191_v24   ;;  %v335_v47 = vsel %vm50_vm0, %v328_v23, 0.0  ;;  %v298_v59 = vmul.f32 %v2578_v10, %v278_v22  ;;  %v385_v24 = vsel %vm384_vm15, %v2621_v26, %v2576_v9  ;;  %v319_v39 = vmul.f32 %v2580_v11, %v277_v2  ;;  %vm2910_vm0 = vmand %vm3779_vm4, %vm3784_vm7  ;;  %v2196_v23 = vld [vmem:[%s3757_s1 + $0x208] sm:$0xff] }
  0xf3   :  { %976 = vperm.xlu0 %2293, %v2193_v45   ;;  %v320_v45 = vmul.f32 %v2580_v11, %v278_v22  ;;  %v365_v51 = vmul.f32 %v2561_v1, %v334_v58  ;;  %v299_v10 = vadd.f32 %v297_v17, %v242_v41  ;;  %v366_v30 = vmul.f32 %v2561_v1, %v335_v47  ;;  %v2197_v17 = vld [vmem:[%s3757_s1 + $0x210] sm:$0xff] }
  0xf4   :  { %v2827_v63 = vpop.permute.xlu2 %647  ;;  %v2829_v54 = vpop.permute.xlu1 %551  ;;  %v391_v12 = vsel %vm53_vm2, %v386_v8, 0.0  ;;  %vm3774_vm9 = vcmp.lt.s32.totalorder %v2648_v48, 17  ;;  %v343_v9 = vmul.f32 %v2593_v15, %v334_v58  ;;  %v344_v11 = vmul.f32 %v2593_v15, %v335_v47  ;;  %vm2941_vm2 = vmand %vm3780_vm12, %vm3775_vm8 }
  0xf5   :  { %v2842_v52 = vpop.permute.xlu0 %568  ;;  %v354_v26 = vmul.f32 %v2606_v20, %v334_v58  ;;  %v392_v2 = vsel %vm2864_vm6, %v385_v24, 0.0  ;;  %v300_v1 = vadd.f32 %v298_v59, %v243_v37  ;;  %v355_v29 = vmul.f32 %v2606_v20, %v335_v47 }
  0xf6   :  { %v376_v33 = vmul.f32 %v2608_v21, %v334_v58  ;;  %v377_v57 = vmul.f32 %v2608_v21, %v335_v47  ;;  %v321_v42 = vadd.f32 %v319_v39, %v264_v4  ;;  %v322_v15 = vadd.f32 %v320_v45, %v265_v44 }
  0xf7   :  { %v367_v56 = vadd.f32 %v365_v51, %v310_v14  ;;  %v422_v62 = vmul.f32 %v2589_v13, %v391_v12  ;;  %v423_v20 = vmul.f32 %v2589_v13, %v392_v2  ;;  %v400_v55 = vmul.f32 %v2623_v28, %v391_v12 }
  0xf8   :  { %v442_v38 = vsel %vm3774_vm9, %v2652_v50, %v2604_v19  ;;  %v443_v13 = vsel %vm3774_vm9, %v2604_v19, %v2652_v50  ;;  %v368_v41 = vadd.f32 %v366_v30, %v311_v18  ;;  %v345_v37 = vadd.f32 %v343_v9, %v288_v35  ;;  %vm60_vm9 = vmand %vm3779_vm4, %vm3792_vm10 }
  0xf9   :  { %v346_v4 = vadd.f32 %v344_v11, %v289_v53  ;;  %v356_v44 = vadd.f32 %v354_v26, %v299_v10  ;;  %v357_v58 = vadd.f32 %v355_v29, %v300_v1  ;;  %v379_v14 = vadd.f32 %v377_v57, %v322_v15  ;;  %v2198_v29 = vld [vmem:[%s3757_s1 + $0x218] sm:$0xff] }
  0xfa   :  { %994 = vrot.lane.b32.xlu2 %v2367_v3, %s2314_s13  ;;  %987 = vperm.xlu1 %2291, %v2194_v61   ;;  %v378_v61 = vadd.f32 %v376_v33, %v321_v42  ;;  %vm3781_vm15 = vcmp.lt.s32.totalorder %v2648_v48, 16  ;;  %v401_v19 = vmul.f32 %v2623_v28, %v392_v2  ;;  %v448_v50 = vsel %vm2900_vm11, %v443_v13, 0.0  ;;  %v3822_v13 = vld [vmem:[#allocation4_spill] sm:$0xff] }
  0xfb   :  { %996 = vrot.lane.b32.xlu0 %v2379_v6, %s2314_s13  ;;  %v449_v18 = vsel %vm2910_vm0, %v442_v38, 0.0  ;;  %vm612_vm6 = vcmp.lt.s32.totalorder %v2648_v48, 14  ;;  %v424_v8 = vadd.f32 %v422_v62, %v367_v56  ;;  %v425_v28 = vadd.f32 %v423_v20, %v368_v41  ;;  %v3821_v62 = vld [vmem:[#allocation5_spill] sm:$0xff] }
  0xfc   :  { %v2886_v22 = vpop.permute.xlu2 %667  ;;  %v2888_v36 = vpop.permute.xlu1 %579  ;;  %v402_v35 = vadd.f32 %v400_v55, %v345_v37  ;;  %v411_v53 = vmul.f32 %v2634_v32, %v391_v12  ;;  %v412_v59 = vmul.f32 %v2634_v32, %v392_v2  ;;  %v433_v46 = vmul.f32 %v2636_v34, %v391_v12 }
  0xfd   :  { %v2893_v27 = vpop.permute.xlu0 %601  ;;  %v434_v24 = vmul.f32 %v2636_v34, %v392_v2  ;;  %vm3778_vm8 = vcmp.lt.s32.totalorder %v2648_v48, 15  ;;  %v479_v51 = vmul.f32 %v2619_v25, %v448_v50  ;;  %v480_v10 = vmul.f32 %v2619_v25, %v449_v18 }
  0xfe   :  { %v499_v34 = vsel %vm3781_vm15, %v2721_v40, %v2632_v31  ;;  %v500_v9 = vsel %vm3781_vm15, %v2632_v31, %v2721_v40  ;;  %v403_v33 = vadd.f32 %v401_v19, %v346_v4  ;;  %v413_v31 = vadd.f32 %v411_v53, %v356_v44  ;;  %v3823_v4 = vld [vmem:[#allocation6_spill] sm:$0xff] }
  0xff   :  { %v414_v40 = vadd.f32 %v412_v59, %v357_v58  ;;  %v435_v57 = vadd.f32 %v433_v46, %v378_v61  ;;  %v505_v15 = vsel %vm3780_vm12, %v500_v9, 0.0  ;;  %v556_v20 = vsel %vm3778_vm8, %v2829_v54, %v3821_v62  ;;  %v3824_v58 = vld [vmem:[#allocation7_spill] sm:$0xff]  ;;  %v3826_v59 = vld [vmem:[#allocation9_spill] sm:$0xff] }
 0x100   :  { %v557_v55 = vsel %vm3778_vm8, %v3821_v62, %v2829_v54  ;;  %v481_v38 = vadd.f32 %v479_v51, %v424_v8  ;;  %v506_v41 = vsel %vm3779_vm4, %v499_v34, 0.0  ;;  %v482_v37 = vadd.f32 %v480_v10, %v425_v28  ;;  %v2200_v62 = vld [vmem:[%s3757_s1 + $0x228] sm:$0xff] }
 0x101   :  { %v468_v44 = vmul.f32 %v3823_v4, %v448_v50  ;;  %v490_v54 = vmul.f32 %v3824_v58, %v448_v50  ;;  %v491_v61 = vmul.f32 %v3824_v58, %v449_v18  ;;  %v514_v46 = vmul.f32 %v3826_v59, %v505_v15 }
 0x102   :  { %1022 = vperm.xlu2 %2292, %v2196_v23   ;;  %1011 = vperm.xlu1 %2291, %v2195_v43   ;;  %v457_v23 = vmul.f32 %v3822_v13, %v448_v50  ;;  %v458_v43 = vmul.f32 %v3822_v13, %v449_v18  ;;  %v515_v50 = vmul.f32 %v3826_v59, %v506_v41  ;;  %vm3830_vm8 = vcmp.lt.s32.totalorder %v2664_v0, 14 }
 0x103   :  { %1033 = vperm.xlu0 %2293, %v2197_v17   ;;  %v469_v17 = vmul.f32 %v3823_v4, %v449_v18  ;;  %v470_v34 = vadd.f32 %v468_v44, %v413_v31  ;;  %v3828_v44 = vld [vmem:[#allocation10_spill] sm:$0xff] }
 0x104   :  { %v2955_v39 = vpop.permute.xlu2 %704  ;;  %v609_v45 = vpop.permute.xlu1 %608  ;;  %v459_v51 = vadd.f32 %v457_v23, %v402_v35  ;;  %v2199_v35 = vld [vmem:[%s3757_s1 + $0x220] sm:$0xff]  ;;  %v525_v58 = vmul.f32 %v3828_v44, %v505_v15 }
 0x105   :  { %v613_v30 = vsel %vm612_vm6, %v609_v45, %v2756_v16  ;;  %v614_v32 = vsel %vm612_vm6, %v2756_v16, %v609_v45  ;;  %v626_v12 = vpop.permute.xlu0 %625  ;;  %vm669_vm6 = vcmp.lt.s32.totalorder %v2648_v48, 2 }
 0x106   :  { %v619_v25 = vsel %vm2941_vm2, %v614_v32, 0.0  ;;  %v620_v11 = vsel %vm60_vm9, %v613_v30, 0.0  ;;  %vm2992_vm9 = vmand %vm3780_vm12, %vm3788_vm13  ;;  %v516_v23 = vadd.f32 %v514_v46, %v459_v51  ;;  %vm941_vm12 = vcmp.lt.s32.totalorder %v2648_v48, 114 }
 0x107   :  { %v2976_v26 = vmul.f32 %v2827_v63, %v619_v25  ;;  %v2979_v16 = vmul.f32 %v2827_v63, %v620_v11  ;;  %v2981_v2 = vmul.f32 %v626_v12, %v619_v25  ;;  %v2983_v1 = vmul.f32 %v626_v12, %v620_v11  ;;  %vm3002_vm2 = vmand %vm3779_vm4, %vm3787_vm14 }
 0x108   :  { %v436_v63 = vadd.f32 %v434_v24, %v379_v14  ;;  %v3825_v14 = vld [vmem:[#allocation3_spill] sm:$0xff]  ;;  %v562_v47 = vsel %vm2992_vm9, %v557_v55, 0.0  ;;  %v563_v8 = vsel %vm3002_vm2, %v556_v20, 0.0  ;;  %v460_v12 = vadd.f32 %v458_v43, %v403_v33  ;;  %v2201_v33 = vld [vmem:[%s3757_s1 + $0x230] sm:$0xff] }
 0x109   :  { %v536_v19 = vmul.f32 %v3825_v14, %v505_v15  ;;  %v537_v10 = vmul.f32 %v3825_v14, %v506_v41  ;;  %v571_v9 = vmul.f32 %v2842_v52, %v562_v47  ;;  %v471_v20 = vadd.f32 %v469_v17, %v414_v40  ;;  %v3829_v40 = vld [vmem:[#allocation11_spill] sm:$0xff] }
 0x10a   :  { %1051 = vrot.lane.b32.xlu2 %v2367_v3, %s2315_s23  ;;  %1044 = vperm.xlu1 %2291, %v2198_v29   ;;  %v572_v29 = vmul.f32 %v2842_v52, %v563_v8  ;;  %v492_v55 = vadd.f32 %v490_v54, %v435_v57  ;;  %v493_v31 = vadd.f32 %v491_v61, %v436_v63 }
 0x10b   :  { %1053 = vrot.lane.b32.xlu0 %v2379_v6, %s2315_s23  ;;  %v538_v52 = vadd.f32 %v536_v19, %v481_v38  ;;  %v517_v43 = vadd.f32 %v515_v50, %v460_v12  ;;  %v539_v4 = vadd.f32 %v537_v10, %v482_v37  ;;  %v526_v14 = vmul.f32 %v3828_v44, %v506_v41 }
 0x10c   :  { %v3031_v28 = vpop.permute.xlu2 %724  ;;  %v637_v53 = vpop.permute.xlu1 %636  ;;  %v547_v57 = vmul.f32 %v3829_v40, %v505_v15  ;;  %v548_v17 = vmul.f32 %v3829_v40, %v506_v41  ;;  %v573_v54 = vadd.f32 %v571_v9, %v516_v23  ;;  %v582_v61 = vmul.f32 %v2888_v36, %v562_v47 }
 0x10d   :  { %v3035_v24 = vmul.f32 %v637_v53, %v619_v25  ;;  %v3037_v45 = vmul.f32 %v637_v53, %v620_v11  ;;  %v659_v18 = vpop.permute.xlu0 %658  ;;  %v574_v53 = vadd.f32 %v572_v29, %v517_v43  ;;  %v583_v37 = vmul.f32 %v2888_v36, %v563_v8 }
 0x10e   :  { %v3040_v30 = vmul.f32 %v659_v18, %v619_v25  ;;  %v3042_v32 = vmul.f32 %v659_v18, %v620_v11  ;;  %v3827_v25 = vld [vmem:[#allocation8_spill] sm:$0xff]  ;;  %v630_v46 = vadd.f32 %v2981_v2, %v573_v54  ;;  %v550_v23 = vadd.f32 %v548_v17, %v493_v31 }
 0x10f   :  { %v593_v13 = vmul.f32 %v3827_v25, %v562_v47  ;;  %v594_v11 = vmul.f32 %v3827_v25, %v563_v8  ;;  %v631_v50 = vadd.f32 %v2983_v1, %v574_v53  ;;  %v604_v25 = vmul.f32 %v2893_v27, %v562_v47 }
 0x111   :  { %v595_v63 = vadd.f32 %v593_v13, %v538_v52  ;;  %v596_v38 = vadd.f32 %v594_v11, %v539_v4  ;;  %v605_v13 = vmul.f32 %v2893_v27, %v563_v8  ;;  %v549_v52 = vadd.f32 %v547_v57, %v492_v55 }
 0x112   :  { %1079 = vperm.xlu2 %2292, %v2200_v62   ;;  %1068 = vperm.xlu1 %2291, %v2199_v35   ;;  %v527_v62 = vadd.f32 %v525_v58, %v470_v34  ;;  %v528_v35 = vadd.f32 %v526_v14, %v471_v20 }
 0x113   :  { %1090 = vperm.xlu0 %2293, %v2201_v33   ;;  %v652_v36 = vadd.f32 %v2976_v26, %v595_v63  ;;  %v653_v12 = vadd.f32 %v2979_v16, %v596_v38  ;;  %v606_v34 = vadd.f32 %v604_v25, %v549_v52  ;;  %v607_v47 = vadd.f32 %v605_v13, %v550_v23 }
 0x114   :  { %v3064_v19 = vpop.permute.xlu2 %761  ;;  %v666_v59 = vpop.permute.xlu1 %665  ;;  %v585_v43 = vadd.f32 %v583_v37, %v528_v35 }
 0x115   :  { %v670_v15 = vsel %vm669_vm6, %v666_v59, %v2886_v22  ;;  %v671_v41 = vsel %vm669_vm6, %v2886_v22, %v666_v59  ;;  %v683_v18 = vpop.permute.xlu0 %682  ;;  %v2202_v22 = vld [vmem:[%s3757_s1 + $0x238] sm:$0xff]  ;;  %v663_v58 = vadd.f32 %v3040_v30, %v606_v34  ;;  %v2205_v30 = vld [vmem:[%s3757_s1 + $0x250] sm:$0xff]  ;;  %vm3776_vm6 = vcmp.lt.s32.totalorder %v2648_v48, 1 }
 0x116   :  { %v676_v51 = vsel %vm35_vm1, %v671_v41, 0.0  ;;  %v677_v10 = vsel %vm3789_vm3, %v670_v15, 0.0  ;;  %v642_v4 = vadd.f32 %v3037_v45, %v585_v43 }
 0x117   :  { %v707_v9 = vmul.f32 %v2955_v39, %v676_v51  ;;  %v708_v2 = vmul.f32 %v2955_v39, %v677_v10  ;;  %v685_v1 = vmul.f32 %v683_v18, %v676_v51  ;;  %v686_v29 = vmul.f32 %v683_v18, %v677_v10  ;;  %v2206_v18 = vld [vmem:[%s3757_s1 + $0x258] sm:$0xff] }
 0x118   :  { %v584_v39 = vadd.f32 %v582_v61, %v527_v62 }
 0x119   :  { %v687_v11 = vadd.f32 %v685_v1, %v630_v46  ;;  %v688_v26 = vadd.f32 %v686_v29, %v631_v50  ;;  %v709_v33 = vadd.f32 %v707_v9, %v652_v36  ;;  %v710_v16 = vadd.f32 %v708_v2, %v653_v12  ;;  %v3121_v12 = vld [vmem:[%s3758_s0] sm:$0xff] }
 0x11a   :  { %1108 = vrot.lane.b32.xlu2 %v2367_v3, %s2316_s12  ;;  %1101 = vperm.xlu1 %2291, %v2202_v22   ;;  %v641_v8 = vadd.f32 %v3035_v24, %v584_v39  ;;  %v664_v3 = vadd.f32 %v3042_v32, %v607_v47  ;;  %v2203_v24 = vld [vmem:[%s3757_s1 + $0x240] sm:$0xff]  ;;  %v2209_v39 = vld [vmem:[%s3757_s1 + $0x270] sm:$0xff] }
 0x11b   :  { %1110 = vrot.lane.b32.xlu0 %v2379_v6, %s2316_s12  ;;  %v2204_v6 = vld [vmem:[%s3757_s1 + $0x248] sm:$0xff] }
 0x11c   :  { %v795_v20 = vpop.permute.xlu2 %794  ;;  %v694_v27 = vpop.permute.xlu1 %693 }
 0x11d   :  { %v696_v55 = vmul.f32 %v694_v27, %v676_v51  ;;  %v697_v31 = vmul.f32 %v694_v27, %v677_v10  ;;  %v716_v44 = vpop.permute.xlu0 %715  ;;  %v797_v25 = vmul.f32 %v3121_v12, %v795_v20 }
 0x11e   :  { %v718_v14 = vmul.f32 %v716_v44, %v676_v51  ;;  %v719_v40 = vmul.f32 %v716_v44, %v677_v10 }
 0x11f   :  { %v698_v57 = vadd.f32 %v696_v55, %v641_v8  ;;  %v699_v17 = vadd.f32 %v697_v31, %v642_v4 }
 0x120   :  { %v720_v45 = vadd.f32 %v718_v14, %v663_v58  ;;  %v721_v54 = vadd.f32 %v719_v40, %v664_v3  ;;  %v2210_v3 = vld [vmem:[%s3757_s1 + $0x278] sm:$0xff] }
 0x122   :  { %1136 = vperm.xlu2 %2292, %v2204_v6   ;;  %1125 = vperm.xlu1 %2291, %v2203_v24  }
 0x123   :  { %1147 = vperm.xlu0 %2293, %v2205_v30  }
 0x124   :  { %v3101_v32 = vpop.permute.xlu2 %823  ;;  %v723_v53 = vpop.permute.xlu1 %722 }
 0x125   :  { %v727_v63 = vsel %vm3776_vm6, %v723_v53, %v3031_v28  ;;  %v728_v38 = vsel %vm3776_vm6, %v3031_v28, %v723_v53  ;;  %v740_v61 = vpop.permute.xlu0 %739  ;;  %vm3777_vm6 = vcmp.lt.s32.totalorder %v2648_v48, 127 }
 0x126   :  { %v733_v37 = vsel %vm3785_vm5, %v728_v38, 0.0  ;;  %v734_v59 = vsel %vm3784_vm7, %v727_v63, 0.0 }
 0x127   :  { %v764_v46 = vmul.f32 %v3064_v19, %v733_v37  ;;  %v765_v50 = vmul.f32 %v3064_v19, %v734_v59  ;;  %v742_v15 = vmul.f32 %v740_v61, %v733_v37  ;;  %v743_v41 = vmul.f32 %v740_v61, %v734_v59  ;;  %v3127_v19 = vld [vmem:[%s3758_s0 + $0x8] sm:$0xff] }
 0x128   :  { %v798_v13 = vmul.f32 %v3127_v19, %v795_v20 }
 0x129   :  { %v744_v51 = vadd.f32 %v742_v15, %v687_v11  ;;  %v745_v10 = vadd.f32 %v743_v41, %v688_v26  ;;  %v766_v28 = vadd.f32 %v764_v46, %v709_v33  ;;  %v767_v36 = vadd.f32 %v765_v50, %v710_v16  ;;  %v2208_v33 = vld [vmem:[%s3757_s1 + $0x268] sm:$0xff]  ;;  %v2207_v16 = vld [vmem:[%s3757_s1 + $0x260] sm:$0xff] }
 0x12a   :  { %1165 = vrot.lane.b32.xlu2 %v3121_v12, %s2317_s28  ;;  %1158 = vperm.xlu1 %2291, %v2206_v18  }
 0x12b   :  { %1167 = vrot.lane.b32.xlu0 %v3127_v19, %s2317_s28 }
 0x12c   :  { %v852_v9 = vpop.permute.xlu2 %851  ;;  %v751_v2 = vpop.permute.xlu1 %750 }
 0x12d   :  { %v753_v1 = vmul.f32 %v751_v2, %v733_v37  ;;  %v754_v29 = vmul.f32 %v751_v2, %v734_v59  ;;  %v773_v22 = vpop.permute.xlu0 %772 }
 0x12e   :  { %v775_v62 = vmul.f32 %v773_v22, %v733_v37  ;;  %v776_v35 = vmul.f32 %v773_v22, %v734_v59  ;;  %v2212_v37 = vld [vmem:[%s3757_s1 + $0x288] sm:$0xff]  ;;  %v2211_v59 = vld [vmem:[%s3757_s1 + $0x280] sm:$0xff] }
 0x12f   :  { %v755_v11 = vadd.f32 %v753_v1, %v698_v57  ;;  %v756_v26 = vadd.f32 %v754_v29, %v699_v17 }
 0x130   :  { %v777_v52 = vadd.f32 %v775_v62, %v720_v45  ;;  %v778_v23 = vadd.f32 %v776_v35, %v721_v54 }
 0x131   :  { %v799_v43 = vadd.f32 %v797_v25, %v755_v11  ;;  %v800_v34 = vadd.f32 %v798_v13, %v756_v26 }
 0x132   :  { %1193 = vperm.xlu2 %2292, %v2208_v33   ;;  %1182 = vperm.xlu1 %2291, %v2207_v16  }
 0x133   :  { %1204 = vperm.xlu0 %2293, %v2209_v39  }
 0x134   :  { %v881_v47 = vpop.permute.xlu2 %880  ;;  %v784_v20 = vpop.permute.xlu1 %783 }
 0x135   :  { %v786_v27 = vmul.f32 %v3121_v12, %v784_v20  ;;  %v787_v8 = vmul.f32 %v3127_v19, %v784_v20  ;;  %v806_v4 = vpop.permute.xlu0 %805  ;;  %v2216_v20 = vld [vmem:[%s3757_s1 + $0x2a8] sm:$0xff] }
 0x136   :  { %v808_v55 = vmul.f32 %v3121_v12, %v806_v4  ;;  %v809_v31 = vmul.f32 %v3127_v19, %v806_v4 }
 0x137   :  { %v788_v44 = vadd.f32 %v786_v27, %v744_v51  ;;  %v789_v58 = vadd.f32 %v787_v8, %v745_v10  ;;  %v2215_v27 = vld [vmem:[%s3757_s1 + $0x2a0] sm:$0xff] }
 0x138   :  { %v810_v14 = vadd.f32 %v808_v55, %v766_v28  ;;  %v811_v40 = vadd.f32 %v809_v31, %v767_v36 }
 0x13a   :  { %1222 = vrot.lane.b32.xlu2 %v3121_v12, %s2318_s20  ;;  %1215 = vperm.xlu1 %2291, %v2210_v3  }
 0x13b   :  { %1224 = vrot.lane.b32.xlu0 %v3127_v19, %s2318_s20 }
 0x13c   :  { %v909_v57 = vpop.permute.xlu2 %908  ;;  %v817_v17 = vpop.permute.xlu1 %816 }
 0x13d   :  { %v819_v6 = vmul.f32 %v3121_v12, %v817_v17  ;;  %v820_v24 = vmul.f32 %v3127_v19, %v817_v17  ;;  %v826_v45 = vpop.permute.xlu0 %825 }
 0x13e   :  { %v828_v54 = vsel %vm3777_vm6, %v3101_v32, %v826_v45  ;;  %v829_v30 = vsel %vm3777_vm6, %v826_v45, %v3101_v32  ;;  %v2213_v32 = vld [vmem:[%s3757_s1 + $0x290] sm:$0xff]  ;;  %vm884_vm6 = vcmp.lt.s32.totalorder %v2648_v48, 126 }
 0x13f   :  { %v821_v53 = vadd.f32 %v819_v6, %v777_v52  ;;  %v822_v63 = vadd.f32 %v820_v24, %v778_v23  ;;  %v834_v38 = vsel %vm3788_vm13, %v828_v54, 0.0  ;;  %v835_v61 = vsel %vm3787_vm14, %v829_v30, 0.0 }
 0x140   :  { %v854_v46 = vmul.f32 %v852_v9, %v834_v38  ;;  %v855_v50 = vmul.f32 %v852_v9, %v835_v61  ;;  %v2214_v9 = vld [vmem:[%s3757_s1 + $0x298] sm:$0xff] }
 0x142   :  { %v856_v15 = vadd.f32 %v854_v46, %v799_v43  ;;  %v857_v41 = vadd.f32 %v855_v50, %v800_v34  ;;  %1250 = vperm.xlu2 %2292, %v2212_v37   ;;  %1239 = vperm.xlu1 %2291, %v2211_v59  }
 0x143   :  { %1261 = vperm.xlu0 %2293, %v2213_v32  }
 0x144   :  { %v3172_v18 = vpop.permute.xlu2 %937  ;;  %v841_v51 = vpop.permute.xlu1 %840 }
 0x145   :  { %v843_v10 = vmul.f32 %v841_v51, %v834_v38  ;;  %v844_v28 = vmul.f32 %v841_v51, %v835_v61  ;;  %v863_v36 = vpop.permute.xlu0 %862  ;;  %v2220_v51 = vld [vmem:[%s3757_s1 + $0x2c8] sm:$0xff] }
 0x146   :  { %v865_v2 = vmul.f32 %v863_v36, %v834_v38  ;;  %v866_v1 = vmul.f32 %v863_v36, %v835_v61 }
 0x147   :  { %v845_v29 = vadd.f32 %v843_v10, %v788_v44  ;;  %v846_v22 = vadd.f32 %v844_v28, %v789_v58  ;;  %v2219_v10 = vld [vmem:[%s3757_s1 + $0x2c0] sm:$0xff] }
 0x148   :  { %v867_v62 = vadd.f32 %v865_v2, %v810_v14  ;;  %v868_v35 = vadd.f32 %v866_v1, %v811_v40  ;;  %v2221_v2 = vld [vmem:[%s3757_s1 + $0x2d0] sm:$0xff] }
 0x14a   :  { %1279 = vrot.lane.b32.xlu2 %v3121_v12, %s2319_s8  ;;  %1272 = vperm.xlu1 %2291, %v2214_v9  }
 0x14b   :  { %1281 = vrot.lane.b32.xlu0 %v3127_v19, %s2319_s8 }
 0x14c   :  { %v966_v25 = vpop.permute.xlu2 %965  ;;  %v874_v13 = vpop.permute.xlu1 %873 }
 0x14d   :  { %v876_v11 = vmul.f32 %v874_v13, %v834_v38  ;;  %v877_v26 = vmul.f32 %v874_v13, %v835_v61  ;;  %v883_v33 = vpop.permute.xlu0 %882 }
 0x14e   :  { %v885_v16 = vsel %vm884_vm6, %v881_v47, %v883_v33  ;;  %v886_v52 = vsel %vm884_vm6, %v883_v33, %v881_v47  ;;  %v2217_v47 = vld [vmem:[%s3757_s1 + $0x2b0] sm:$0xff]  ;;  %vm3790_vm6 = vcmp.lt.s32.totalorder %v2666_v5, 15 }
 0x14f   :  { %v878_v23 = vadd.f32 %v876_v11, %v821_v53  ;;  %v879_v39 = vadd.f32 %v877_v26, %v822_v63  ;;  %v891_v43 = vsel %vm3830_vm8, %v885_v16, 0.0  ;;  %v892_v34 = vsel %vm3792_vm10, %v886_v52, 0.0  ;;  %vm64_vm15 = vmand %vm3790_vm6, %vm3789_vm3 }
 0x150   :  { %v911_v8 = vmul.f32 %v909_v57, %v891_v43  ;;  %v912_v4 = vmul.f32 %v909_v57, %v892_v34  ;;  %v2218_v57 = vld [vmem:[%s3757_s1 + $0x2b8] sm:$0xff]  ;;  %vm3791_vm8 = vcmp.lt.s32.totalorder %v2661_v60, 15  ;;  %vm70_vm3 = vmand %vm3790_vm6, %vm3792_vm10 }
 0x151   :  { %vm63_vm4 = vmand %vm3791_vm8, %vm35_vm1 }
 0x152   :  { %v913_v55 = vadd.f32 %v911_v8, %v856_v15  ;;  %v914_v31 = vadd.f32 %v912_v4, %v857_v41  ;;  %1307 = vperm.xlu2 %2292, %v2216_v20   ;;  %1296 = vperm.xlu1 %2291, %v2215_v27  }
 0x153   :  { %1318 = vperm.xlu0 %2293, %v2217_v47  }
 0x154   :  { %v3193_v44 = vpop.permute.xlu2 %994  ;;  %v898_v58 = vpop.permute.xlu1 %897 }
 0x155   :  { %v900_v3 = vmul.f32 %v898_v58, %v891_v43  ;;  %v901_v14 = vmul.f32 %v898_v58, %v892_v34  ;;  %v920_v40 = vpop.permute.xlu0 %919 }
 0x156   :  { %v922_v17 = vmul.f32 %v920_v40, %v891_v43  ;;  %v923_v6 = vmul.f32 %v920_v40, %v892_v34  ;;  %v2223_v40 = vld [vmem:[%s3757_s1 + $0x2e0] sm:$0xff] }
 0x157   :  { %v902_v24 = vadd.f32 %v900_v3, %v845_v29  ;;  %v903_v45 = vadd.f32 %v901_v14, %v846_v22  ;;  %v2224_v14 = vld [vmem:[%s3757_s1 + $0x2e8] sm:$0xff] }
 0x158   :  { %v924_v54 = vadd.f32 %v922_v17, %v867_v62  ;;  %v925_v30 = vadd.f32 %v923_v6, %v868_v35 }
 0x15a   :  { %1336 = vrot.lane.b32.xlu2 %v3121_v12, %s2320_s22  ;;  %1329 = vperm.xlu1 %2291, %v2218_v57  }
 0x15b   :  { %1338 = vrot.lane.b32.xlu0 %v3127_v19, %s2320_s22 }
 0x15c   :  { %v1023_v53 = vpop.permute.xlu2 %1022  ;;  %v931_v63 = vpop.permute.xlu1 %930 }
 0x15d   :  { %v933_v38 = vmul.f32 %v931_v63, %v891_v43  ;;  %v934_v61 = vmul.f32 %v931_v63, %v892_v34  ;;  %v940_v37 = vpop.permute.xlu0 %939 }
 0x15e   :  { %v942_v59 = vsel %vm941_vm12, %v3172_v18, %v940_v37  ;;  %v943_v46 = vsel %vm941_vm12, %v940_v37, %v3172_v18  ;;  %vm3233_vm12 = vmand %vm3791_vm8, %vm3785_vm5 }
 0x15f   :  { %v935_v50 = vadd.f32 %v933_v38, %v878_v23  ;;  %v936_v32 = vadd.f32 %v934_v61, %v879_v39  ;;  %v948_v15 = vsel %vm63_vm4, %v942_v59, 0.0  ;;  %v949_v41 = vsel %vm64_vm15, %v943_v46, 0.0  ;;  %vm3242_vm15 = vmand %vm3790_vm6, %vm3784_vm7 }
 0x160   :  { %v968_v28 = vmul.f32 %v966_v25, %v948_v15  ;;  %v969_v36 = vmul.f32 %v966_v25, %v949_v41  ;;  %v2222_v25 = vld [vmem:[%s3757_s1 + $0x2d8] sm:$0xff]  ;;  %vm3782_vm4 = vcmp.lt.s32.totalorder %v2648_v48, 113  ;;  %vm3786_vm7 = vcmp.lt.s32.totalorder %v2648_v48, 111  ;;  %vm3311_vm5 = vmand %vm3790_vm6, %vm3787_vm14 }
 0x162   :  { %v970_v1 = vadd.f32 %v968_v28, %v913_v55  ;;  %v971_v18 = vadd.f32 %v969_v36, %v914_v31  ;;  %1364 = vperm.xlu2 %2292, %v2220_v51   ;;  %1353 = vperm.xlu1 %2291, %v2219_v10  }
 0x163   :  { %1375 = vperm.xlu0 %2293, %v2221_v2  }
 0x164   :  { %v3222_v29 = vpop.permute.xlu2 %1051  ;;  %v955_v22 = vpop.permute.xlu1 %954 }
 0x165   :  { %v957_v9 = vmul.f32 %v955_v22, %v948_v15  ;;  %v958_v62 = vmul.f32 %v955_v22, %v949_v41  ;;  %v977_v35 = vpop.permute.xlu0 %976  ;;  %v2228_v22 = vld [vmem:[%s3757_s1 + $0x308] sm:$0xff] }
 0x166   :  { %v979_v13 = vmul.f32 %v977_v35, %v948_v15  ;;  %v980_v11 = vmul.f32 %v977_v35, %v949_v41 }
 0x167   :  { %v959_v26 = vadd.f32 %v957_v9, %v902_v24  ;;  %v960_v33 = vadd.f32 %v958_v62, %v903_v45  ;;  %v2227_v9 = vld [vmem:[%s3757_s1 + $0x300] sm:$0xff] }
 0x168   :  { %v981_v16 = vadd.f32 %v979_v13, %v924_v54  ;;  %v982_v52 = vadd.f32 %v980_v11, %v925_v30 }
 0x16a   :  { %1393 = vrot.lane.b32.xlu2 %v3121_v12, %s2321_s14  ;;  %1386 = vperm.xlu1 %2291, %v2222_v25  }
 0x16b   :  { %1395 = vrot.lane.b32.xlu0 %v3127_v19, %s2321_s14 }
 0x16c   :  { %v1080_v39 = vpop.permute.xlu2 %1079  ;;  %v988_v43 = vpop.permute.xlu1 %987 }
 0x16d   :  { %v990_v20 = vmul.f32 %v988_v43, %v948_v15  ;;  %v991_v27 = vmul.f32 %v988_v43, %v949_v41  ;;  %v997_v8 = vpop.permute.xlu0 %996 }
 0x16e   :  { %v999_v4 = vsel %vm3782_vm4, %v3193_v44, %v997_v8  ;;  %v1000_v47 = vsel %vm3782_vm4, %v997_v8, %v3193_v44  ;;  %v2225_v44 = vld [vmem:[%s3757_s1 + $0x2f0] sm:$0xff]  ;;  %vm3783_vm4 = vcmp.lt.s32.totalorder %v2648_v48, 112 }
 0x16f   :  { %v992_v55 = vadd.f32 %v990_v20, %v935_v50  ;;  %v993_v31 = vadd.f32 %v991_v27, %v936_v32  ;;  %v1005_v58 = vsel %vm3233_vm12, %v999_v4, 0.0  ;;  %v1006_v3 = vsel %vm3242_vm15, %v1000_v47, 0.0  ;;  %v2230_v4 = vld [vmem:[%s3757_s1 + $0x318] sm:$0xff] }
 0x170   :  { %v1025_v17 = vmul.f32 %v1023_v53, %v1005_v58  ;;  %v1026_v6 = vmul.f32 %v1023_v53, %v1006_v3  ;;  %v2226_v53 = vld [vmem:[%s3757_s1 + $0x2f8] sm:$0xff] }
 0x172   :  { %v1027_v24 = vadd.f32 %v1025_v17, %v970_v1  ;;  %v1028_v45 = vadd.f32 %v1026_v6, %v971_v18  ;;  %1421 = vperm.xlu2 %2292, %v2224_v14   ;;  %1410 = vperm.xlu1 %2291, %v2223_v40   ;;  %v3837_v14 = vmov 0 }
 0x173   :  { %1432 = vperm.xlu0 %2293, %v2225_v44   ;;  %v3838_v14 = vsel %vm3311_vm5, 4294967295, %v3837_v14 }
 0x174   :  { %v3265_v57 = vpop.permute.xlu2 %1108  ;;  %v1012_v54 = vpop.permute.xlu1 %1011 }
 0x175   :  { %v1014_v30 = vmul.f32 %v1012_v54, %v1005_v58  ;;  %v1015_v63 = vmul.f32 %v1012_v54, %v1006_v3  ;;  %v1034_v38 = vpop.permute.xlu0 %1033 }
 0x176   :  { %v1036_v61 = vmul.f32 %v1034_v38, %v1005_v58  ;;  %v1037_v37 = vmul.f32 %v1034_v38, %v1006_v3  ;;  %v1599_v38 = vld [vmem:[%s3760_s3] sm:$0xff] }
 0x177   :  { %v1016_v59 = vadd.f32 %v1014_v30, %v959_v26  ;;  %v1017_v46 = vadd.f32 %v1015_v63, %v960_v33 }
 0x178   :  { %v1038_v50 = vadd.f32 %v1036_v61, %v981_v16  ;;  %v1039_v32 = vadd.f32 %v1037_v37, %v982_v52 }
 0x17a   :  { %1450 = vrot.lane.b32.xlu2 %v3121_v12, %s2322_s25  ;;  %1443 = vperm.xlu1 %2291, %v2226_v53  }
 0x17b   :  { %1452 = vrot.lane.b32.xlu0 %v3127_v19, %s2322_s25 }
 0x17c   :  { %v1137_v15 = vpop.permute.xlu2 %1136  ;;  %v1045_v41 = vpop.permute.xlu1 %1044 }
 0x17d   :  { %v1047_v51 = vmul.f32 %v1045_v41, %v1005_v58  ;;  %v1048_v10 = vmul.f32 %v1045_v41, %v1006_v3  ;;  %v1054_v28 = vpop.permute.xlu0 %1053 }
 0x17e   :  { %v1056_v36 = vsel %vm3783_vm4, %v3222_v29, %v1054_v28  ;;  %v1057_v2 = vsel %vm3783_vm4, %v1054_v28, %v3222_v29  ;;  %v2229_v29 = vld [vmem:[%s3757_s1 + $0x310] sm:$0xff]  ;;  %vm3302_vm4 = vmand %vm3791_vm8, %vm3788_vm13  ;;  %vm1169_vm13 = vcmp.lt.s32.totalorder %v2648_v48, 110 }
 0x17f   :  { %v1049_v1 = vadd.f32 %v1047_v51, %v992_v55  ;;  %v1050_v12 = vadd.f32 %v1048_v10, %v993_v31  ;;  %v1062_v19 = vsel %vm3791_vm8, %v1056_v36, 0.0  ;;  %v1063_v18 = vsel %vm3790_vm6, %v1057_v2, 0.0  ;;  %v2233_v2 = vld [vmem:[%s3760_s3 + $0x18] sm:$0xff] }
 0x180   :  { %v1082_v62 = vmul.f32 %v1080_v39, %v1062_v19  ;;  %v1083_v35 = vmul.f32 %v1080_v39, %v1063_v18  ;;  %v1576_v39 = vld [vmem:[%s3759_s2] sm:$0xff]  ;;  %vm3840_vm6 = vcmp.ge.s32.totalorder %v2668_v7, 2 }
 0x182   :  { %v1084_v13 = vadd.f32 %v1082_v62, %v1027_v24  ;;  %v1085_v11 = vadd.f32 %v1083_v35, %v1028_v45  ;;  %1478 = vperm.xlu2 %2292, %v2228_v22   ;;  %1467 = vperm.xlu1 %2291, %v2227_v9  }
 0x183   :  { %1489 = vperm.xlu0 %2293, %v2229_v29  }
 0x184   :  { %v1166_v26 = vpop.permute.xlu2 %1165  ;;  %v1069_v33 = vpop.permute.xlu1 %1068 }
 0x185   :  { %v1071_v25 = vmul.f32 %v1069_v33, %v1062_v19  ;;  %v1072_v16 = vmul.f32 %v1069_v33, %v1063_v18  ;;  %v1091_v52 = vpop.permute.xlu0 %1090 }
 0x186   :  { %v1093_v43 = vmul.f32 %v1091_v52, %v1062_v19  ;;  %v1094_v20 = vmul.f32 %v1091_v52, %v1063_v18 }
 0x187   :  { %v1073_v27 = vadd.f32 %v1071_v25, %v1016_v59  ;;  %v1074_v8 = vadd.f32 %v1072_v16, %v1017_v46  ;;  %v2234_v25 = vld [vmem:[%s3760_s3 + $0x20] sm:$0xff] }
 0x188   :  { %v1095_v47 = vadd.f32 %v1093_v43, %v1038_v50  ;;  %v1096_v55 = vadd.f32 %v1094_v20, %v1039_v32 }
 0x18a   :  { %1579 = vperm.xlu2 %2292, %v1576_v39   ;;  %1500 = vperm.xlu1 %2291, %v2230_v4  }
 0x18c   :  { %v1194_v58 = vpop.permute.xlu2 %1193  ;;  %v1102_v3 = vpop.permute.xlu1 %1101 }
 0x18d   :  { %v1104_v40 = vmul.f32 %v1102_v3, %v1062_v19  ;;  %v1105_v17 = vmul.f32 %v1102_v3, %v1063_v18  ;;  %v1111_v6 = vpop.permute.xlu0 %1110 }
 0x18e   :  { %v1113_v44 = vsel %vm3786_vm7, %v3265_v57, %v1111_v6  ;;  %v1114_v24 = vsel %vm3786_vm7, %v1111_v6, %v3265_v57  ;;  %vm3839_vm7 = vcmp.lt.s32.totalorder %v2664_v0, 14 }
 0x18f   :  { %v1106_v45 = vadd.f32 %v1104_v40, %v1049_v1  ;;  %v1107_v54 = vadd.f32 %v1105_v17, %v1050_v12  ;;  %v1119_v30 = vsel %vm3302_vm4, %v1113_v44, 0.0  ;;  %v1120_v63 = vsel %vm3311_vm5, %v1114_v24, 0.0  ;;  %vm69_vm14 = vmand %vm3791_vm8, %vm3839_vm7  ;;  %v2237_v40 = vld [vmem:[%s3760_s3 + $0x38] sm:$0xff] }
 0x190   :  { %v1139_v61 = vmul.f32 %v1137_v15, %v1119_v30  ;;  %v1140_v37 = vmul.f32 %v1137_v15, %v1120_v63  ;;  %vm72_vm7 = vcmp.lt.s32.totalorder %v2666_v5, 14  ;;  %vm1397_vm5 = vcmp.lt.s32.totalorder %v2648_v48, 95 }
 0x191   :  { %vm74_vm8 = vmand %vm72_vm7, %vm3840_vm6 }
 0x192   :  { %v1141_v59 = vadd.f32 %v1139_v61, %v1084_v13  ;;  %v1142_v46 = vadd.f32 %v1140_v37, %v1085_v11  ;;  %1602 = vperm.xlu2 %2292, %v1599_v38   ;;  %v2238_v38 = vld [vmem:[%s3760_s3 + $0x40] sm:$0xff] }
 0x194   :  { %v1126_v53 = vpop.permute.xlu1 %1125  ;;  %v1223_v50 = vpop.permute.xlu2 %1222 }
 0x195   :  { %v1128_v57 = vmul.f32 %v1126_v53, %v1119_v30  ;;  %v1129_v32 = vmul.f32 %v1126_v53, %v1120_v63  ;;  %v1148_v41 = vpop.permute.xlu0 %1147 }
 0x196   :  { %v1150_v51 = vmul.f32 %v1148_v41, %v1119_v30  ;;  %v1151_v10 = vmul.f32 %v1148_v41, %v1120_v63 }
 0x197   :  { %v1130_v28 = vadd.f32 %v1128_v57, %v1073_v27  ;;  %v1131_v36 = vadd.f32 %v1129_v32, %v1074_v8 }
 0x198   :  { %v1152_v1 = vadd.f32 %v1150_v51, %v1095_v47  ;;  %v1153_v12 = vadd.f32 %v1151_v10, %v1096_v55 }
 0x19a   :  { %1635 = vperm.xlu2 %2292, %v2233_v2  }
 0x19c   :  { %v1159_v15 = vpop.permute.xlu1 %1158  ;;  %v3340_v35 = vpop.permute.xlu2 %1250 }
 0x19d   :  { %v1161_v19 = vmul.f32 %v1159_v15, %v1119_v30  ;;  %v1162_v18 = vmul.f32 %v1159_v15, %v1120_v63  ;;  %v1168_v22 = vpop.permute.xlu0 %1167 }
 0x19e   :  { %v1170_v9 = vsel %vm1169_vm13, %v1166_v26, %v1168_v22  ;;  %v1171_v62 = vsel %vm1169_vm13, %v1168_v22, %v1166_v26  ;;  %vm1226_vm13 = vcmp.lt.s32.totalorder %v2648_v48, 98  ;;  %v2245_v22 = vld [vmem:[%s3760_s3 + $0x78] sm:$0xff] }
 0x19f   :  { %v1163_v29 = vadd.f32 %v1161_v19, %v1106_v45  ;;  %v1164_v13 = vadd.f32 %v1162_v18, %v1107_v54  ;;  %v1176_v11 = vsel %vm69_vm14, %v1170_v9, 0.0  ;;  %v1177_v33 = vsel %vm70_vm3, %v1171_v62, 0.0 }
 0x1a0   :  { %v1196_v16 = vmul.f32 %v1194_v58, %v1176_v11  ;;  %v1197_v52 = vmul.f32 %v1194_v58, %v1177_v33  ;;  %vm71_vm3 = vcmp.lt.s32.totalorder %v2661_v60, 14 }
 0x1a1   :  { %vm73_vm14 = vmand %vm71_vm3, %vm35_vm1  ;;  %vm1283_vm1 = vcmp.lt.s32.totalorder %v2648_v48, 97 }
 0x1a2   :  { %v3345_v43 = vadd.f32 %v1196_v16, %v1141_v59  ;;  %v3347_v20 = vadd.f32 %v1197_v52, %v1142_v46  ;;  %1654 = vperm.xlu2 %2292, %v2234_v25  }
 0x1a4   :  { %v1183_v27 = vpop.permute.xlu1 %1182  ;;  %v1280_v6 = vpop.permute.xlu2 %1279 }
 0x1a5   :  { %v1185_v8 = vmul.f32 %v1183_v27, %v1176_v11  ;;  %v1186_v26 = vmul.f32 %v1183_v27, %v1177_v33  ;;  %v1205_v39 = vpop.permute.xlu0 %1204 }
 0x1a6   :  { %v1207_v4 = vmul.f32 %v1205_v39, %v1176_v11  ;;  %v1208_v47 = vmul.f32 %v1205_v39, %v1177_v33 }
 0x1a7   :  { %v1187_v55 = vadd.f32 %v1185_v8, %v1130_v28  ;;  %v1188_v3 = vadd.f32 %v1186_v26, %v1131_v36  ;;  %v2241_v36 = vld [vmem:[%s3760_s3 + $0x58] sm:$0xff] }
 0x1a8   :  { %v3352_v17 = vadd.f32 %v1207_v4, %v1152_v1  ;;  %v3354_v58 = vadd.f32 %v1208_v47, %v1153_v12  ;;  %v2242_v12 = vld [vmem:[%s3760_s3 + $0x60] sm:$0xff] }
 0x1aa   :  { %1687 = vperm.xlu2 %2292, %v2237_v40  }
 0x1ac   :  { %v1216_v44 = vpop.permute.xlu1 %1215  ;;  %v1308_v59 = vpop.permute.xlu2 %1307 }
 0x1ad   :  { %v1218_v24 = vmul.f32 %v1216_v44, %v1176_v11  ;;  %v1219_v45 = vmul.f32 %v1216_v44, %v1177_v33  ;;  %v1225_v54 = vpop.permute.xlu0 %1224 }
 0x1ae   :  { %v1227_v61 = vsel %vm1226_vm13, %v1223_v50, %v1225_v54  ;;  %v1228_v37 = vsel %vm1226_vm13, %v1225_v54, %v1223_v50  ;;  %vm1340_vm13 = vcmp.lt.s32.totalorder %v2648_v48, 96 }
 0x1af   :  { %v3359_v30 = vadd.f32 %v1218_v24, %v1163_v29  ;;  %v3361_v63 = vadd.f32 %v1219_v45, %v1164_v13  ;;  %v1233_v46 = vsel %vm73_vm14, %v1227_v61, 0.0  ;;  %v1234_v53 = vsel %vm74_vm8, %v1228_v37, 0.0  ;;  %v2248_v29 = vld [vmem:[%s3760_s3 + $0x90] sm:$0xff] }
 0x1b0   :  { %v1253_v52 = vmul.f32 %v3340_v35, %v1233_v46  ;;  %vm3841_vm8 = vcmp.ge.s32.totalorder %v2664_v0, 1  ;;  %v1254_v8 = vmul.f32 %v3340_v35, %v1234_v53  ;;  %vm3842_vm14 = vcmp.ge.s32.totalorder %v2668_v7, 1 }
 0x1b1   :  { %vm75_vm6 = vmand %vm71_vm3, %vm3841_vm8  ;;  %vm3843_vm8 = vcmp.lt.s32.totalorder %v2664_v0, 15 }
 0x1b2   :  { %1706 = vperm.xlu2 %2292, %v2238_v38   ;;  %vm76_vm10 = vmand %vm72_vm7, %vm3842_vm14  ;;  %v1255_v24 = vadd.f32 %v1253_v52, %v3345_v43  ;;  %v1256_v45 = vadd.f32 %v1254_v8, %v3347_v20 }
 0x1b3   :  { %vm3416_vm14 = vmand %vm71_vm3, %vm3843_vm8  ;;  %vm3852_vm8 = vcmp.lt.s32.totalorder %v2668_v7, 14 }
 0x1b4   :  { %v1240_v57 = vpop.permute.xlu1 %1239  ;;  %v1337_v1 = vpop.permute.xlu2 %1336 }
 0x1b5   :  { %v1242_v32 = vmul.f32 %v1240_v57, %v1233_v46  ;;  %v1243_v41 = vmul.f32 %v1240_v57, %v1234_v53  ;;  %v1262_v51 = vpop.permute.xlu0 %1261 }
 0x1b6   :  { %v1264_v26 = vmul.f32 %v1262_v51, %v1233_v46  ;;  %v1265_v47 = vmul.f32 %v1262_v51, %v1234_v53 }
 0x1b7   :  { %v3374_v10 = vadd.f32 %v1242_v32, %v1187_v55  ;;  %v3376_v28 = vadd.f32 %v1243_v41, %v1188_v3 }
 0x1b8   :  { %v1266_v35 = vadd.f32 %v1264_v26, %v3352_v17 }
 0x1ba   :  { %1739 = vperm.xlu2 %2292, %v2241_v36  }
 0x1bc   :  { %v1273_v2 = vpop.permute.xlu1 %1272  ;;  %v1365_v18 = vpop.permute.xlu2 %1364 }
 0x1bd   :  { %v1282_v50 = vpop.permute.xlu0 %1281  ;;  %v1276_v38 = vmul.f32 %v1273_v2, %v1234_v53  ;;  %v1267_v53 = vadd.f32 %v1265_v47, %v3354_v58 }
 0x1be   :  { %v1284_v39 = vsel %vm1283_vm1, %v1280_v6, %v1282_v50  ;;  %v1285_v4 = vsel %vm1283_vm1, %v1282_v50, %v1280_v6  ;;  %v1275_v6 = vmul.f32 %v1273_v2, %v1233_v46 }
 0x1bf   :  { %v1290_v55 = vsel %vm75_vm6, %v1284_v39, 0.0  ;;  %v1291_v3 = vsel %vm76_vm10, %v1285_v4, 0.0  ;;  %vm3846_vm10 = vcmp.lt.s32.totalorder %v2668_v7, 15  ;;  %v1278_v58 = vadd.f32 %v1276_v38, %v3361_v63 }
 0x1c0   :  { %vm3424_vm1 = vmand %vm72_vm7, %vm3846_vm10  ;;  %v1310_v61 = vmul.f32 %v1308_v59, %v1290_v55  ;;  %v1311_v37 = vmul.f32 %v1308_v59, %v1291_v3  ;;  %vm3849_vm6 = vcmp.lt.s32.totalorder %v2664_v0, 14 }
 0x1c2   :  { %1758 = vperm.xlu2 %2292, %v2242_v12  }
 0x1c4   :  { %v1297_v15 = vpop.permute.xlu1 %1296  ;;  %v1394_v13 = vpop.permute.xlu2 %1393 }
 0x1c5   :  { %v1319_v19 = vpop.permute.xlu0 %1318  ;;  %v1299_v41 = vmul.f32 %v1297_v15, %v1290_v55  ;;  %v1300_v51 = vmul.f32 %v1297_v15, %v1291_v3  ;;  %v1313_v15 = vadd.f32 %v1311_v37, %v1256_v45 }
 0x1c6   :  { %v1321_v36 = vmul.f32 %v1319_v19, %v1290_v55  ;;  %v1322_v50 = vmul.f32 %v1319_v19, %v1291_v3 }
 0x1c7   :  { %v1301_v19 = vadd.f32 %v1299_v41, %v3374_v10  ;;  %v1302_v26 = vadd.f32 %v1300_v51, %v3376_v28 }
 0x1c8   :  { %v1323_v47 = vadd.f32 %v1321_v36, %v1266_v35 }
 0x1ca   :  { %1791 = vperm.xlu2 %2292, %v2245_v22  }
 0x1cc   :  { %v1330_v9 = vpop.permute.xlu1 %1329  ;;  %v1422_v25 = vpop.permute.xlu2 %1421 }
 0x1cd   :  { %v1339_v62 = vpop.permute.xlu0 %1338  ;;  %v1332_v12 = vmul.f32 %v1330_v9, %v1290_v55  ;;  %v1324_v55 = vadd.f32 %v1322_v50, %v1267_v53 }
 0x1ce   :  { %v1341_v40 = vsel %vm1340_vm13, %v1337_v1, %v1339_v62  ;;  %v1342_v44 = vsel %vm1340_vm13, %v1339_v62, %v1337_v1  ;;  %v1277_v62 = vadd.f32 %v1275_v6, %v3359_v30  ;;  %vm3448_vm13 = vmand %vm71_vm3, %vm3849_vm6  ;;  %vm3854_vm6 = vcmp.lt.s32.totalorder %v2648_v48, 17 }
 0x1cf   :  { %v1347_v57 = vsel %vm71_vm3, %v1341_v40, 0.0  ;;  %v1348_v32 = vsel %vm72_vm7, %v1342_v44, 0.0 }
 0x1d0   :  { %v1368_v52 = vmul.f32 %v1365_v18, %v1348_v32  ;;  %v1334_v40 = vadd.f32 %v1332_v12, %v1277_v62 }
 0x1d2   :  { %1824 = vperm.xlu2 %2292, %v2248_v29   ;;  %v1333_v29 = vmul.f32 %v1330_v9, %v1291_v3 }
 0x1d4   :  { %v3390_v11 = vpop.permute.xlu1 %1353  ;;  %v1451_v2 = vpop.permute.xlu2 %1450  ;;  %v1335_v30 = vadd.f32 %v1333_v29, %v1278_v58 }
 0x1d5   :  { %v3392_v33 = vpop.permute.xlu0 %1375  ;;  %v1356_v8 = vmul.f32 %v3390_v11, %v1347_v57  ;;  %v1357_v63 = vmul.f32 %v3390_v11, %v1348_v32  ;;  %v3853_v11 = vlaneseq }
 0x1d6   :  { %v1379_v3 = vmul.f32 %v3392_v33, %v1348_v32 }
 0x1d7   :  { %v1358_v28 = vadd.f32 %v1356_v8, %v1301_v19  ;;  %v1359_v36 = vadd.f32 %v1357_v63, %v1302_v26 }
 0x1d8   :  { %v1381_v12 = vadd.f32 %v1379_v3, %v1324_v55 }
 0x1dc   :  { %v3395_v16 = vpop.permute.xlu1 %1386 }
 0x1dd   :  { %v1396_v27 = vpop.permute.xlu0 %1395  ;;  %v1389_v45 = vmul.f32 %v3395_v16, %v1347_v57  ;;  %v1390_v35 = vmul.f32 %v3395_v16, %v1348_v32 }
 0x1de   :  { %v1398_v20 = vsel %vm1397_vm5, %v1394_v13, %v1396_v27  ;;  %v1399_v17 = vsel %vm1397_vm5, %v1396_v27, %v1394_v13  ;;  %v1367_v13 = vmul.f32 %v1365_v18, %v1347_v57  ;;  %v1312_v27 = vadd.f32 %v1310_v61, %v1255_v24  ;;  %v1479_v61 = vpop.permute.xlu2 %1478 }
 0x1df   :  { %v1404_v22 = vsel %vm3416_vm14, %v1398_v20, 0.0  ;;  %v1405_v59 = vsel %vm3424_vm1, %v1399_v17, 0.0  ;;  %vm1454_vm5 = vcmp.lt.s32.totalorder %v2648_v48, 94  ;;  %v1370_v18 = vadd.f32 %v1368_v52, %v1313_v15  ;;  %vm80_vm14 = vmand %vm72_vm7, %vm3852_vm8 }
 0x1e0   :  { %v1424_v39 = vmul.f32 %v1422_v25, %v1404_v22  ;;  %v1425_v4 = vmul.f32 %v1422_v25, %v1405_v59  ;;  %v1369_v9 = vadd.f32 %v1367_v13, %v1312_v27  ;;  %v1378_v25 = vmul.f32 %v3392_v33, %v1347_v57 }
 0x1e1   :  { %v82_v24 = vshrl.u32 %v3853_v11, 7  ;;  %v1392_v29 = vadd.f32 %v1390_v35, %v1335_v30  ;;  %vm3858_vm8 = vcmp.ge.s32.totalorder %v2661_v60, 1 }
 0x1e2   :  { %v1426_v54 = vadd.f32 %v1424_v39, %v1369_v9  ;;  %v1427_v6 = vadd.f32 %v1425_v4, %v1370_v18  ;;  %v1380_v50 = vadd.f32 %v1378_v25, %v1323_v47 }
 0x1e3   :  { %v3473_v62 = vand.u32 3, %v82_v24 }
 0x1e4   :  { %v1411_v46 = vpop.permute.xlu1 %1410 }
 0x1e5   :  { %v1433_v1 = vpop.permute.xlu0 %1432  ;;  %v1413_v43 = vmul.f32 %v1411_v46, %v1404_v22  ;;  %v1414_v20 = vmul.f32 %v1411_v46, %v1405_v59  ;;  %vm1533_vm3 = vcmp.eq.s32.totalorder %v3473_v62, 1  ;;  %vm1552_vm7 = vcmp.eq.s32.totalorder %v3473_v62, 2 }
 0x1e6   :  { %v1435_v37 = vmul.f32 %v1433_v1, %v1404_v22  ;;  %v1436_v53 = vmul.f32 %v1433_v1, %v1405_v59  ;;  %vm1571_vm10 = vcmp.eq.s32.totalorder %v3473_v62, 3  ;;  %v2297_v62 = vld [vmem:[%s3758_s0 + $0x8] sm:$0xff] }
 0x1e7   :  { %v1415_v52 = vadd.f32 %v1413_v43, %v1358_v28  ;;  %v1416_v58 = vadd.f32 %v1414_v20, %v1359_v36 }
 0x1e8   :  { %v1437_v27 = vadd.f32 %v1435_v37, %v1380_v50  ;;  %v1438_v15 = vadd.f32 %v1436_v53, %v1381_v12 }
 0x1ec   :  { %v1444_v44 = vpop.permute.xlu1 %1443 }
 0x1ed   :  { %v1453_v38 = vpop.permute.xlu0 %1452  ;;  %v1446_v16 = vmul.f32 %v1444_v44, %v1404_v22  ;;  %v1447_v32 = vmul.f32 %v1444_v44, %v1405_v59 }
 0x1ee   :  { %v1455_v33 = vsel %vm1454_vm5, %v1451_v2, %v1453_v38  ;;  %v1456_v17 = vsel %vm1454_vm5, %v1453_v38, %v1451_v2  ;;  %v1391_v2 = vadd.f32 %v1389_v45, %v1334_v40 }
 0x1ef   :  { %v3467_v41 = vsel %vm3448_vm13, %v1455_v33, 0.0  ;;  %v3469_v57 = vsel %vm80_vm14, %v1456_v17, 0.0  ;;  %v1449_v22 = vadd.f32 %v1447_v32, %v1392_v29  ;;  %vm3855_vm13 = vmmov %vm3854_vm6  ;;  %vm3859_vm14 = vcmp.ge.s32.totalorder %v2666_v5, 1 }
 0x1f0   :  { %v1481_v51 = vmul.f32 %v1479_v61, %v3467_v41  ;;  %v1482_v46 = vmul.f32 %v1479_v61, %v3469_v57  ;;  %v1448_v8 = vadd.f32 %v1446_v16, %v1391_v2 }
 0x1f2   :  { %v1483_v1 = vadd.f32 %v1481_v51, %v1426_v54  ;;  %v1484_v13 = vadd.f32 %v1482_v46, %v1427_v6 }
 0x1f4   :  { %v1519_v59 = vrot.slane %v1483_v1, 1  ;;  %v1520_v19 = vrot.slane %v1484_v13, 1  ;;  %v1468_v39 = vpop.permute.xlu1 %1467  ;;  %v1523_v4 = vrot.slane %v1483_v1, 2  ;;  %v1524_v9 = vrot.slane %v1484_v13, 2 }
 0x1f5   :  { %v1470_v26 = vmul.f32 %v1468_v39, %v3467_v41  ;;  %v1471_v47 = vmul.f32 %v1468_v39, %v3469_v57  ;;  %v1490_v55 = vpop.permute.xlu0 %1489  ;;  %v1527_v10 = vrot.slane %v1483_v1, 3  ;;  %v1528_v28 = vrot.slane %v1484_v13, 3 }
 0x1f6   :  { %v1521_v40 = vadd.f32 %v1519_v59, %v1483_v1  ;;  %v1522_v30 = vadd.f32 %v1520_v19, %v1484_v13  ;;  %v1492_v18 = vmul.f32 %v1490_v55, %v3467_v41  ;;  %v1493_v63 = vmul.f32 %v1490_v55, %v3469_v57 }
 0x1f7   :  { %v1472_v25 = vadd.f32 %v1470_v26, %v1415_v52  ;;  %v1473_v3 = vadd.f32 %v1471_v47, %v1416_v58 }
 0x1f8   :  { %v1525_v44 = vadd.f32 %v1523_v4, %v1521_v40  ;;  %v1526_v11 = vadd.f32 %v1524_v9, %v1522_v30  ;;  %v1494_v24 = vadd.f32 %v1492_v18, %v1437_v27  ;;  %v1495_v45 = vadd.f32 %v1493_v63, %v1438_v15 }
 0x1f9   :  { %v1507_v35 = vrot.slane %v1472_v25, 1  ;;  %v1508_v54 = vrot.slane %v1473_v3, 1  ;;  %v1511_v6 = vrot.slane %v1472_v25, 2  ;;  %v1512_v38 = vrot.slane %v1473_v3, 2 }
 0x1fa   :  { %v1529_v43 = vadd.f32 %v1527_v10, %v1525_v44  ;;  %v1530_v20 = vadd.f32 %v1528_v28, %v1526_v11  ;;  %v1515_v33 = vrot.slane %v1472_v25, 3  ;;  %v1516_v17 = vrot.slane %v1473_v3, 3 }
 0x1fb   :  { %v1509_v61 = vadd.f32 %v1507_v35, %v1472_v25  ;;  %v1510_v37 = vadd.f32 %v1508_v54, %v1473_v3  ;;  %v1538_v53 = vrot.slane %v1494_v24, 1  ;;  %v1539_v16 = vrot.slane %v1495_v45, 1 }
 0x1fc   :  { %v1531_v32 = vrot.slane %v1529_v43, 7  ;;  %v1532_v51 = vrot.slane %v1530_v20, 7  ;;  %v1542_v46 = vrot.slane %v1494_v24, 2  ;;  %v1543_v36 = vrot.slane %v1495_v45, 2  ;;  %v1501_v50 = vpop.permute.xlu1 %1500 }
 0x1fd   :  { %v1513_v12 = vadd.f32 %v1511_v6, %v1509_v61  ;;  %v1514_v2 = vadd.f32 %v1512_v38, %v1510_v37  ;;  %v1540_v29 = vadd.f32 %v1538_v53, %v1494_v24  ;;  %v1541_v1 = vadd.f32 %v1539_v16, %v1495_v45  ;;  %v1580_v38 = vpop.permute.xlu2 %1579 }
 0x1fe   :  { %v1546_v13 = vrot.slane %v1494_v24, 3  ;;  %v1547_v52 = vrot.slane %v1495_v45, 3  ;;  %v1503_v58 = vmul.f32 %v1501_v50, %v3467_v41  ;;  %v1504_v27 = vmul.f32 %v1501_v50, %v3469_v57  ;;  %v2256_v50 = vld [vmem:[%s3760_s3 + $0xd0] sm:$0xff] }
 0x1ff   :  { %v1517_v15 = vadd.f32 %v1515_v33, %v1513_v12  ;;  %v1518_v59 = vadd.f32 %v1516_v17, %v1514_v2  ;;  %v1544_v19 = vadd.f32 %v1542_v46, %v1540_v29  ;;  %v1545_v39 = vadd.f32 %v1543_v36, %v1541_v1  ;;  %v2232_v46 = vld [vmem:[%s3760_s3 + $0x10] sm:$0xff]  ;;  %v2231_v36 = vld [vmem:[%s3760_s3 + $0x8] sm:$0xff] }
 0x200   :  { %v1505_v4 = vadd.f32 %v1503_v58, %v1448_v8  ;;  %v1506_v9 = vadd.f32 %v1504_v27, %v1449_v22  ;;  %v3495_v43 = vstv %s3761_s5  ;;  %v2236_v12 = vld [vmem:[%s3760_s3 + $0x30] sm:$0xff]  ;;  %v2235_v2 = vld [vmem:[%s3760_s3 + $0x28] sm:$0xff] }
 0x201   :  { %v1536_v26 = vsel %vm1533_vm3, %v1531_v32, %v1517_v15  ;;  %v1537_v47 = vsel %vm1533_vm3, %v1532_v51, %v1518_v59  ;;  %v1548_v55 = vadd.f32 %v1546_v13, %v1544_v19  ;;  %v1549_v40 = vadd.f32 %v1547_v52, %v1545_v39  ;;  %v2252_v51 = vld [vmem:[%s3760_s3 + $0xb0] sm:$0xff]  ;;  %v2239_v1 = vld [vmem:[%s3760_s3 + $0x48] sm:$0xff]  ;;  %v2261_v13 = vld [vmem:[%s3760_s3 + $0xf8] sm:$0xff] }
 0x202   :  { %v1557_v30 = vrot.slane %v1505_v4, 1  ;;  %v1558_v41 = vrot.slane %v1506_v9, 1  ;;  %v1561_v28 = vrot.slane %v1505_v4, 2  ;;  %v1562_v25 = vrot.slane %v1506_v9, 2  ;;  %v2240_v29 = vld [vmem:[%s3760_s3 + $0x50] sm:$0xff]  ;;  %v2262_v52 = vld [vmem:[%s3760_s3 + $0x100] sm:$0xff] }
 0x203   :  { %v1550_v18 = vrot.slane %v1548_v55, 6  ;;  %v1551_v57 = vrot.slane %v1549_v40, 6  ;;  %v1565_v11 = vrot.slane %v1505_v4, 3  ;;  %v1566_v24 = vrot.slane %v1506_v9, 3  ;;  %v2244_v58 = vld [vmem:[%s3760_s3 + $0x70] sm:$0xff]  ;;  %v2243_v27 = vld [vmem:[%s3760_s3 + $0x68] sm:$0xff] }
 0x204   :  { %v1559_v63 = vadd.f32 %v1557_v30, %v1505_v4  ;;  %v1560_v10 = vadd.f32 %v1558_v41, %v1506_v9  ;;  %v2247_v15 = vld [vmem:[%s3760_s3 + $0x88] sm:$0xff]  ;;  %v2246_v59 = vld [vmem:[%s3760_s3 + $0x80] sm:$0xff]  ;;  %v2249_v19 = vld [vmem:[%s3760_s3 + $0x98] sm:$0xff] }
 0x205   :  { %v1555_v8 = vsel %vm1552_vm7, %v1550_v18, %v1536_v26  ;;  %v1556_v22 = vsel %vm1552_vm7, %v1551_v57, %v1537_v47  ;;  %v2251_v39 = vld [vmem:[%s3760_s3 + $0xa8] sm:$0xff]  ;;  %v1603_v4 = vpop.permute.xlu2 %1602  ;;  %v2250_v9 = vld [vmem:[%s3760_s3 + $0xa0] sm:$0xff]  ;;  %v2253_v26 = vld [vmem:[%s3760_s3 + $0xb8] sm:$0xff] }
 0x206   :  { %v1563_v3 = vadd.f32 %v1561_v28, %v1559_v63  ;;  %v1564_v44 = vadd.f32 %v1562_v25, %v1560_v10  ;;  %v2255_v55 = vld [vmem:[%s3760_s3 + $0xc8] sm:$0xff]  ;;  %v2254_v40 = vld [vmem:[%s3760_s3 + $0xc0] sm:$0xff]  ;;  %v2257_v41 = vld [vmem:[%s3760_s3 + $0xd8] sm:$0xff] }
 0x207   :  { %v2259_v57 = vld [vmem:[%s3760_s3 + $0xe8] sm:$0xff] }
 0x208   :  { %v1567_v45 = vadd.f32 %v1565_v11, %v1563_v3  ;;  %v1568_v35 = vadd.f32 %v1566_v24, %v1564_v44  ;;  %v2260_v3 = vld [vmem:[%s3760_s3 + $0xf0] sm:$0xff] }
 0x20a   :  { %v1569_v54 = vrot.slane %v1567_v45, 5  ;;  %v1570_v6 = vrot.slane %v1568_v35, 5 }
 0x20c   :  { %v1574_v20 = vsel %vm1571_vm10, %v1569_v54, %v1555_v8  ;;  %v1575_v33 = vsel %vm1571_vm10, %v1570_v6, %v1556_v22  ;;  %v2258_v8 = vld [vmem:[%s3760_s3 + $0xe0] sm:$0xff] }
 0x20d   :  { %v1582_v17 = vadd.f32 %v1580_v38, %v1574_v20  ;;  %v1583_v61 = vadd.f32 %v1580_v38, %v1575_v33  ;;  %v1636_v47 = vpop.permute.xlu2 %1635  ;;  %v2264_v20 = vld [vmem:[%s3760_s3 + $0x110] sm:$0xff]  ;;  %v2263_v33 = vld [vmem:[%s3760_s3 + $0x108] sm:$0xff] }
 0x20f   :  { %vm1584_vm1 = vcmp.gt.f32.partialorder %v1582_v17, 0.0  ;;  %vm1585_vm5 = vcmp.gt.f32.partialorder %v1583_v61, 0.0  ;;  %v1587_v37 = vmul.f32 %v3495_v43, %v1582_v17  ;;  %v1588_v53 = vmul.f32 %v3495_v43, %v1583_v61 }
 0x211   :  { %v3503_v16 = vsel %vm1584_vm1, %v1582_v17, %v1587_v37  ;;  %v3505_v32 = vsel %vm1585_vm5, %v1583_v61, %v1588_v53  ;;  %vm3860_vm1 = vcmp.lt.s32.totalorder %v2648_v48, 15 }
 0x212   :  { %1844 = vrot.lane.b32.xlu2 %v3505_v32, %s2311_s26  ;;  %1593 = vrot.lane.b32.xlu1 %v3505_v32, %s2305_s9  ;;  %vm3861_vm5 = vmmov %vm3860_vm1 }
 0x213   :  { %1591 = vrot.lane.b32.xlu0 %v3503_v16, %s2305_s9 }
 0x215   :  { %v1655_v30 = vpop.permute.xlu2 %1654 }
 0x21a   :  { %1876 = vperm.xlu2 %2292, %v2252_v51   ;;  %1624 = vperm.xlu1 %2291, %v2232_v46  }
 0x21b   :  { %1613 = vperm.xlu0 %2293, %v2231_v36  }
 0x21d   :  { %v1688_v18 = vpop.permute.xlu2 %1687 }
 0x222   :  { %1896 = vrot.lane.b32.xlu2 %v3505_v32, %s2314_s13  ;;  %1644 = vrot.lane.b32.xlu1 %v3505_v32, %s2306_s18 }
 0x223   :  { %1642 = vrot.lane.b32.xlu0 %v3503_v16, %s2306_s18 }
 0x225   :  { %v1707_v22 = vpop.permute.xlu2 %1706 }
 0x22a   :  { %1928 = vperm.xlu2 %2292, %v2256_v50   ;;  %1676 = vperm.xlu1 %2291, %v2236_v12  }
 0x22b   :  { %1665 = vperm.xlu0 %2293, %v2235_v2   ;;  %v2110_v2 = vld [vmem:[%s3762_s4] sm:$0xff] }
 0x22d   :  { %v1740_v17 = vpop.permute.xlu2 %1739 }
 0x232   :  { %1948 = vrot.lane.b32.xlu2 %v3505_v32, %s2315_s23  ;;  %1696 = vrot.lane.b32.xlu1 %v3505_v32, %s2307_s27 }
 0x233   :  { %1694 = vrot.lane.b32.xlu0 %v3503_v16, %s2307_s27 }
 0x23a   :  { %2000 = vrot.lane.b32.xlu2 %v3505_v32, %s2316_s12  ;;  %1728 = vperm.xlu1 %2291, %v2240_v29  }
 0x23b   :  { %1717 = vperm.xlu0 %2293, %v2239_v1  }
 0x242   :  { %1991 = vperm.xlu2 %2292, %v2261_v13   ;;  %1748 = vrot.lane.b32.xlu1 %v3505_v32, %s2310_s10 }
 0x243   :  { %1746 = vrot.lane.b32.xlu0 %v3503_v16, %s2310_s10 }
 0x24a   :  { %2010 = vperm.xlu2 %2292, %v2262_v52   ;;  %1780 = vperm.xlu1 %2291, %v2244_v58   ;;  %v2265_v58 = vld [vmem:[%s3760_s3 + $0x118] sm:$0xff] }
 0x24b   :  { %1769 = vperm.xlu0 %2293, %v2243_v27  }
 0x252   :  { %1813 = vperm.xlu1 %2291, %v2247_v15  }
 0x253   :  { %1802 = vperm.xlu0 %2293, %v2246_v59  }
 0x25a   :  { %1842 = vrot.lane.b32.xlu1 %v3503_v16, %s2311_s26 }
 0x25b   :  { %1835 = vperm.xlu0 %2293, %v2249_v19  }
 0x262   :  { %1865 = vperm.xlu1 %2291, %v2251_v39   ;;  %v1759_v39 = vpop.permute.xlu2 %1758 }
 0x263   :  { %1854 = vperm.xlu0 %2293, %v2250_v9  }
 0x26a   :  { %1894 = vrot.lane.b32.xlu1 %v3503_v16, %s2314_s13 }
 0x26b   :  { %1887 = vperm.xlu0 %2293, %v2253_v26  }
 0x272   :  { %1917 = vperm.xlu1 %2291, %v2255_v55  }
 0x273   :  { %1906 = vperm.xlu0 %2293, %v2254_v40  }
 0x27a   :  { %1946 = vrot.lane.b32.xlu1 %v3503_v16, %s2315_s23 }
 0x27b   :  { %1939 = vperm.xlu0 %2293, %v2257_v41  }
 0x282   :  { %1998 = vrot.lane.b32.xlu1 %v3503_v16, %s2316_s12 }
 0x283   :  { %1969 = vperm.xlu0 %2293, %v2259_v57  }
 0x284   :  { %v1594_v63 = vpop.permute.xlu1 %1593 }
 0x285   :  { %v1592_v10 = vpop.permute.xlu0 %1591 }
 0x286   :  { %v1595_v28 = vsel %vm3854_vm6, %v1592_v10, %v1594_v63  ;;  %v1596_v25 = vsel %vm3855_vm13, %v1594_v63, %v1592_v10  ;;  %vm3864_vm6 = vcmp.ge.s32.totalorder %v2664_v0, 1  ;;  %vm3865_vm13 = vcmp.ge.s32.totalorder %v2668_v7, 1 }
 0x287   :  { %v1597_v44 = vsel %vm2900_vm11, %v1596_v25, 0.0  ;;  %v1598_v11 = vsel %vm2910_vm0, %v1595_v28, 0.0  ;;  %vm3856_vm11 = vcmp.lt.s32.totalorder %v2648_v48, 16  ;;  %v1792_v28 = vpop.permute.xlu2 %1791 }
 0x288   :  { %v1605_v61 = vmul.f32 %v1603_v4, %v1597_v44  ;;  %v1606_v37 = vmul.f32 %v1603_v4, %v1598_v11  ;;  %vm3857_vm0 = vmmov %vm3856_vm11  ;;  %v1638_v46 = vmul.f32 %v1636_v47, %v1597_v44  ;;  %v1639_v36 = vmul.f32 %v1636_v47, %v1598_v11 }
 0x28a   :  { %1958 = vperm.xlu1 %2291, %v2258_v8  }
 0x28b   :  { %1980 = vperm.xlu0 %2293, %v2260_v3  }
 0x28c   :  { %v1625_v24 = vpop.permute.xlu1 %1624 }
 0x28d   :  { %v1627_v45 = vmul.f32 %v1625_v24, %v1597_v44  ;;  %v1628_v35 = vmul.f32 %v1625_v24, %v1598_v11  ;;  %v1614_v54 = vpop.permute.xlu0 %1613 }
 0x28e   :  { %v1616_v6 = vmul.f32 %v1614_v54, %v1597_v44  ;;  %v1617_v38 = vmul.f32 %v1614_v54, %v1598_v11 }
 0x292   :  { %2032 = vperm.xlu1 %2291, %v2264_v20  }
 0x293   :  { %2021 = vperm.xlu0 %2293, %v2263_v33  }
 0x294   :  { %v1645_v49 = vpop.permute.xlu1 %1644 }
 0x295   :  { %v1643_v21 = vpop.permute.xlu0 %1642 }
 0x296   :  { %v1646_v53 = vsel %vm3856_vm11, %v1643_v21, %v1645_v49  ;;  %v1647_v51 = vsel %vm3857_vm0, %v1645_v49, %v1643_v21  ;;  %vm3866_vm11 = vcmp.lt.s32.totalorder %v2648_v48, 127 }
 0x297   :  { %v1648_v50 = vsel %vm3858_vm8, %v1647_v51, 0.0  ;;  %v1649_v12 = vsel %vm3859_vm14, %v1646_v53, 0.0  ;;  %vm3867_vm0 = vmmov %vm3866_vm11  ;;  %vm3868_vm8 = vcmp.lt.s32.totalorder %v2664_v0, 15  ;;  %vm3869_vm14 = vcmp.lt.s32.totalorder %v2668_v7, 15 }
 0x298   :  { %v1657_v29 = vmul.f32 %v1655_v30, %v1648_v50  ;;  %v1658_v1 = vmul.f32 %v1655_v30, %v1649_v12  ;;  %v1690_v13 = vmul.f32 %v1688_v18, %v1648_v50  ;;  %v1691_v52 = vmul.f32 %v1688_v18, %v1649_v12 }
 0x29a   :  { %v1659_v27 = vadd.f32 %v1657_v29, %v1605_v61  ;;  %v1660_v15 = vadd.f32 %v1658_v1, %v1606_v37  ;;  %v1692_v59 = vadd.f32 %v1690_v13, %v1638_v46  ;;  %v1693_v19 = vadd.f32 %v1691_v52, %v1639_v36  ;;  %2113 = vperm.xlu1 %2291, %v2110_v2   ;;  %v1825_v46 = vpop.permute.xlu2 %1824 }
 0x29b   :  { %2043 = vperm.xlu0 %2293, %v2265_v58  }
 0x29c   :  { %v1677_v4 = vpop.permute.xlu1 %1676 }
 0x29d   :  { %v1679_v9 = vmul.f32 %v1677_v4, %v1648_v50  ;;  %v1680_v26 = vmul.f32 %v1677_v4, %v1649_v12  ;;  %v1666_v47 = vpop.permute.xlu0 %1665 }
 0x29e   :  { %v1668_v55 = vmul.f32 %v1666_v47, %v1648_v50  ;;  %v1669_v40 = vmul.f32 %v1666_v47, %v1649_v12 }
 0x29f   :  { %v1681_v30 = vadd.f32 %v1679_v9, %v1627_v45  ;;  %v1682_v41 = vadd.f32 %v1680_v26, %v1628_v35 }
 0x2a0   :  { %v1670_v18 = vadd.f32 %v1668_v55, %v1616_v6  ;;  %v1671_v57 = vadd.f32 %v1669_v40, %v1617_v38 }
 0x2a2   :  { %v1845_v1 = vpop.permute.xlu2 %1844 }
 0x2a4   :  { %v1697_v63 = vpop.permute.xlu1 %1696 }
 0x2a5   :  { %v1695_v10 = vpop.permute.xlu0 %1694 }
 0x2a6   :  { %v1698_v25 = vsel %vm3860_vm1, %v1695_v10, %v1697_v63  ;;  %v1699_v8 = vsel %vm3861_vm5, %v1697_v63, %v1695_v10  ;;  %vm3870_vm1 = vcmp.lt.s32.totalorder %v2648_v48, 113 }
 0x2a7   :  { %v1700_v3 = vsel %vm2992_vm9, %v1699_v8, 0.0  ;;  %v1701_v44 = vsel %vm3002_vm2, %v1698_v25, 0.0  ;;  %vm3862_vm9 = vcmp.lt.s32.totalorder %v2648_v48, 1  ;;  %vm3871_vm5 = vmmov %vm3870_vm1 }
 0x2a8   :  { %v1709_v11 = vmul.f32 %v1707_v22, %v1700_v3  ;;  %v1710_v24 = vmul.f32 %v1707_v22, %v1701_v44  ;;  %v1742_v45 = vmul.f32 %v1740_v17, %v1700_v3  ;;  %v1743_v35 = vmul.f32 %v1740_v17, %v1701_v44  ;;  %vm3863_vm2 = vmmov %vm3862_vm9 }
 0x2aa   :  { %v1711_v54 = vadd.f32 %v1709_v11, %v1659_v27  ;;  %v1712_v6 = vadd.f32 %v1710_v24, %v1660_v15  ;;  %v1744_v38 = vadd.f32 %v1742_v45, %v1692_v59  ;;  %v1745_v20 = vadd.f32 %v1743_v35, %v1693_v19  ;;  %v1877_v10 = vpop.permute.xlu2 %1876 }
 0x2ac   :  { %v1729_v33 = vpop.permute.xlu1 %1728 }
 0x2ad   :  { %v1731_v49 = vmul.f32 %v1729_v33, %v1700_v3  ;;  %v1732_v21 = vmul.f32 %v1729_v33, %v1701_v44  ;;  %v1718_v61 = vpop.permute.xlu0 %1717 }
 0x2ae   :  { %v1720_v37 = vmul.f32 %v1718_v61, %v1700_v3  ;;  %v1721_v53 = vmul.f32 %v1718_v61, %v1701_v44 }
 0x2af   :  { %v1733_v51 = vadd.f32 %v1731_v49, %v1681_v30  ;;  %v1734_v42 = vadd.f32 %v1732_v21, %v1682_v41 }
 0x2b0   :  { %v1722_v36 = vadd.f32 %v1720_v37, %v1670_v18  ;;  %v1723_v56 = vadd.f32 %v1721_v53, %v1671_v57 }
 0x2b2   :  { %v1897_v11 = vpop.permute.xlu2 %1896 }
 0x2b4   :  { %v1749_v50 = vpop.permute.xlu1 %1748 }
 0x2b5   :  { %v1747_v12 = vpop.permute.xlu0 %1746 }
 0x2b6   :  { %v1750_v22 = vsel %vm3862_vm9, %v1747_v12, %v1749_v50  ;;  %v1751_v17 = vsel %vm3863_vm2, %v1749_v50, %v1747_v12  ;;  %vm3872_vm9 = vcmp.lt.s32.totalorder %v2648_v48, 112 }
 0x2b7   :  { %v1752_v2 = vsel %vm3864_vm6, %v1751_v17, 0.0  ;;  %v1753_v29 = vsel %vm3865_vm13, %v1750_v22, 0.0  ;;  %vm3873_vm2 = vmmov %vm3872_vm9  ;;  %vm3874_vm6 = vcmp.lt.s32.totalorder %v2648_v48, 111 }
 0x2b8   :  { %v1761_v13 = vmul.f32 %v1759_v39, %v1752_v2  ;;  %v1762_v52 = vmul.f32 %v1759_v39, %v1753_v29  ;;  %v1794_v58 = vmul.f32 %v1792_v28, %v1752_v2  ;;  %v1795_v27 = vmul.f32 %v1792_v28, %v1753_v29  ;;  %vm3875_vm13 = vmmov %vm3874_vm6 }
 0x2ba   :  { %v1763_v15 = vadd.f32 %v1761_v13, %v1711_v54  ;;  %v1764_v59 = vadd.f32 %v1762_v52, %v1712_v6  ;;  %v1796_v19 = vadd.f32 %v1794_v58, %v1744_v38  ;;  %v1797_v4 = vadd.f32 %v1795_v27, %v1745_v20  ;;  %v1929_v6 = vpop.permute.xlu2 %1928 }
 0x2bc   :  { %v1781_v9 = vpop.permute.xlu1 %1780 }
 0x2bd   :  { %v1783_v26 = vmul.f32 %v1781_v9, %v1752_v2  ;;  %v1784_v47 = vmul.f32 %v1781_v9, %v1753_v29  ;;  %v1770_v55 = vpop.permute.xlu0 %1769 }
 0x2be   :  { %v1772_v40 = vmul.f32 %v1770_v55, %v1752_v2  ;;  %v1773_v30 = vmul.f32 %v1770_v55, %v1753_v29  ;;  %v1827_v2 = vmul.f32 %v1825_v46, %v3503_v16  ;;  %v1828_v29 = vmul.f32 %v1825_v46, %v3505_v32 }
 0x2bf   :  { %v1785_v41 = vadd.f32 %v1783_v26, %v1733_v51  ;;  %v1786_v18 = vadd.f32 %v1784_v47, %v1734_v42 }
 0x2c0   :  { %v1774_v57 = vadd.f32 %v1772_v40, %v1722_v36  ;;  %v1775_v63 = vadd.f32 %v1773_v30, %v1723_v56 }
 0x2c1   :  { %v1829_v27 = vadd.f32 %v1827_v2, %v1785_v41 }
 0x2c2   :  { %v1949_v33 = vpop.permute.xlu2 %1948 }
 0x2c4   :  { %v1814_v25 = vpop.permute.xlu1 %1813 }
 0x2c5   :  { %v1803_v8 = vpop.permute.xlu0 %1802  ;;  %v1816_v36 = vmul.f32 %v1814_v25, %v3503_v16  ;;  %v1817_v56 = vmul.f32 %v1814_v25, %v3505_v32 }
 0x2c6   :  { %v1805_v39 = vmul.f32 %v1803_v8, %v3503_v16  ;;  %v1806_v28 = vmul.f32 %v1803_v8, %v3505_v32 }
 0x2c7   :  { %v1819_v9 = vadd.f32 %v1817_v56, %v1775_v63 }
 0x2c8   :  { %v1807_v3 = vadd.f32 %v1805_v39, %v1763_v15  ;;  %v1808_v44 = vadd.f32 %v1806_v28, %v1764_v59  ;;  %v1830_v15 = vadd.f32 %v1828_v29, %v1786_v18  ;;  %v1818_v59 = vadd.f32 %v1816_v36, %v1774_v57 }
 0x2ca   :  { %v2001_v61 = vpop.permute.xlu2 %2000 }
 0x2cc   :  { %v1843_v24 = vpop.permute.xlu1 %1842 }
 0x2cd   :  { %v1836_v45 = vpop.permute.xlu0 %1835  ;;  %v1846_v51 = vsel %vm3866_vm11, %v1843_v24, %v1845_v1  ;;  %v1847_v42 = vsel %vm3867_vm0, %v1845_v1, %v1843_v24  ;;  %vm3878_vm11 = vnez %v3838_v14 }
 0x2ce   :  { %v1848_v50 = vsel %vm3868_vm8, %v1846_v51, 0.0  ;;  %v1849_v12 = vsel %vm3869_vm14, %v1847_v42, 0.0  ;;  %v1838_v22 = vmul.f32 %v1836_v45, %v3503_v16  ;;  %v1839_v17 = vmul.f32 %v1836_v45, %v3505_v32 }
 0x2cf   :  { %v1879_v1 = vmul.f32 %v1877_v10, %v1848_v50  ;;  %v1880_v52 = vmul.f32 %v1877_v10, %v1849_v12 }
 0x2d0   :  { %v1840_v47 = vadd.f32 %v1838_v22, %v1796_v19  ;;  %v1841_v16 = vadd.f32 %v1839_v17, %v1797_v4 }
 0x2d1   :  { %v1882_v39 = vadd.f32 %v1880_v52, %v1830_v15  ;;  %v1881_v41 = vadd.f32 %v1879_v1, %v1829_v27 }
 0x2d2   :  { %v3675_v13 = vpop.permute.xlu2 %1991 }
 0x2d4   :  { %v1866_v35 = vpop.permute.xlu1 %1865 }
 0x2d5   :  { %v1855_v54 = vpop.permute.xlu0 %1854  ;;  %v1868_v55 = vmul.f32 %v1866_v35, %v1848_v50  ;;  %v1869_v32 = vmul.f32 %v1866_v35, %v1849_v12 }
 0x2d6   :  { %v1857_v46 = vmul.f32 %v1855_v54, %v1848_v50  ;;  %v1858_v40 = vmul.f32 %v1855_v54, %v1849_v12 }
 0x2d7   :  { %v1870_v57 = vadd.f32 %v1868_v55, %v1818_v59  ;;  %v1871_v63 = vadd.f32 %v1869_v32, %v1819_v9 }
 0x2d8   :  { %v1860_v24 = vadd.f32 %v1858_v40, %v1808_v44 }
 0x2dc   :  { %v1895_v38 = vpop.permute.xlu1 %1894 }
 0x2dd   :  { %v1888_v20 = vpop.permute.xlu0 %1887  ;;  %v1898_v58 = vsel %vm3870_vm1, %v1895_v38, %v1897_v11  ;;  %v1899_v0 = vsel %vm3871_vm5, %v1897_v11, %v1895_v38  ;;  %v1859_v11 = vadd.f32 %v1857_v46, %v1807_v3 }
 0x2de   :  { %v1900_v30 = vsel %vm3233_vm12, %v1898_v58, 0.0  ;;  %v1901_v10 = vsel %vm3242_vm15, %v1899_v0, 0.0  ;;  %v1890_v34 = vmul.f32 %v1888_v20, %v1848_v50  ;;  %v1891_v28 = vmul.f32 %v1888_v20, %v1849_v12 }
 0x2df   :  { %v1931_v45 = vmul.f32 %v1929_v6, %v1900_v30  ;;  %v1932_v35 = vmul.f32 %v1929_v6, %v1901_v10  ;;  %vm3876_vm12 = vcmp.lt.s32.totalorder %v2661_v60, 15  ;;  %vm3877_vm15 = vcmp.lt.s32.totalorder %v2666_v5, 15 }
 0x2e0   :  { %v1892_v60 = vadd.f32 %v1890_v34, %v1840_v47  ;;  %v1893_v51 = vadd.f32 %v1891_v28, %v1841_v16 }
 0x2e1   :  { %v1934_v0 = vadd.f32 %v1932_v35, %v1882_v39 }
 0x2e4   :  { %v3657_v49 = vpop.permute.xlu1 %1917 }
 0x2e5   :  { %v1907_v21 = vpop.permute.xlu0 %1906  ;;  %v1920_v5 = vmul.f32 %v3657_v49, %v1900_v30  ;;  %v1921_v42 = vmul.f32 %v3657_v49, %v1901_v10 }
 0x2e6   :  { %v1909_v25 = vmul.f32 %v1907_v21, %v1900_v30  ;;  %v1910_v8 = vmul.f32 %v1907_v21, %v1901_v10 }
 0x2e7   :  { %v1922_v58 = vadd.f32 %v1920_v5, %v1870_v57  ;;  %v1923_v49 = vadd.f32 %v1921_v42, %v1871_v63 }
 0x2e8   :  { %v1911_v20 = vadd.f32 %v1909_v25, %v1859_v11  ;;  %v1912_v3 = vadd.f32 %v1910_v8, %v1860_v24 }
 0x2ec   :  { %v1947_v37 = vpop.permute.xlu1 %1946 }
 0x2ed   :  { %v3659_v53 = vpop.permute.xlu0 %1939  ;;  %v1950_v18 = vsel %vm3872_vm9, %v1947_v37, %v1949_v33  ;;  %v1951_v19 = vsel %vm3873_vm2, %v1949_v33, %v1947_v37  ;;  %v2011_v37 = vpop.permute.xlu2 %2010 }
 0x2ee   :  { %v1952_v54 = vsel %vm3876_vm12, %v1950_v18, 0.0  ;;  %v1953_v38 = vsel %vm3877_vm15, %v1951_v19, 0.0  ;;  %v1942_v50 = vmul.f32 %v3659_v53, %v1900_v30  ;;  %v1943_v12 = vmul.f32 %v3659_v53, %v1901_v10 }
 0x2ef   :  { %v1994_v59 = vmul.f32 %v3675_v13, %v1952_v54  ;;  %v1995_v53 = vmul.f32 %v3675_v13, %v1953_v38 }
 0x2f0   :  { %v1944_v9 = vadd.f32 %v1942_v50, %v1892_v60 }
 0x2f2   :  { %v1996_v28 = vadd.f32 %v1994_v59, %v1944_v9 }
 0x2f4   :  { %v1999_v7 = vpop.permute.xlu1 %1998 }
 0x2f5   :  { %v1970_v26 = vpop.permute.xlu0 %1969  ;;  %v2002_v4 = vsel %vm3874_vm6, %v1999_v7, %v2001_v61  ;;  %v2003_v23 = vsel %vm3875_vm13, %v2001_v61, %v1999_v7  ;;  %v1933_v7 = vadd.f32 %v1931_v45, %v1881_v41 }
 0x2f6   :  { %v3699_v33 = vsel %vm3302_vm4, %v2002_v4, 0.0  ;;  %v3703_v48 = vsel %vm3878_vm11, %v2003_v23, 0.0  ;;  %v1972_v22 = vmul.f32 %v1970_v26, %v1952_v54  ;;  %v1973_v17 = vmul.f32 %v1970_v26, %v1953_v38 }
 0x2f7   :  { %v2013_v31 = vmul.f32 %v2011_v37, %v3699_v33  ;;  %v2014_v36 = vmul.f32 %v2011_v37, %v3703_v48  ;;  %v1945_v26 = vadd.f32 %v1943_v12, %v1893_v51 }
 0x2f8   :  { %v1974_v47 = vadd.f32 %v1972_v22, %v1922_v58  ;;  %v1975_v16 = vadd.f32 %v1973_v17, %v1923_v49 }
 0x2f9   :  { %v1997_v11 = vadd.f32 %v1995_v53, %v1945_v26 }
 0x2fc   :  { %v1959_v21 = vpop.permute.xlu1 %1958 }
 0x2fd   :  { %v1961_v44 = vmul.f32 %v1959_v21, %v1952_v54  ;;  %v1962_v61 = vmul.f32 %v1959_v21, %v1953_v38  ;;  %v1981_v6 = vpop.permute.xlu0 %1980 }
 0x2fe   :  { %v1983_v1 = vmul.f32 %v1981_v6, %v1952_v54  ;;  %v1984_v52 = vmul.f32 %v1981_v6, %v1953_v38 }
 0x2ff   :  { %v1963_v14 = vadd.f32 %v1961_v44, %v1911_v20  ;;  %v1964_v56 = vadd.f32 %v1962_v61, %v1912_v3 }
 0x300   :  { %v1985_v32 = vadd.f32 %v1983_v1, %v1933_v7  ;;  %v1986_v46 = vadd.f32 %v1984_v52, %v1934_v0 }
 0x301   :  { %v3711_v2 = vadd.f32 %v2013_v31, %v1963_v14  ;;  %v3713_v29 = vadd.f32 %v2014_v36, %v1964_v56 }
 0x303   :  { %v2050_v27 = vrot.slane %v3711_v2, 1  ;;  %v2051_v15 = vrot.slane %v3713_v29, 1  ;;  %v2054_v19 = vrot.slane %v3711_v2, 2  ;;  %v2055_v4 = vrot.slane %v3713_v29, 2 }
 0x304   :  { %v2033_v55 = vpop.permute.xlu1 %2032  ;;  %v2058_v49 = vrot.slane %v3711_v2, 3  ;;  %v2059_v0 = vrot.slane %v3713_v29, 3 }
 0x305   :  { %v2035_v40 = vmul.f32 %v2033_v55, %v3699_v33  ;;  %v2036_v30 = vmul.f32 %v2033_v55, %v3703_v48  ;;  %v2022_v10 = vpop.permute.xlu0 %2021  ;;  %v2052_v25 = vadd.f32 %v2050_v27, %v3711_v2  ;;  %v2053_v8 = vadd.f32 %v2051_v15, %v3713_v29 }
 0x306   :  { %v2024_v39 = vmul.f32 %v2022_v10, %v3699_v33  ;;  %v2025_v13 = vmul.f32 %v2022_v10, %v3703_v48 }
 0x307   :  { %v2037_v41 = vadd.f32 %v2035_v40, %v1985_v32  ;;  %v2038_v18 = vadd.f32 %v2036_v30, %v1986_v46  ;;  %v2056_v24 = vadd.f32 %v2054_v19, %v2052_v25  ;;  %v2057_v45 = vadd.f32 %v2055_v4, %v2053_v8 }
 0x308   :  { %v2026_v23 = vadd.f32 %v2024_v39, %v1974_v47  ;;  %v2027_v57 = vadd.f32 %v2025_v13, %v1975_v16 }
 0x309   :  { %v2078_v63 = vrot.slane %v2037_v41, 1  ;;  %v2079_v34 = vrot.slane %v2038_v18, 1  ;;  %v2082_v35 = vrot.slane %v2037_v41, 2  ;;  %v2083_v54 = vrot.slane %v2038_v18, 2 }
 0x30a   :  { %v2062_v20 = vrot.slane %v2026_v23, 1  ;;  %v2063_v3 = vrot.slane %v2027_v57, 1  ;;  %v2086_v44 = vrot.slane %v2037_v41, 3  ;;  %v2087_v61 = vrot.slane %v2038_v18, 3 }
 0x30b   :  { %v2080_v38 = vadd.f32 %v2078_v63, %v2037_v41  ;;  %v2081_v21 = vadd.f32 %v2079_v34, %v2038_v18  ;;  %v2066_v6 = vrot.slane %v2026_v23, 2  ;;  %v2067_v37 = vrot.slane %v2027_v57, 2 }
 0x30c   :  { %v2064_v5 = vadd.f32 %v2062_v20, %v2026_v23  ;;  %v2065_v42 = vadd.f32 %v2063_v3, %v2027_v57  ;;  %v2070_v36 = vrot.slane %v2026_v23, 3  ;;  %v2071_v14 = vrot.slane %v2027_v57, 3  ;;  %v2114_v4 = vpop.permute.xlu1 %2113 }
 0x30d   :  { %v2084_v60 = vadd.f32 %v2082_v35, %v2080_v38  ;;  %v2085_v51 = vadd.f32 %v2083_v54, %v2081_v21  ;;  %v2044_v31 = vpop.permute.xlu0 %2043  ;;  %v2060_v26 = vadd.f32 %v2058_v49, %v2056_v24  ;;  %v2296_v35 = vld [vmem:[%s3758_s0] sm:$0xff] }
 0x30e   :  { %v2046_v56 = vmul.f32 %v2044_v31, %v3699_v33  ;;  %v2047_v50 = vmul.f32 %v2044_v31, %v3703_v48  ;;  %v2068_v17 = vadd.f32 %v2066_v6, %v2064_v5  ;;  %v2069_v1 = vadd.f32 %v2067_v37, %v2065_v42 }
 0x30f   :  { %v2088_v12 = vadd.f32 %v2086_v44, %v2084_v60  ;;  %v2089_v22 = vadd.f32 %v2087_v61, %v2085_v51  ;;  %v2061_v33 = vadd.f32 %v2059_v0, %v2057_v45 }
 0x310   :  { %v2048_v52 = vadd.f32 %v2046_v56, %v1996_v28  ;;  %v2049_v58 = vadd.f32 %v2047_v50, %v1997_v11  ;;  %v2072_v7 = vadd.f32 %v2070_v36, %v2068_v17  ;;  %v2073_v27 = vadd.f32 %v2071_v14, %v2069_v1 }
 0x311   :  { %v2090_v15 = vrot.slane %v2088_v12, 6  ;;  %v2091_v59 = vrot.slane %v2089_v22, 6 }
 0x312   :  { %v2094_v53 = vrot.slane %v2048_v52, 1  ;;  %v2095_v9 = vrot.slane %v2049_v58, 1  ;;  %v2074_v47 = vrot.slane %v2072_v7, 7  ;;  %v2075_v48 = vrot.slane %v2073_v27, 7 }
 0x313   :  { %v2098_v32 = vrot.slane %v2048_v52, 2  ;;  %v2099_v46 = vrot.slane %v2049_v58, 2  ;;  %v2102_v29 = vrot.slane %v2048_v52, 3  ;;  %v2103_v30 = vrot.slane %v2049_v58, 3 }
 0x314   :  { %v2096_v16 = vadd.f32 %v2094_v53, %v2048_v52  ;;  %v2097_v55 = vadd.f32 %v2095_v9, %v2049_v58  ;;  %v2076_v40 = vsel %vm1533_vm3, %v2074_v47, %v2060_v26  ;;  %v2077_v2 = vsel %vm1533_vm3, %v2075_v48, %v2061_v33 }
 0x315   :  { %v2093_v10 = vsel %vm1552_vm7, %v2091_v59, %v2077_v2  ;;  %v2092_v25 = vsel %vm1552_vm7, %v2090_v15, %v2076_v40 }
 0x316   :  { %v2100_v8 = vadd.f32 %v2098_v32, %v2096_v16  ;;  %v2101_v39 = vadd.f32 %v2099_v46, %v2097_v55 }
 0x318   :  { %v2104_v13 = vadd.f32 %v2102_v29, %v2100_v8  ;;  %v2105_v41 = vadd.f32 %v2103_v30, %v2101_v39 }
 0x31a   :  { %v2106_v18 = vrot.slane %v2104_v13, 5  ;;  %v2107_v19 = vrot.slane %v2105_v41, 5 }
 0x31c   :  { %v2108_v23 = vsel %vm1571_vm10, %v2106_v18, %v2092_v25  ;;  %v2109_v57 = vsel %vm1571_vm10, %v2107_v19, %v2093_v10 }
 0x31d   :  { %v2116_v63 = vadd.f32 %v2114_v4, %v2108_v23  ;;  %v2117_v34 = vadd.f32 %v2114_v4, %v2109_v57 }
 0x31f   :  { %vm2118_vm4 = vcmp.gt.f32.partialorder %v2116_v63, 0.0  ;;  %vm2119_vm3 = vcmp.gt.f32.partialorder %v2117_v34, 0.0  ;;  %v2120_v28 = vmul.f32 %v2116_v63, %v3495_v43  ;;  %v2121_v11 = vmul.f32 %v2117_v34, %v3495_v43 }
 0x321   :  { %v2122_v24 = vsel %vm2118_vm4, %v2116_v63, %v2120_v28  ;;  %v2123_v45 = vsel %vm2119_vm3, %v2117_v34, %v2121_v11 }
 0x322   :  { %v2124_v54 = vadd.f32 %v2296_v35, %v2122_v24  ;;  %v2125_v38 = vadd.f32 %v2297_v62, %v2123_v45 }
 0x324   :  { %2126 = vst [vmem:[%s3763_s6] sm:$0xff] %v2124_v54 }
 0x325   :  { %2127 = vst [vmem:[%s3763_s6 + $0x8] sm:$0xff] %v2125_v38 }

</bundles_post_ra>
